<compile_context>
chip_gen: v7x
topology: tpu7x:2x2x1
jax: 0.10.0
libtpu: 0.0.40
codegen_flags: <defaults>
</compile_context>

<pallas_src>
import jax
import jax.numpy as jnp
from jax import lax
from jax.experimental import pallas as pl
from jax.experimental.pallas import tpu as pltpu

K = 7
PAD = (K - 1) // 2
_LANE_TILE = 1024            # lane-tile width of the pooling loop (8 f32 vregs)


def _vmem_capacity_bytes():
    try:
        return int(pltpu.get_tpu_info().vmem_capacity_bytes)
    except Exception:
        return 64 << 20      # conservative fallback = v7x per-TensorCore VMEM


def _choose_c_block(C, HW, itemsize, vmem_cap):
    """Channel-block size: large enough to amortize per-grid-step overhead, capped
    so a double-buffered input block stays well inside every generation's VMEM."""
    budget = min(12 << 20, max(1 << 20, vmem_cap // 6))
    max_c = max(1, budget // max(1, HW * itemsize))
    if C <= 8:
        return C                                   # block dim == full channel axis
    if C % 8 == 0 and max_c >= C:
        return C                                   # whole channel axis in one block
    return max(8, (min(C, max_c) // 8) * 8)        # multiple of 8 (< C), masked tail


def spatial_gate(x, weight, *, channels_per_block=None):
    """x: (N, C, H, W); weight: (1, 2, K, K) float32 (OIHW, like nn.Conv2d)."""
    N, C, H, W = x.shape
    HW = H * W
    Hp, Wp = H + 2 * PAD, W + 2 * PAD

    vmem_cap = _vmem_capacity_bytes()
    c_blk = (channels_per_block if channels_per_block is not None
             else _choose_c_block(C, HW, x.dtype.itemsize, vmem_cap))
    assert c_blk == C or (c_blk % 8 == 0 and c_blk <= C)
    n_c = -(-C // c_blk)
    need_mask = (C % c_blk) != 0                   # only the last block has OOB channels
    acc_rows = min(8, c_blk)                       # sublane height of the running max/sum
    n_grp = c_blk // acc_rows                      # exact 8-row groups by construction

    # Fold the 1/C of the channel mean into the mean-plane conv weights so the
    # kernel only ever accumulates a plain channel sum (never divides).
    w = weight.reshape(2, K, K).astype(jnp.float32)
    w = w * jnp.array([1.0, 1.0 / C], jnp.float32)[:, None, None]
    w_flat = w.reshape(-1)                         # (2*K*K,) -> SMEM via scalar prefetch

    x_flat = x.reshape(N, C, HW)                   # lane-dense: H*W becomes the lane dim

    def kernel(w_ref, x_ref, o_ref, pool_ref, pad_ref):
        # w_ref:    SMEM f32[2*K*K]        conv weights (mean plane pre-scaled by 1/C)
        # x_ref:    VMEM (1, c_blk, HW)    lane-dense channel chunk of one batch elem
        # o_ref:    VMEM (1, 1, H, W)
        # pool_ref: VMEM f32 (2, acc_rows, HW)  sublane-partial running [max, sum]
        # pad_ref:  VMEM f32 (2, Hp, Wp)   zero-padded planes (written in final step only)
        c_idx = pl.program_id(1)

        def load_group(g, l0, lt):
            ch0 = g * acc_rows
            v = x_ref[0, ch0:ch0 + acc_rows, l0:l0 + lt].astype(jnp.float32)
            if need_mask:
                cid = (c_idx * c_blk + ch0
                       + lax.broadcasted_iota(jnp.int32, (acc_rows, lt), 0))
                valid = cid < C
                return jnp.where(valid, v, -jnp.inf), jnp.where(valid, v, 0.0)
            return v, v

        # ---- fused channel pooling: elementwise max/add into 8 sublane-partials ----
        for l0 in range(0, HW, _LANE_TILE):
            lt = min(_LANE_TILE, HW - l0)
            acc_max, acc_sum = load_group(0, l0, lt)
            for g in range(1, n_grp):
                vmax, vsum = load_group(g, l0, lt)
                acc_max = jnp.maximum(acc_max, vmax)
                acc_sum = acc_sum + vsum

            @pl.when(c_idx == 0)
            def _():                                    # aligned (offset-0) scratch init
                pool_ref[0, :, l0:l0 + lt] = acc_max
                pool_ref[1, :, l0:l0 + lt] = acc_sum

            @pl.when(c_idx > 0)
            def _():                                    # aligned scratch accumulate
                pool_ref[0, :, l0:l0 + lt] = jnp.maximum(pool_ref[0, :, l0:l0 + lt], acc_max)
                pool_ref[1, :, l0:l0 + lt] = pool_ref[1, :, l0:l0 + lt] + acc_sum

        # ---- last channel chunk: reduce partials, pad once, 7x7 conv + sigmoid ----
        # NOTE: when n_c == 1 the c_idx == 0 init above and this block run in the
        # same invocation; pl.when bodies execute in program order, so the init
        # stores land before these reads.
        @pl.when(c_idx == pl.num_programs(1) - 1)
        def _():
            mx = jnp.max(pool_ref[0], axis=0, keepdims=True)   # (1, HW) once per batch
            sm = jnp.sum(pool_ref[1], axis=0, keepdims=True)
            pool_ref[0, 0:1, :] = mx
            pool_ref[1, 0:1, :] = sm

            # Zero border == conv zero padding; fill the interior row by row
            # (flat lane-dense scratch -> tiny 2-D padded planes, once per batch).
            pad_ref[...] = jnp.zeros_like(pad_ref)
            for p in range(2):
                for h in range(H):
                    pad_ref[p, PAD + h:PAD + h + 1, PAD:PAD + W] = \
                        pool_ref[p, 0:1, h * W:(h + 1) * W]

            # 7x7 conv on the VPU: windows are direct ref slices (load slots),
            # 4 independent partial accumulators (plane x kh parity) for ILP.
            accs = [jnp.zeros((H, W), jnp.float32) for _ in range(4)]
            for p in range(2):
                for kh in range(K):
                    for kw in range(K):
                        wgt = w_ref[p * K * K + kh * K + kw]       # scalar from SMEM
                        win = pad_ref[p, kh:kh + H, kw:kw + W]     # (H, W) window
                        i = 2 * p + (kh & 1)
                        accs[i] = accs[i] + wgt * win
            acc = (accs[0] + accs[1]) + (accs[2] + accs[3])
            o_ref[0, 0] = jax.nn.sigmoid(acc).astype(o_ref.dtype)

    block_bytes = c_blk * HW * x.dtype.itemsize
    scratch_bytes = 4 * (2 * acc_rows * HW + 2 * Hp * Wp)
    vmem_limit = int(min(vmem_cap,
                         max(32 << 20, 2 * block_bytes + scratch_bytes + (4 << 20))))

    grid_spec = pltpu.PrefetchScalarGridSpec(
        num_scalar_prefetch=1,
        grid=(N, n_c),                                  # channel-reduction axis last
        in_specs=[pl.BlockSpec((1, c_blk, HW), lambda b, c, w_s: (b, c, 0))],
        out_specs=pl.BlockSpec((1, 1, H, W), lambda b, c, w_s: (b, 0, 0, 0)),
        scratch_shapes=[pltpu.VMEM((2, acc_rows, HW), jnp.float32),
                        pltpu.VMEM((2, Hp, Wp), jnp.float32)],
    )
    return pl.pallas_call(
        kernel,
        out_shape=jax.ShapeDtypeStruct((N, 1, H, W), x.dtype),
        grid_spec=grid_spec,
        compiler_params=pltpu.CompilerParams(
            dimension_semantics=("parallel", "arbitrary"),
            vmem_limit_bytes=vmem_limit,
        ),
    )(w_flat, x_flat)


def spatial_gate_ref(x, weight):
    """Pure-JAX reference of the PyTorch forward (for correctness checks)."""
    pooled = jnp.concatenate(
        [jnp.max(x, axis=1, keepdims=True), jnp.mean(x, axis=1, keepdims=True)],
        axis=1)
    conv = lax.conv_general_dilated(
        pooled, weight, window_strides=(1, 1),
        padding=((PAD, PAD), (PAD, PAD)),
        dimension_numbers=("NCHW", "OIHW", "NCHW"))
    return jax.nn.sigmoid(conv)


if __name__ == "__main__":
    key = jax.random.PRNGKey(0)
    kx1, kw1, kx2, kw2 = jax.random.split(key, 4)

    fan_in = 2 * K * K
    bound = 1.0 / (fan_in ** 0.5)     # kaiming-uniform-style bound (nn.Conv2d default)

    # Case 1: spec-sized inputs; whole channel axis in one block.
    N, C, H, W = 2, 4, 16, 16
    x = jax.random.normal(kx1, (N, C, H, W), dtype=jnp.float32)
    weight = jax.random.uniform(kw1, (1, 2, K, K), minval=-bound, maxval=bound,
                                dtype=jnp.float32)
    out = jax.block_until_ready(spatial_gate(x, weight))
    ref = spatial_gate_ref(x, weight)
    assert out.shape == (N, 1, H, W)
    assert jnp.allclose(out, ref, atol=1e-5, rtol=1e-5), \
        float(jnp.max(jnp.abs(out - ref)))

    # Case 2: C with no nice divisor -> multi-step channel grid + masked tail block.
    x2 = jax.random.normal(kx2, (1, 10, 8, 8), dtype=jnp.float32)
    weight2 = jax.random.uniform(kw2, (1, 2, K, K), minval=-bound, maxval=bound,
                                 dtype=jnp.float32)
    out2 = jax.block_until_ready(spatial_gate(x2, weight2, channels_per_block=8))
    ref2 = spatial_gate_ref(x2, weight2)
    assert jnp.allclose(out2, ref2, atol=1e-5, rtol=1e-5), \
        float(jnp.max(jnp.abs(out2 - ref2)))

    print("KERNEL_OK")
</pallas_src>

<mosaic_0001>
module attributes {stable_mosaic.version = 11 : i64} {
  func.func @kernel(%arg0: i32, %arg1: i32, %arg2: memref<98xf32, #tpu.memory_space<smem>>, %arg3: memref<1x4x256xf32, #tpu.memory_space<vmem>>, %arg4: memref<1x1x16x16xf32, #tpu.memory_space<vmem>>, %arg5: memref<2x4x256xf32, #tpu.memory_space<vmem>>, %arg6: memref<2x22x22xf32, #tpu.memory_space<vmem>>) attributes {dimension_semantics = [#tpu.dimension_semantics<parallel>, #tpu.dimension_semantics<arbitrary>], iteration_bounds = array<i64: 2, 1>, scalar_prefetch = 1 : i64, scratch_operands = 2 : i64, tpu.core_type = #tpu.core_type<tc>, window_params = [{transform_indices = @transform_0, window_bounds = array<i64: 1, 4, 256>}, {transform_indices = @transform_1, window_bounds = array<i64: 1, 1, 16, 16>}]} {
    %c0 = arith.constant 0 : index
    %c0_0 = arith.constant 0 : index
    %c0_1 = arith.constant 0 : index
    %0 = vector.load %arg3[%c0, %c0_0, %c0_1] : memref<1x4x256xf32, #tpu.memory_space<vmem>>, vector<1x4x256xf32>
    %1 = vector.shape_cast %0 : vector<1x4x256xf32> to vector<4x256xf32>
    %c0_i32 = arith.constant 0 : i32
    %2 = arith.cmpi eq, %arg1, %c0_i32 : i32
    %3 = arith.extui %2 : i1 to i32
    %c0_i32_2 = arith.constant 0 : i32
    %4 = arith.cmpi ne, %3, %c0_i32_2 : i32
    scf.if %4 {
      %c0_7 = arith.constant 0 : index
      %c0_8 = arith.constant 0 : index
      %c0_9 = arith.constant 0 : index
      %11 = vector.load %arg5[%c0_7, %c0_8, %c0_9] : memref<2x4x256xf32, #tpu.memory_space<vmem>>, vector<1x4x256xf32>
      %12 = vector.shape_cast %11 : vector<1x4x256xf32> to vector<4x256xf32>
      %13 = vector.shape_cast %1 : vector<4x256xf32> to vector<1x4x256xf32>
      tpu.vector_store %arg5[%c0_7, %c0_8, %c0_9], %13 {strides = array<i32>} : memref<2x4x256xf32, #tpu.memory_space<vmem>>, vector<1x4x256xf32>,
      %c1 = arith.constant 1 : index
      %c0_10 = arith.constant 0 : index
      %c0_11 = arith.constant 0 : index
      %14 = vector.load %arg5[%c1, %c0_10, %c0_11] : memref<2x4x256xf32, #tpu.memory_space<vmem>>, vector<1x4x256xf32>
      %15 = vector.shape_cast %14 : vector<1x4x256xf32> to vector<4x256xf32>
      %16 = vector.shape_cast %1 : vector<4x256xf32> to vector<1x4x256xf32>
      tpu.vector_store %arg5[%c1, %c0_10, %c0_11], %16 {strides = array<i32>} : memref<2x4x256xf32, #tpu.memory_space<vmem>>, vector<1x4x256xf32>,
    } else {
    }
    %c0_i32_3 = arith.constant 0 : i32
    %5 = arith.cmpi sgt, %arg1, %c0_i32_3 : i32
    %6 = arith.extui %5 : i1 to i32
    %c0_i32_4 = arith.constant 0 : i32
    %7 = arith.cmpi ne, %6, %c0_i32_4 : i32
    scf.if %7 {
      %c0_7 = arith.constant 0 : index
      %c0_8 = arith.constant 0 : index
      %c0_9 = arith.constant 0 : index
      %11 = vector.load %arg5[%c0_7, %c0_8, %c0_9] : memref<2x4x256xf32, #tpu.memory_space<vmem>>, vector<1x4x256xf32>
      %12 = vector.shape_cast %11 : vector<1x4x256xf32> to vector<4x256xf32>
      %13 = arith.maximumf %12, %1 : vector<4x256xf32>
      %c0_10 = arith.constant 0 : index
      %c0_11 = arith.constant 0 : index
      %c0_12 = arith.constant 0 : index
      %14 = vector.load %arg5[%c0_10, %c0_11, %c0_12] : memref<2x4x256xf32, #tpu.memory_space<vmem>>, vector<1x4x256xf32>
      %15 = vector.shape_cast %14 : vector<1x4x256xf32> to vector<4x256xf32>
      %16 = vector.shape_cast %13 : vector<4x256xf32> to vector<1x4x256xf32>
      tpu.vector_store %arg5[%c0_10, %c0_11, %c0_12], %16 {strides = array<i32>} : memref<2x4x256xf32, #tpu.memory_space<vmem>>, vector<1x4x256xf32>,
      %c1 = arith.constant 1 : index
      %c0_13 = arith.constant 0 : index
      %c0_14 = arith.constant 0 : index
      %17 = vector.load %arg5[%c1, %c0_13, %c0_14] : memref<2x4x256xf32, #tpu.memory_space<vmem>>, vector<1x4x256xf32>
      %18 = vector.shape_cast %17 : vector<1x4x256xf32> to vector<4x256xf32>
      %19 = arith.addf %18, %1 : vector<4x256xf32>
      %c1_15 = arith.constant 1 : index
      %c0_16 = arith.constant 0 : index
      %c0_17 = arith.constant 0 : index
      %20 = vector.load %arg5[%c1_15, %c0_16, %c0_17] : memref<2x4x256xf32, #tpu.memory_space<vmem>>, vector<1x4x256xf32>
      %21 = vector.shape_cast %20 : vector<1x4x256xf32> to vector<4x256xf32>
      %22 = vector.shape_cast %19 : vector<4x256xf32> to vector<1x4x256xf32>
      tpu.vector_store %arg5[%c1_15, %c0_16, %c0_17], %22 {strides = array<i32>} : memref<2x4x256xf32, #tpu.memory_space<vmem>>, vector<1x4x256xf32>,
    } else {
    }
    %c0_i32_5 = arith.constant 0 : i32
    %8 = arith.cmpi eq, %arg1, %c0_i32_5 : i32
    %9 = arith.extui %8 : i1 to i32
    %c0_i32_6 = arith.constant 0 : i32
    %10 = arith.cmpi ne, %9, %c0_i32_6 : i32
    scf.if %10 {
      %c0_7 = arith.constant 0 : index
      %c0_8 = arith.constant 0 : index
      %c0_9 = arith.constant 0 : index
      %11 = vector.load %arg5[%c0_7, %c0_8, %c0_9] : memref<2x4x256xf32, #tpu.memory_space<vmem>>, vector<1x4x256xf32>
      %12 = vector.shape_cast %11 : vector<1x4x256xf32> to vector<4x256xf32>
      %cst = arith.constant dense<0xFF800000> : vector<256xf32>
      %13 = vector.multi_reduction <maximumf>, %12, %cst [0] : vector<4x256xf32> to vector<256xf32>
      %14 = vector.shape_cast %13 : vector<256xf32> to vector<1x256xf32>
      %c1 = arith.constant 1 : index
      %c0_10 = arith.constant 0 : index
      %c0_11 = arith.constant 0 : index
      %15 = vector.load %arg5[%c1, %c0_10, %c0_11] : memref<2x4x256xf32, #tpu.memory_space<vmem>>, vector<1x4x256xf32>
      %16 = vector.shape_cast %15 : vector<1x4x256xf32> to vector<4x256xf32>
      %cst_12 = arith.constant dense<0.000000e+00> : vector<256xf32>
      %17 = vector.multi_reduction <add>, %16, %cst_12 [0] : vector<4x256xf32> to vector<256xf32>
      %18 = vector.shape_cast %17 : vector<256xf32> to vector<1x256xf32>
      %c0_13 = arith.constant 0 : index
      %c0_14 = arith.constant 0 : index
      %c0_15 = arith.constant 0 : index
      %19 = vector.load %arg5[%c0_13, %c0_14, %c0_15] : memref<2x4x256xf32, #tpu.memory_space<vmem>>, vector<1x1x256xf32>
      %20 = vector.shape_cast %19 : vector<1x1x256xf32> to vector<1x256xf32>
      %21 = vector.shape_cast %14 : vector<1x256xf32> to vector<1x1x256xf32>
      tpu.vector_store %arg5[%c0_13, %c0_14, %c0_15], %21 {strides = array<i32>} : memref<2x4x256xf32, #tpu.memory_space<vmem>>, vector<1x1x256xf32>,
      %c1_16 = arith.constant 1 : index
      %c0_17 = arith.constant 0 : index
      %c0_18 = arith.constant 0 : index
      %22 = vector.load %arg5[%c1_16, %c0_17, %c0_18] : memref<2x4x256xf32, #tpu.memory_space<vmem>>, vector<1x1x256xf32>
      %23 = vector.shape_cast %22 : vector<1x1x256xf32> to vector<1x256xf32>
      %24 = vector.shape_cast %18 : vector<1x256xf32> to vector<1x1x256xf32>
      tpu.vector_store %arg5[%c1_16, %c0_17, %c0_18], %24 {strides = array<i32>} : memref<2x4x256xf32, #tpu.memory_space<vmem>>, vector<1x1x256xf32>,
      %cst_19 = arith.constant 0.000000e+00 : f32
      %25 = vector.broadcast %cst_19 : f32 to vector<2x22x22xf32>
      %c0_20 = arith.constant 0 : index
      %c0_21 = arith.constant 0 : index
      %c0_22 = arith.constant 0 : index
      %26 = vector.load %arg6[%c0_20, %c0_21, %c0_22] : memref<2x22x22xf32, #tpu.memory_space<vmem>>, vector<2x22x22xf32>
      tpu.vector_store %arg6[%c0_20, %c0_21, %c0_22], %25 {strides = array<i32>} : memref<2x22x22xf32, #tpu.memory_space<vmem>>, vector<2x22x22xf32>,
      %c0_23 = arith.constant 0 : index
      %c0_24 = arith.constant 0 : index
      %c0_25 = arith.constant 0 : index
      %27 = vector.load %arg5[%c0_23, %c0_24, %c0_25] : memref<2x4x256xf32, #tpu.memory_space<vmem>>, vector<1x1x16xf32>
      %28 = vector.shape_cast %27 : vector<1x1x16xf32> to vector<1x16xf32>
      %c0_26 = arith.constant 0 : index
      %c3 = arith.constant 3 : index
      %c3_27 = arith.constant 3 : index
      %29 = vector.load %arg6[%c0_26, %c3, %c3_27] : memref<2x22x22xf32, #tpu.memory_space<vmem>>, vector<1x1x16xf32>
      %30 = vector.shape_cast %29 : vector<1x1x16xf32> to vector<1x16xf32>
      %31 = vector.shape_cast %28 : vector<1x16xf32> to vector<1x1x16xf32>
      tpu.vector_store %arg6[%c0_26, %c3, %c3_27], %31 {strides = array<i32>} : memref<2x22x22xf32, #tpu.memory_space<vmem>>, vector<1x1x16xf32>,
      %c0_28 = arith.constant 0 : index
      %c0_29 = arith.constant 0 : index
      %c16 = arith.constant 16 : index
      %32 = vector.load %arg5[%c0_28, %c0_29, %c16] : memref<2x4x256xf32, #tpu.memory_space<vmem>>, vector<1x1x16xf32>
      %33 = vector.shape_cast %32 : vector<1x1x16xf32> to vector<1x16xf32>
      %c0_30 = arith.constant 0 : index
      %c4 = arith.constant 4 : index
      %c3_31 = arith.constant 3 : index
      %34 = vector.load %arg6[%c0_30, %c4, %c3_31] : memref<2x22x22xf32, #tpu.memory_space<vmem>>, vector<1x1x16xf32>
      %35 = vector.shape_cast %34 : vector<1x1x16xf32> to vector<1x16xf32>
      %36 = vector.shape_cast %33 : vector<1x16xf32> to vector<1x1x16xf32>
      tpu.vector_store %arg6[%c0_30, %c4, %c3_31], %36 {strides = array<i32>} : memref<2x22x22xf32, #tpu.memory_space<vmem>>, vector<1x1x16xf32>,
      %c0_32 = arith.constant 0 : index
      %c0_33 = arith.constant 0 : index
      %c32 = arith.constant 32 : index
      %37 = vector.load %arg5[%c0_32, %c0_33, %c32] : memref<2x4x256xf32, #tpu.memory_space<vmem>>, vector<1x1x16xf32>
      %38 = vector.shape_cast %37 : vector<1x1x16xf32> to vector<1x16xf32>
      %c0_34 = arith.constant 0 : index
      %c5 = arith.constant 5 : index
      %c3_35 = arith.constant 3 : index
      %39 = vector.load %arg6[%c0_34, %c5, %c3_35] : memref<2x22x22xf32, #tpu.memory_space<vmem>>, vector<1x1x16xf32>
      %40 = vector.shape_cast %39 : vector<1x1x16xf32> to vector<1x16xf32>
      %41 = vector.shape_cast %38 : vector<1x16xf32> to vector<1x1x16xf32>
      tpu.vector_store %arg6[%c0_34, %c5, %c3_35], %41 {strides = array<i32>} : memref<2x22x22xf32, #tpu.memory_space<vmem>>, vector<1x1x16xf32>,
      %c0_36 = arith.constant 0 : index
      %c0_37 = arith.constant 0 : index
      %c48 = arith.constant 48 : index
      %42 = vector.load %arg5[%c0_36, %c0_37, %c48] : memref<2x4x256xf32, #tpu.memory_space<vmem>>, vector<1x1x16xf32>
      %43 = vector.shape_cast %42 : vector<1x1x16xf32> to vector<1x16xf32>
      %c0_38 = arith.constant 0 : index
      %c6 = arith.constant 6 : index
      %c3_39 = arith.constant 3 : index
      %44 = vector.load %arg6[%c0_38, %c6, %c3_39] : memref<2x22x22xf32, #tpu.memory_space<vmem>>, vector<1x1x16xf32>
      %45 = vector.shape_cast %44 : vector<1x1x16xf32> to vector<1x16xf32>
      %46 = vector.shape_cast %43 : vector<1x16xf32> to vector<1x1x16xf32>
      tpu.vector_store %arg6[%c0_38, %c6, %c3_39], %46 {strides = array<i32>} : memref<2x22x22xf32, #tpu.memory_space<vmem>>, vector<1x1x16xf32>,
      %c0_40 = arith.constant 0 : index
      %c0_41 = arith.constant 0 : index
      %c64 = arith.constant 64 : index
      %47 = vector.load %arg5[%c0_40, %c0_41, %c64] : memref<2x4x256xf32, #tpu.memory_space<vmem>>, vector<1x1x16xf32>
      %48 = vector.shape_cast %47 : vector<1x1x16xf32> to vector<1x16xf32>
      %c0_42 = arith.constant 0 : index
      %c7 = arith.constant 7 : index
      %c3_43 = arith.constant 3 : index
      %49 = vector.load %arg6[%c0_42, %c7, %c3_43] : memref<2x22x22xf32, #tpu.memory_space<vmem>>, vector<1x1x16xf32>
      %50 = vector.shape_cast %49 : vector<1x1x16xf32> to vector<1x16xf32>
      %51 = vector.shape_cast %48 : vector<1x16xf32> to vector<1x1x16xf32>
      tpu.vector_store %arg6[%c0_42, %c7, %c3_43], %51 {strides = array<i32>} : memref<2x22x22xf32, #tpu.memory_space<vmem>>, vector<1x1x16xf32>,
      %c0_44 = arith.constant 0 : index
      %c0_45 = arith.constant 0 : index
      %c80 = arith.constant 80 : index
      %52 = vector.load %arg5[%c0_44, %c0_45, %c80] : memref<2x4x256xf32, #tpu.memory_space<vmem>>, vector<1x1x16xf32>
      %53 = vector.shape_cast %52 : vector<1x1x16xf32> to vector<1x16xf32>
      %c0_46 = arith.constant 0 : index
      %c8 = arith.constant 8 : index
      %c3_47 = arith.constant 3 : index
      %54 = vector.load %arg6[%c0_46, %c8, %c3_47] : memref<2x22x22xf32, #tpu.memory_space<vmem>>, vector<1x1x16xf32>
      %55 = vector.shape_cast %54 : vector<1x1x16xf32> to vector<1x16xf32>
      %56 = vector.shape_cast %53 : vector<1x16xf32> to vector<1x1x16xf32>
      tpu.vector_store %arg6[%c0_46, %c8, %c3_47], %56 {strides = array<i32>} : memref<2x22x22xf32, #tpu.memory_space<vmem>>, vector<1x1x16xf32>,
      %c0_48 = arith.constant 0 : index
      %c0_49 = arith.constant 0 : index
      %c96 = arith.constant 96 : index
      %57 = vector.load %arg5[%c0_48, %c0_49, %c96] : memref<2x4x256xf32, #tpu.memory_space<vmem>>, vector<1x1x16xf32>
      %58 = vector.shape_cast %57 : vector<1x1x16xf32> to vector<1x16xf32>
      %c0_50 = arith.constant 0 : index
      %c9 = arith.constant 9 : index
      %c3_51 = arith.constant 3 : index
      %59 = vector.load %arg6[%c0_50, %c9, %c3_51] : memref<2x22x22xf32, #tpu.memory_space<vmem>>, vector<1x1x16xf32>
      %60 = vector.shape_cast %59 : vector<1x1x16xf32> to vector<1x16xf32>
      %61 = vector.shape_cast %58 : vector<1x16xf32> to vector<1x1x16xf32>
      tpu.vector_store %arg6[%c0_50, %c9, %c3_51], %61 {strides = array<i32>} : memref<2x22x22xf32, #tpu.memory_space<vmem>>, vector<1x1x16xf32>,
      %c0_52 = arith.constant 0 : index
      %c0_53 = arith.constant 0 : index
      %c112 = arith.constant 112 : index
      %62 = vector.load %arg5[%c0_52, %c0_53, %c112] : memref<2x4x256xf32, #tpu.memory_space<vmem>>, vector<1x1x16xf32>
      %63 = vector.shape_cast %62 : vector<1x1x16xf32> to vector<1x16xf32>
      %c0_54 = arith.constant 0 : index
      %c10 = arith.constant 10 : index
      %c3_55 = arith.constant 3 : index
      %64 = vector.load %arg6[%c0_54, %c10, %c3_55] : memref<2x22x22xf32, #tpu.memory_space<vmem>>, vector<1x1x16xf32>
      %65 = vector.shape_cast %64 : vector<1x1x16xf32> to vector<1x16xf32>
      %66 = vector.shape_cast %63 : vector<1x16xf32> to vector<1x1x16xf32>
      tpu.vector_store %arg6[%c0_54, %c10, %c3_55], %66 {strides = array<i32>} : memref<2x22x22xf32, #tpu.memory_space<vmem>>, vector<1x1x16xf32>,
      %c0_56 = arith.constant 0 : index
      %c0_57 = arith.constant 0 : index
      %c128 = arith.constant 128 : index
      %67 = vector.load %arg5[%c0_56, %c0_57, %c128] : memref<2x4x256xf32, #tpu.memory_space<vmem>>, vector<1x1x16xf32>
      %68 = vector.shape_cast %67 : vector<1x1x16xf32> to vector<1x16xf32>
      %c0_58 = arith.constant 0 : index
      %c11 = arith.constant 11 : index
      %c3_59 = arith.constant 3 : index
      %69 = vector.load %arg6[%c0_58, %c11, %c3_59] : memref<2x22x22xf32, #tpu.memory_space<vmem>>, vector<1x1x16xf32>
      %70 = vector.shape_cast %69 : vector<1x1x16xf32> to vector<1x16xf32>
      %71 = vector.shape_cast %68 : vector<1x16xf32> to vector<1x1x16xf32>
      tpu.vector_store %arg6[%c0_58, %c11, %c3_59], %71 {strides = array<i32>} : memref<2x22x22xf32, #tpu.memory_space<vmem>>, vector<1x1x16xf32>,
      %c0_60 = arith.constant 0 : index
      %c0_61 = arith.constant 0 : index
      %c144 = arith.constant 144 : index
      %72 = vector.load %arg5[%c0_60, %c0_61, %c144] : memref<2x4x256xf32, #tpu.memory_space<vmem>>, vector<1x1x16xf32>
      %73 = vector.shape_cast %72 : vector<1x1x16xf32> to vector<1x16xf32>
      %c0_62 = arith.constant 0 : index
      %c12 = arith.constant 12 : index
      %c3_63 = arith.constant 3 : index
      %74 = vector.load %arg6[%c0_62, %c12, %c3_63] : memref<2x22x22xf32, #tpu.memory_space<vmem>>, vector<1x1x16xf32>
      %75 = vector.shape_cast %74 : vector<1x1x16xf32> to vector<1x16xf32>
      %76 = vector.shape_cast %73 : vector<1x16xf32> to vector<1x1x16xf32>
      tpu.vector_store %arg6[%c0_62, %c12, %c3_63], %76 {strides = array<i32>} : memref<2x22x22xf32, #tpu.memory_space<vmem>>, vector<1x1x16xf32>,
      %c0_64 = arith.constant 0 : index
      %c0_65 = arith.constant 0 : index
      %c160 = arith.constant 160 : index
      %77 = vector.load %arg5[%c0_64, %c0_65, %c160] : memref<2x4x256xf32, #tpu.memory_space<vmem>>, vector<1x1x16xf32>
      %78 = vector.shape_cast %77 : vector<1x1x16xf32> to vector<1x16xf32>
      %c0_66 = arith.constant 0 : index
      %c13 = arith.constant 13 : index
      %c3_67 = arith.constant 3 : index
      %79 = vector.load %arg6[%c0_66, %c13, %c3_67] : memref<2x22x22xf32, #tpu.memory_space<vmem>>, vector<1x1x16xf32>
      %80 = vector.shape_cast %79 : vector<1x1x16xf32> to vector<1x16xf32>
      %81 = vector.shape_cast %78 : vector<1x16xf32> to vector<1x1x16xf32>
      tpu.vector_store %arg6[%c0_66, %c13, %c3_67], %81 {strides = array<i32>} : memref<2x22x22xf32, #tpu.memory_space<vmem>>, vector<1x1x16xf32>,
      %c0_68 = arith.constant 0 : index
      %c0_69 = arith.constant 0 : index
      %c176 = arith.constant 176 : index
      %82 = vector.load %arg5[%c0_68, %c0_69, %c176] : memref<2x4x256xf32, #tpu.memory_space<vmem>>, vector<1x1x16xf32>
      %83 = vector.shape_cast %82 : vector<1x1x16xf32> to vector<1x16xf32>
      %c0_70 = arith.constant 0 : index
      %c14 = arith.constant 14 : index
      %c3_71 = arith.constant 3 : index
      %84 = vector.load %arg6[%c0_70, %c14, %c3_71] : memref<2x22x22xf32, #tpu.memory_space<vmem>>, vector<1x1x16xf32>
      %85 = vector.shape_cast %84 : vector<1x1x16xf32> to vector<1x16xf32>
      %86 = vector.shape_cast %83 : vector<1x16xf32> to vector<1x1x16xf32>
      tpu.vector_store %arg6[%c0_70, %c14, %c3_71], %86 {strides = array<i32>} : memref<2x22x22xf32, #tpu.memory_space<vmem>>, vector<1x1x16xf32>,
      %c0_72 = arith.constant 0 : index
      %c0_73 = arith.constant 0 : index
      %c192 = arith.constant 192 : index
      %87 = vector.load %arg5[%c0_72, %c0_73, %c192] : memref<2x4x256xf32, #tpu.memory_space<vmem>>, vector<1x1x16xf32>
      %88 = vector.shape_cast %87 : vector<1x1x16xf32> to vector<1x16xf32>
      %c0_74 = arith.constant 0 : index
      %c15 = arith.constant 15 : index
      %c3_75 = arith.constant 3 : index
      %89 = vector.load %arg6[%c0_74, %c15, %c3_75] : memref<2x22x22xf32, #tpu.memory_space<vmem>>, vector<1x1x16xf32>
      %90 = vector.shape_cast %89 : vector<1x1x16xf32> to vector<1x16xf32>
      %91 = vector.shape_cast %88 : vector<1x16xf32> to vector<1x1x16xf32>
      tpu.vector_store %arg6[%c0_74, %c15, %c3_75], %91 {strides = array<i32>} : memref<2x22x22xf32, #tpu.memory_space<vmem>>, vector<1x1x16xf32>,
      %c0_76 = arith.constant 0 : index
      %c0_77 = arith.constant 0 : index
      %c208 = arith.constant 208 : index
      %92 = vector.load %arg5[%c0_76, %c0_77, %c208] : memref<2x4x256xf32, #tpu.memory_space<vmem>>, vector<1x1x16xf32>
      %93 = vector.shape_cast %92 : vector<1x1x16xf32> to vector<1x16xf32>
      %c0_78 = arith.constant 0 : index
      %c16_79 = arith.constant 16 : index
      %c3_80 = arith.constant 3 : index
      %94 = vector.load %arg6[%c0_78, %c16_79, %c3_80] : memref<2x22x22xf32, #tpu.memory_space<vmem>>, vector<1x1x16xf32>
      %95 = vector.shape_cast %94 : vector<1x1x16xf32> to vector<1x16xf32>
      %96 = vector.shape_cast %93 : vector<1x16xf32> to vector<1x1x16xf32>
      tpu.vector_store %arg6[%c0_78, %c16_79, %c3_80], %96 {strides = array<i32>} : memref<2x22x22xf32, #tpu.memory_space<vmem>>, vector<1x1x16xf32>,
      %c0_81 = arith.constant 0 : index
      %c0_82 = arith.constant 0 : index
      %c224 = arith.constant 224 : index
      %97 = vector.load %arg5[%c0_81, %c0_82, %c224] : memref<2x4x256xf32, #tpu.memory_space<vmem>>, vector<1x1x16xf32>
      %98 = vector.shape_cast %97 : vector<1x1x16xf32> to vector<1x16xf32>
      %c0_83 = arith.constant 0 : index
      %c17 = arith.constant 17 : index
      %c3_84 = arith.constant 3 : index
      %99 = vector.load %arg6[%c0_83, %c17, %c3_84] : memref<2x22x22xf32, #tpu.memory_space<vmem>>, vector<1x1x16xf32>
      %100 = vector.shape_cast %99 : vector<1x1x16xf32> to vector<1x16xf32>
      %101 = vector.shape_cast %98 : vector<1x16xf32> to vector<1x1x16xf32>
      tpu.vector_store %arg6[%c0_83, %c17, %c3_84], %101 {strides = array<i32>} : memref<2x22x22xf32, #tpu.memory_space<vmem>>, vector<1x1x16xf32>,
      %c0_85 = arith.constant 0 : index
      %c0_86 = arith.constant 0 : index
      %c240 = arith.constant 240 : index
      %102 = vector.load %arg5[%c0_85, %c0_86, %c240] : memref<2x4x256xf32, #tpu.memory_space<vmem>>, vector<1x1x16xf32>
      %103 = vector.shape_cast %102 : vector<1x1x16xf32> to vector<1x16xf32>
      %c0_87 = arith.constant 0 : index
      %c18 = arith.constant 18 : index
      %c3_88 = arith.constant 3 : index
      %104 = vector.load %arg6[%c0_87, %c18, %c3_88] : memref<2x22x22xf32, #tpu.memory_space<vmem>>, vector<1x1x16xf32>
      %105 = vector.shape_cast %104 : vector<1x1x16xf32> to vector<1x16xf32>
      %106 = vector.shape_cast %103 : vector<1x16xf32> to vector<1x1x16xf32>
      tpu.vector_store %arg6[%c0_87, %c18, %c3_88], %106 {strides = array<i32>} : memref<2x22x22xf32, #tpu.memory_space<vmem>>, vector<1x1x16xf32>,
      %c1_89 = arith.constant 1 : index
      %c0_90 = arith.constant 0 : index
      %c0_91 = arith.constant 0 : index
      %107 = vector.load %arg5[%c1_89, %c0_90, %c0_91] : memref<2x4x256xf32, #tpu.memory_space<vmem>>, vector<1x1x16xf32>
      %108 = vector.shape_cast %107 : vector<1x1x16xf32> to vector<1x16xf32>
      %c1_92 = arith.constant 1 : index
      %c3_93 = arith.constant 3 : index
      %c3_94 = arith.constant 3 : index
      %109 = vector.load %arg6[%c1_92, %c3_93, %c3_94] : memref<2x22x22xf32, #tpu.memory_space<vmem>>, vector<1x1x16xf32>
      %110 = vector.shape_cast %109 : vector<1x1x16xf32> to vector<1x16xf32>
      %111 = vector.shape_cast %108 : vector<1x16xf32> to vector<1x1x16xf32>
      tpu.vector_store %arg6[%c1_92, %c3_93, %c3_94], %111 {strides = array<i32>} : memref<2x22x22xf32, #tpu.memory_space<vmem>>, vector<1x1x16xf32>,
      %c1_95 = arith.constant 1 : index
      %c0_96 = arith.constant 0 : index
      %c16_97 = arith.constant 16 : index
      %112 = vector.load %arg5[%c1_95, %c0_96, %c16_97] : memref<2x4x256xf32, #tpu.memory_space<vmem>>, vector<1x1x16xf32>
      %113 = vector.shape_cast %112 : vector<1x1x16xf32> to vector<1x16xf32>
      %c1_98 = arith.constant 1 : index
      %c4_99 = arith.constant 4 : index
      %c3_100 = arith.constant 3 : index
      %114 = vector.load %arg6[%c1_98, %c4_99, %c3_100] : memref<2x22x22xf32, #tpu.memory_space<vmem>>, vector<1x1x16xf32>
      %115 = vector.shape_cast %114 : vector<1x1x16xf32> to vector<1x16xf32>
      %116 = vector.shape_cast %113 : vector<1x16xf32> to vector<1x1x16xf32>
      tpu.vector_store %arg6[%c1_98, %c4_99, %c3_100], %116 {strides = array<i32>} : memref<2x22x22xf32, #tpu.memory_space<vmem>>, vector<1x1x16xf32>,
      %c1_101 = arith.constant 1 : index
      %c0_102 = arith.constant 0 : index
      %c32_103 = arith.constant 32 : index
      %117 = vector.load %arg5[%c1_101, %c0_102, %c32_103] : memref<2x4x256xf32, #tpu.memory_space<vmem>>, vector<1x1x16xf32>
      %118 = vector.shape_cast %117 : vector<1x1x16xf32> to vector<1x16xf32>
      %c1_104 = arith.constant 1 : index
      %c5_105 = arith.constant 5 : index
      %c3_106 = arith.constant 3 : index
      %119 = vector.load %arg6[%c1_104, %c5_105, %c3_106] : memref<2x22x22xf32, #tpu.memory_space<vmem>>, vector<1x1x16xf32>
      %120 = vector.shape_cast %119 : vector<1x1x16xf32> to vector<1x16xf32>
      %121 = vector.shape_cast %118 : vector<1x16xf32> to vector<1x1x16xf32>
      tpu.vector_store %arg6[%c1_104, %c5_105, %c3_106], %121 {strides = array<i32>} : memref<2x22x22xf32, #tpu.memory_space<vmem>>, vector<1x1x16xf32>,
      %c1_107 = arith.constant 1 : index
      %c0_108 = arith.constant 0 : index
      %c48_109 = arith.constant 48 : index
      %122 = vector.load %arg5[%c1_107, %c0_108, %c48_109] : memref<2x4x256xf32, #tpu.memory_space<vmem>>, vector<1x1x16xf32>
      %123 = vector.shape_cast %122 : vector<1x1x16xf32> to vector<1x16xf32>
      %c1_110 = arith.constant 1 : index
      %c6_111 = arith.constant 6 : index
      %c3_112 = arith.constant 3 : index
      %124 = vector.load %arg6[%c1_110, %c6_111, %c3_112] : memref<2x22x22xf32, #tpu.memory_space<vmem>>, vector<1x1x16xf32>
      %125 = vector.shape_cast %124 : vector<1x1x16xf32> to vector<1x16xf32>
      %126 = vector.shape_cast %123 : vector<1x16xf32> to vector<1x1x16xf32>
      tpu.vector_store %arg6[%c1_110, %c6_111, %c3_112], %126 {strides = array<i32>} : memref<2x22x22xf32, #tpu.memory_space<vmem>>, vector<1x1x16xf32>,
      %c1_113 = arith.constant 1 : index
      %c0_114 = arith.constant 0 : index
      %c64_115 = arith.constant 64 : index
      %127 = vector.load %arg5[%c1_113, %c0_114, %c64_115] : memref<2x4x256xf32, #tpu.memory_space<vmem>>, vector<1x1x16xf32>
      %128 = vector.shape_cast %127 : vector<1x1x16xf32> to vector<1x16xf32>
      %c1_116 = arith.constant 1 : index
      %c7_117 = arith.constant 7 : index
      %c3_118 = arith.constant 3 : index
      %129 = vector.load %arg6[%c1_116, %c7_117, %c3_118] : memref<2x22x22xf32, #tpu.memory_space<vmem>>, vector<1x1x16xf32>
      %130 = vector.shape_cast %129 : vector<1x1x16xf32> to vector<1x16xf32>
      %131 = vector.shape_cast %128 : vector<1x16xf32> to vector<1x1x16xf32>
      tpu.vector_store %arg6[%c1_116, %c7_117, %c3_118], %131 {strides = array<i32>} : memref<2x22x22xf32, #tpu.memory_space<vmem>>, vector<1x1x16xf32>,
      %c1_119 = arith.constant 1 : index
      %c0_120 = arith.constant 0 : index
      %c80_121 = arith.constant 80 : index
      %132 = vector.load %arg5[%c1_119, %c0_120, %c80_121] : memref<2x4x256xf32, #tpu.memory_space<vmem>>, vector<1x1x16xf32>
      %133 = vector.shape_cast %132 : vector<1x1x16xf32> to vector<1x16xf32>
      %c1_122 = arith.constant 1 : index
      %c8_123 = arith.constant 8 : index
      %c3_124 = arith.constant 3 : index
      %134 = vector.load %arg6[%c1_122, %c8_123, %c3_124] : memref<2x22x22xf32, #tpu.memory_space<vmem>>, vector<1x1x16xf32>
      %135 = vector.shape_cast %134 : vector<1x1x16xf32> to vector<1x16xf32>
      %136 = vector.shape_cast %133 : vector<1x16xf32> to vector<1x1x16xf32>
      tpu.vector_store %arg6[%c1_122, %c8_123, %c3_124], %136 {strides = array<i32>} : memref<2x22x22xf32, #tpu.memory_space<vmem>>, vector<1x1x16xf32>,
      %c1_125 = arith.constant 1 : index
      %c0_126 = arith.constant 0 : index
      %c96_127 = arith.constant 96 : index
      %137 = vector.load %arg5[%c1_125, %c0_126, %c96_127] : memref<2x4x256xf32, #tpu.memory_space<vmem>>, vector<1x1x16xf32>
      %138 = vector.shape_cast %137 : vector<1x1x16xf32> to vector<1x16xf32>
      %c1_128 = arith.constant 1 : index
      %c9_129 = arith.constant 9 : index
      %c3_130 = arith.constant 3 : index
      %139 = vector.load %arg6[%c1_128, %c9_129, %c3_130] : memref<2x22x22xf32, #tpu.memory_space<vmem>>, vector<1x1x16xf32>
      %140 = vector.shape_cast %139 : vector<1x1x16xf32> to vector<1x16xf32>
      %141 = vector.shape_cast %138 : vector<1x16xf32> to vector<1x1x16xf32>
      tpu.vector_store %arg6[%c1_128, %c9_129, %c3_130], %141 {strides = array<i32>} : memref<2x22x22xf32, #tpu.memory_space<vmem>>, vector<1x1x16xf32>,
      %c1_131 = arith.constant 1 : index
      %c0_132 = arith.constant 0 : index
      %c112_133 = arith.constant 112 : index
      %142 = vector.load %arg5[%c1_131, %c0_132, %c112_133] : memref<2x4x256xf32, #tpu.memory_space<vmem>>, vector<1x1x16xf32>
      %143 = vector.shape_cast %142 : vector<1x1x16xf32> to vector<1x16xf32>
      %c1_134 = arith.constant 1 : index
      %c10_135 = arith.constant 10 : index
      %c3_136 = arith.constant 3 : index
      %144 = vector.load %arg6[%c1_134, %c10_135, %c3_136] : memref<2x22x22xf32, #tpu.memory_space<vmem>>, vector<1x1x16xf32>
      %145 = vector.shape_cast %144 : vector<1x1x16xf32> to vector<1x16xf32>
      %146 = vector.shape_cast %143 : vector<1x16xf32> to vector<1x1x16xf32>
      tpu.vector_store %arg6[%c1_134, %c10_135, %c3_136], %146 {strides = array<i32>} : memref<2x22x22xf32, #tpu.memory_space<vmem>>, vector<1x1x16xf32>,
      %c1_137 = arith.constant 1 : index
      %c0_138 = arith.constant 0 : index
      %c128_139 = arith.constant 128 : index
      %147 = vector.load %arg5[%c1_137, %c0_138, %c128_139] : memref<2x4x256xf32, #tpu.memory_space<vmem>>, vector<1x1x16xf32>
      %148 = vector.shape_cast %147 : vector<1x1x16xf32> to vector<1x16xf32>
      %c1_140 = arith.constant 1 : index
      %c11_141 = arith.constant 11 : index
      %c3_142 = arith.constant 3 : index
      %149 = vector.load %arg6[%c1_140, %c11_141, %c3_142] : memref<2x22x22xf32, #tpu.memory_space<vmem>>, vector<1x1x16xf32>
      %150 = vector.shape_cast %149 : vector<1x1x16xf32> to vector<1x16xf32>
      %151 = vector.shape_cast %148 : vector<1x16xf32> to vector<1x1x16xf32>
      tpu.vector_store %arg6[%c1_140, %c11_141, %c3_142], %151 {strides = array<i32>} : memref<2x22x22xf32, #tpu.memory_space<vmem>>, vector<1x1x16xf32>,
      %c1_143 = arith.constant 1 : index
      %c0_144 = arith.constant 0 : index
      %c144_145 = arith.constant 144 : index
      %152 = vector.load %arg5[%c1_143, %c0_144, %c144_145] : memref<2x4x256xf32, #tpu.memory_space<vmem>>, vector<1x1x16xf32>
      %153 = vector.shape_cast %152 : vector<1x1x16xf32> to vector<1x16xf32>
      %c1_146 = arith.constant 1 : index
      %c12_147 = arith.constant 12 : index
      %c3_148 = arith.constant 3 : index
      %154 = vector.load %arg6[%c1_146, %c12_147, %c3_148] : memref<2x22x22xf32, #tpu.memory_space<vmem>>, vector<1x1x16xf32>
      %155 = vector.shape_cast %154 : vector<1x1x16xf32> to vector<1x16xf32>
      %156 = vector.shape_cast %153 : vector<1x16xf32> to vector<1x1x16xf32>
      tpu.vector_store %arg6[%c1_146, %c12_147, %c3_148], %156 {strides = array<i32>} : memref<2x22x22xf32, #tpu.memory_space<vmem>>, vector<1x1x16xf32>,
      %c1_149 = arith.constant 1 : index
      %c0_150 = arith.constant 0 : index
      %c160_151 = arith.constant 160 : index
      %157 = vector.load %arg5[%c1_149, %c0_150, %c160_151] : memref<2x4x256xf32, #tpu.memory_space<vmem>>, vector<1x1x16xf32>
      %158 = vector.shape_cast %157 : vector<1x1x16xf32> to vector<1x16xf32>
      %c1_152 = arith.constant 1 : index
      %c13_153 = arith.constant 13 : index
      %c3_154 = arith.constant 3 : index
      %159 = vector.load %arg6[%c1_152, %c13_153, %c3_154] : memref<2x22x22xf32, #tpu.memory_space<vmem>>, vector<1x1x16xf32>
      %160 = vector.shape_cast %159 : vector<1x1x16xf32> to vector<1x16xf32>
      %161 = vector.shape_cast %158 : vector<1x16xf32> to vector<1x1x16xf32>
      tpu.vector_store %arg6[%c1_152, %c13_153, %c3_154], %161 {strides = array<i32>} : memref<2x22x22xf32, #tpu.memory_space<vmem>>, vector<1x1x16xf32>,
      %c1_155 = arith.constant 1 : index
      %c0_156 = arith.constant 0 : index
      %c176_157 = arith.constant 176 : index
      %162 = vector.load %arg5[%c1_155, %c0_156, %c176_157] : memref<2x4x256xf32, #tpu.memory_space<vmem>>, vector<1x1x16xf32>
      %163 = vector.shape_cast %162 : vector<1x1x16xf32> to vector<1x16xf32>
      %c1_158 = arith.constant 1 : index
      %c14_159 = arith.constant 14 : index
      %c3_160 = arith.constant 3 : index
      %164 = vector.load %arg6[%c1_158, %c14_159, %c3_160] : memref<2x22x22xf32, #tpu.memory_space<vmem>>, vector<1x1x16xf32>
      %165 = vector.shape_cast %164 : vector<1x1x16xf32> to vector<1x16xf32>
      %166 = vector.shape_cast %163 : vector<1x16xf32> to vector<1x1x16xf32>
      tpu.vector_store %arg6[%c1_158, %c14_159, %c3_160], %166 {strides = array<i32>} : memref<2x22x22xf32, #tpu.memory_space<vmem>>, vector<1x1x16xf32>,
      %c1_161 = arith.constant 1 : index
      %c0_162 = arith.constant 0 : index
      %c192_163 = arith.constant 192 : index
      %167 = vector.load %arg5[%c1_161, %c0_162, %c192_163] : memref<2x4x256xf32, #tpu.memory_space<vmem>>, vector<1x1x16xf32>
      %168 = vector.shape_cast %167 : vector<1x1x16xf32> to vector<1x16xf32>
      %c1_164 = arith.constant 1 : index
      %c15_165 = arith.constant 15 : index
      %c3_166 = arith.constant 3 : index
      %169 = vector.load %arg6[%c1_164, %c15_165, %c3_166] : memref<2x22x22xf32, #tpu.memory_space<vmem>>, vector<1x1x16xf32>
      %170 = vector.shape_cast %169 : vector<1x1x16xf32> to vector<1x16xf32>
      %171 = vector.shape_cast %168 : vector<1x16xf32> to vector<1x1x16xf32>
      tpu.vector_store %arg6[%c1_164, %c15_165, %c3_166], %171 {strides = array<i32>} : memref<2x22x22xf32, #tpu.memory_space<vmem>>, vector<1x1x16xf32>,
      %c1_167 = arith.constant 1 : index
      %c0_168 = arith.constant 0 : index
      %c208_169 = arith.constant 208 : index
      %172 = vector.load %arg5[%c1_167, %c0_168, %c208_169] : memref<2x4x256xf32, #tpu.memory_space<vmem>>, vector<1x1x16xf32>
      %173 = vector.shape_cast %172 : vector<1x1x16xf32> to vector<1x16xf32>
      %c1_170 = arith.constant 1 : index
      %c16_171 = arith.constant 16 : index
      %c3_172 = arith.constant 3 : index
      %174 = vector.load %arg6[%c1_170, %c16_171, %c3_172] : memref<2x22x22xf32, #tpu.memory_space<vmem>>, vector<1x1x16xf32>
      %175 = vector.shape_cast %174 : vector<1x1x16xf32> to vector<1x16xf32>
      %176 = vector.shape_cast %173 : vector<1x16xf32> to vector<1x1x16xf32>
      tpu.vector_store %arg6[%c1_170, %c16_171, %c3_172], %176 {strides = array<i32>} : memref<2x22x22xf32, #tpu.memory_space<vmem>>, vector<1x1x16xf32>,
      %c1_173 = arith.constant 1 : index
      %c0_174 = arith.constant 0 : index
      %c224_175 = arith.constant 224 : index
      %177 = vector.load %arg5[%c1_173, %c0_174, %c224_175] : memref<2x4x256xf32, #tpu.memory_space<vmem>>, vector<1x1x16xf32>
      %178 = vector.shape_cast %177 : vector<1x1x16xf32> to vector<1x16xf32>
      %c1_176 = arith.constant 1 : index
      %c17_177 = arith.constant 17 : index
      %c3_178 = arith.constant 3 : index
      %179 = vector.load %arg6[%c1_176, %c17_177, %c3_178] : memref<2x22x22xf32, #tpu.memory_space<vmem>>, vector<1x1x16xf32>
      %180 = vector.shape_cast %179 : vector<1x1x16xf32> to vector<1x16xf32>
      %181 = vector.shape_cast %178 : vector<1x16xf32> to vector<1x1x16xf32>
      tpu.vector_store %arg6[%c1_176, %c17_177, %c3_178], %181 {strides = array<i32>} : memref<2x22x22xf32, #tpu.memory_space<vmem>>, vector<1x1x16xf32>,
      %c1_179 = arith.constant 1 : index
      %c0_180 = arith.constant 0 : index
      %c240_181 = arith.constant 240 : index
      %182 = vector.load %arg5[%c1_179, %c0_180, %c240_181] : memref<2x4x256xf32, #tpu.memory_space<vmem>>, vector<1x1x16xf32>
      %183 = vector.shape_cast %182 : vector<1x1x16xf32> to vector<1x16xf32>
      %c1_182 = arith.constant 1 : index
      %c18_183 = arith.constant 18 : index
      %c3_184 = arith.constant 3 : index
      %184 = vector.load %arg6[%c1_182, %c18_183, %c3_184] : memref<2x22x22xf32, #tpu.memory_space<vmem>>, vector<1x1x16xf32>
      %185 = vector.shape_cast %184 : vector<1x1x16xf32> to vector<1x16xf32>
      %186 = vector.shape_cast %183 : vector<1x16xf32> to vector<1x1x16xf32>
      tpu.vector_store %arg6[%c1_182, %c18_183, %c3_184], %186 {strides = array<i32>} : memref<2x22x22xf32, #tpu.memory_space<vmem>>, vector<1x1x16xf32>,
      %cst_185 = arith.constant 0.000000e+00 : f32
      %187 = vector.broadcast %cst_185 : f32 to vector<16x16xf32>
      %cst_186 = arith.constant 0.000000e+00 : f32
      %188 = vector.broadcast %cst_186 : f32 to vector<16x16xf32>
      %cst_187 = arith.constant 0.000000e+00 : f32
      %189 = vector.broadcast %cst_187 : f32 to vector<16x16xf32>
      %cst_188 = arith.constant 0.000000e+00 : f32
      %190 = vector.broadcast %cst_188 : f32 to vector<16x16xf32>
      %c0_189 = arith.constant 0 : index
      %191 = memref.load %arg2[%c0_189] : memref<98xf32, #tpu.memory_space<smem>>
      %c0_190 = arith.constant 0 : index
      %c0_191 = arith.constant 0 : index
      %c0_192 = arith.constant 0 : index
      %192 = vector.load %arg6[%c0_190, %c0_191, %c0_192] : memref<2x22x22xf32, #tpu.memory_space<vmem>>, vector<1x16x16xf32>
      %193 = vector.shape_cast %192 : vector<1x16x16xf32> to vector<16x16xf32>
      %194 = vector.broadcast %191 : f32 to vector<16x16xf32>
      %195 = arith.mulf %194, %193 : vector<16x16xf32>
      %196 = arith.addf %187, %195 : vector<16x16xf32>
      %c1_193 = arith.constant 1 : index
      %197 = memref.load %arg2[%c1_193] : memref<98xf32, #tpu.memory_space<smem>>
      %c0_194 = arith.constant 0 : index
      %c0_195 = arith.constant 0 : index
      %c1_196 = arith.constant 1 : index
      %198 = vector.load %arg6[%c0_194, %c0_195, %c1_196] : memref<2x22x22xf32, #tpu.memory_space<vmem>>, vector<1x16x16xf32>
      %199 = vector.shape_cast %198 : vector<1x16x16xf32> to vector<16x16xf32>
      %200 = vector.broadcast %197 : f32 to vector<16x16xf32>
      %201 = arith.mulf %200, %199 : vector<16x16xf32>
      %202 = arith.addf %196, %201 : vector<16x16xf32>
      %c2 = arith.constant 2 : index
      %203 = memref.load %arg2[%c2] : memref<98xf32, #tpu.memory_space<smem>>
      %c0_197 = arith.constant 0 : index
      %c0_198 = arith.constant 0 : index
      %c2_199 = arith.constant 2 : index
      %204 = vector.load %arg6[%c0_197, %c0_198, %c2_199] : memref<2x22x22xf32, #tpu.memory_space<vmem>>, vector<1x16x16xf32>
      %205 = vector.shape_cast %204 : vector<1x16x16xf32> to vector<16x16xf32>
      %206 = vector.broadcast %203 : f32 to vector<16x16xf32>
      %207 = arith.mulf %206, %205 : vector<16x16xf32>
      %208 = arith.addf %202, %207 : vector<16x16xf32>
      %c3_200 = arith.constant 3 : index
      %209 = memref.load %arg2[%c3_200] : memref<98xf32, #tpu.memory_space<smem>>
      %c0_201 = arith.constant 0 : index
      %c0_202 = arith.constant 0 : index
      %c3_203 = arith.constant 3 : index
      %210 = vector.load %arg6[%c0_201, %c0_202, %c3_203] : memref<2x22x22xf32, #tpu.memory_space<vmem>>, vector<1x16x16xf32>
      %211 = vector.shape_cast %210 : vector<1x16x16xf32> to vector<16x16xf32>
      %212 = vector.broadcast %209 : f32 to vector<16x16xf32>
      %213 = arith.mulf %212, %211 : vector<16x16xf32>
      %214 = arith.addf %208, %213 : vector<16x16xf32>
      %c4_204 = arith.constant 4 : index
      %215 = memref.load %arg2[%c4_204] : memref<98xf32, #tpu.memory_space<smem>>
      %c0_205 = arith.constant 0 : index
      %c0_206 = arith.constant 0 : index
      %c4_207 = arith.constant 4 : index
      %216 = vector.load %arg6[%c0_205, %c0_206, %c4_207] : memref<2x22x22xf32, #tpu.memory_space<vmem>>, vector<1x16x16xf32>
      %217 = vector.shape_cast %216 : vector<1x16x16xf32> to vector<16x16xf32>
      %218 = vector.broadcast %215 : f32 to vector<16x16xf32>
      %219 = arith.mulf %218, %217 : vector<16x16xf32>
      %220 = arith.addf %214, %219 : vector<16x16xf32>
      %c5_208 = arith.constant 5 : index
      %221 = memref.load %arg2[%c5_208] : memref<98xf32, #tpu.memory_space<smem>>
      %c0_209 = arith.constant 0 : index
      %c0_210 = arith.constant 0 : index
      %c5_211 = arith.constant 5 : index
      %222 = vector.load %arg6[%c0_209, %c0_210, %c5_211] : memref<2x22x22xf32, #tpu.memory_space<vmem>>, vector<1x16x16xf32>
      %223 = vector.shape_cast %222 : vector<1x16x16xf32> to vector<16x16xf32>
      %224 = vector.broadcast %221 : f32 to vector<16x16xf32>
      %225 = arith.mulf %224, %223 : vector<16x16xf32>
      %226 = arith.addf %220, %225 : vector<16x16xf32>
      %c6_212 = arith.constant 6 : index
      %227 = memref.load %arg2[%c6_212] : memref<98xf32, #tpu.memory_space<smem>>
      %c0_213 = arith.constant 0 : index
      %c0_214 = arith.constant 0 : index
      %c6_215 = arith.constant 6 : index
      %228 = vector.load %arg6[%c0_213, %c0_214, %c6_215] : memref<2x22x22xf32, #tpu.memory_space<vmem>>, vector<1x16x16xf32>
      %229 = vector.shape_cast %228 : vector<1x16x16xf32> to vector<16x16xf32>
      %230 = vector.broadcast %227 : f32 to vector<16x16xf32>
      %231 = arith.mulf %230, %229 : vector<16x16xf32>
      %232 = arith.addf %226, %231 : vector<16x16xf32>
      %c7_216 = arith.constant 7 : index
      %233 = memref.load %arg2[%c7_216] : memref<98xf32, #tpu.memory_space<smem>>
      %c0_217 = arith.constant 0 : index
      %c1_218 = arith.constant 1 : index
      %c0_219 = arith.constant 0 : index
      %234 = vector.load %arg6[%c0_217, %c1_218, %c0_219] : memref<2x22x22xf32, #tpu.memory_space<vmem>>, vector<1x16x16xf32>
      %235 = vector.shape_cast %234 : vector<1x16x16xf32> to vector<16x16xf32>
      %236 = vector.broadcast %233 : f32 to vector<16x16xf32>
      %237 = arith.mulf %236, %235 : vector<16x16xf32>
      %238 = arith.addf %188, %237 : vector<16x16xf32>
      %c8_220 = arith.constant 8 : index
      %239 = memref.load %arg2[%c8_220] : memref<98xf32, #tpu.memory_space<smem>>
      %c0_221 = arith.constant 0 : index
      %c1_222 = arith.constant 1 : index
      %c1_223 = arith.constant 1 : index
      %240 = vector.load %arg6[%c0_221, %c1_222, %c1_223] : memref<2x22x22xf32, #tpu.memory_space<vmem>>, vector<1x16x16xf32>
      %241 = vector.shape_cast %240 : vector<1x16x16xf32> to vector<16x16xf32>
      %242 = vector.broadcast %239 : f32 to vector<16x16xf32>
      %243 = arith.mulf %242, %241 : vector<16x16xf32>
      %244 = arith.addf %238, %243 : vector<16x16xf32>
      %c9_224 = arith.constant 9 : index
      %245 = memref.load %arg2[%c9_224] : memref<98xf32, #tpu.memory_space<smem>>
      %c0_225 = arith.constant 0 : index
      %c1_226 = arith.constant 1 : index
      %c2_227 = arith.constant 2 : index
      %246 = vector.load %arg6[%c0_225, %c1_226, %c2_227] : memref<2x22x22xf32, #tpu.memory_space<vmem>>, vector<1x16x16xf32>
      %247 = vector.shape_cast %246 : vector<1x16x16xf32> to vector<16x16xf32>
      %248 = vector.broadcast %245 : f32 to vector<16x16xf32>
      %249 = arith.mulf %248, %247 : vector<16x16xf32>
      %250 = arith.addf %244, %249 : vector<16x16xf32>
      %c10_228 = arith.constant 10 : index
      %251 = memref.load %arg2[%c10_228] : memref<98xf32, #tpu.memory_space<smem>>
      %c0_229 = arith.constant 0 : index
      %c1_230 = arith.constant 1 : index
      %c3_231 = arith.constant 3 : index
      %252 = vector.load %arg6[%c0_229, %c1_230, %c3_231] : memref<2x22x22xf32, #tpu.memory_space<vmem>>, vector<1x16x16xf32>
      %253 = vector.shape_cast %252 : vector<1x16x16xf32> to vector<16x16xf32>
      %254 = vector.broadcast %251 : f32 to vector<16x16xf32>
      %255 = arith.mulf %254, %253 : vector<16x16xf32>
      %256 = arith.addf %250, %255 : vector<16x16xf32>
      %c11_232 = arith.constant 11 : index
      %257 = memref.load %arg2[%c11_232] : memref<98xf32, #tpu.memory_space<smem>>
      %c0_233 = arith.constant 0 : index
      %c1_234 = arith.constant 1 : index
      %c4_235 = arith.constant 4 : index
      %258 = vector.load %arg6[%c0_233, %c1_234, %c4_235] : memref<2x22x22xf32, #tpu.memory_space<vmem>>, vector<1x16x16xf32>
      %259 = vector.shape_cast %258 : vector<1x16x16xf32> to vector<16x16xf32>
      %260 = vector.broadcast %257 : f32 to vector<16x16xf32>
      %261 = arith.mulf %260, %259 : vector<16x16xf32>
      %262 = arith.addf %256, %261 : vector<16x16xf32>
      %c12_236 = arith.constant 12 : index
      %263 = memref.load %arg2[%c12_236] : memref<98xf32, #tpu.memory_space<smem>>
      %c0_237 = arith.constant 0 : index
      %c1_238 = arith.constant 1 : index
      %c5_239 = arith.constant 5 : index
      %264 = vector.load %arg6[%c0_237, %c1_238, %c5_239] : memref<2x22x22xf32, #tpu.memory_space<vmem>>, vector<1x16x16xf32>
      %265 = vector.shape_cast %264 : vector<1x16x16xf32> to vector<16x16xf32>
      %266 = vector.broadcast %263 : f32 to vector<16x16xf32>
      %267 = arith.mulf %266, %265 : vector<16x16xf32>
      %268 = arith.addf %262, %267 : vector<16x16xf32>
      %c13_240 = arith.constant 13 : index
      %269 = memref.load %arg2[%c13_240] : memref<98xf32, #tpu.memory_space<smem>>
      %c0_241 = arith.constant 0 : index
      %c1_242 = arith.constant 1 : index
      %c6_243 = arith.constant 6 : index
      %270 = vector.load %arg6[%c0_241, %c1_242, %c6_243] : memref<2x22x22xf32, #tpu.memory_space<vmem>>, vector<1x16x16xf32>
      %271 = vector.shape_cast %270 : vector<1x16x16xf32> to vector<16x16xf32>
      %272 = vector.broadcast %269 : f32 to vector<16x16xf32>
      %273 = arith.mulf %272, %271 : vector<16x16xf32>
      %274 = arith.addf %268, %273 : vector<16x16xf32>
      %c14_244 = arith.constant 14 : index
      %275 = memref.load %arg2[%c14_244] : memref<98xf32, #tpu.memory_space<smem>>
      %c0_245 = arith.constant 0 : index
      %c2_246 = arith.constant 2 : index
      %c0_247 = arith.constant 0 : index
      %276 = vector.load %arg6[%c0_245, %c2_246, %c0_247] : memref<2x22x22xf32, #tpu.memory_space<vmem>>, vector<1x16x16xf32>
      %277 = vector.shape_cast %276 : vector<1x16x16xf32> to vector<16x16xf32>
      %278 = vector.broadcast %275 : f32 to vector<16x16xf32>
      %279 = arith.mulf %278, %277 : vector<16x16xf32>
      %280 = arith.addf %232, %279 : vector<16x16xf32>
      %c15_248 = arith.constant 15 : index
      %281 = memref.load %arg2[%c15_248] : memref<98xf32, #tpu.memory_space<smem>>
      %c0_249 = arith.constant 0 : index
      %c2_250 = arith.constant 2 : index
      %c1_251 = arith.constant 1 : index
      %282 = vector.load %arg6[%c0_249, %c2_250, %c1_251] : memref<2x22x22xf32, #tpu.memory_space<vmem>>, vector<1x16x16xf32>
      %283 = vector.shape_cast %282 : vector<1x16x16xf32> to vector<16x16xf32>
      %284 = vector.broadcast %281 : f32 to vector<16x16xf32>
      %285 = arith.mulf %284, %283 : vector<16x16xf32>
      %286 = arith.addf %280, %285 : vector<16x16xf32>
      %c16_252 = arith.constant 16 : index
      %287 = memref.load %arg2[%c16_252] : memref<98xf32, #tpu.memory_space<smem>>
      %c0_253 = arith.constant 0 : index
      %c2_254 = arith.constant 2 : index
      %c2_255 = arith.constant 2 : index
      %288 = vector.load %arg6[%c0_253, %c2_254, %c2_255] : memref<2x22x22xf32, #tpu.memory_space<vmem>>, vector<1x16x16xf32>
      %289 = vector.shape_cast %288 : vector<1x16x16xf32> to vector<16x16xf32>
      %290 = vector.broadcast %287 : f32 to vector<16x16xf32>
      %291 = arith.mulf %290, %289 : vector<16x16xf32>
      %292 = arith.addf %286, %291 : vector<16x16xf32>
      %c17_256 = arith.constant 17 : index
      %293 = memref.load %arg2[%c17_256] : memref<98xf32, #tpu.memory_space<smem>>
      %c0_257 = arith.constant 0 : index
      %c2_258 = arith.constant 2 : index
      %c3_259 = arith.constant 3 : index
      %294 = vector.load %arg6[%c0_257, %c2_258, %c3_259] : memref<2x22x22xf32, #tpu.memory_space<vmem>>, vector<1x16x16xf32>
      %295 = vector.shape_cast %294 : vector<1x16x16xf32> to vector<16x16xf32>
      %296 = vector.broadcast %293 : f32 to vector<16x16xf32>
      %297 = arith.mulf %296, %295 : vector<16x16xf32>
      %298 = arith.addf %292, %297 : vector<16x16xf32>
      %c18_260 = arith.constant 18 : index
      %299 = memref.load %arg2[%c18_260] : memref<98xf32, #tpu.memory_space<smem>>
      %c0_261 = arith.constant 0 : index
      %c2_262 = arith.constant 2 : index
      %c4_263 = arith.constant 4 : index
      %300 = vector.load %arg6[%c0_261, %c2_262, %c4_263] : memref<2x22x22xf32, #tpu.memory_space<vmem>>, vector<1x16x16xf32>
      %301 = vector.shape_cast %300 : vector<1x16x16xf32> to vector<16x16xf32>
      %302 = vector.broadcast %299 : f32 to vector<16x16xf32>
      %303 = arith.mulf %302, %301 : vector<16x16xf32>
      %304 = arith.addf %298, %303 : vector<16x16xf32>
      %c19 = arith.constant 19 : index
      %305 = memref.load %arg2[%c19] : memref<98xf32, #tpu.memory_space<smem>>
      %c0_264 = arith.constant 0 : index
      %c2_265 = arith.constant 2 : index
      %c5_266 = arith.constant 5 : index
      %306 = vector.load %arg6[%c0_264, %c2_265, %c5_266] : memref<2x22x22xf32, #tpu.memory_space<vmem>>, vector<1x16x16xf32>
      %307 = vector.shape_cast %306 : vector<1x16x16xf32> to vector<16x16xf32>
      %308 = vector.broadcast %305 : f32 to vector<16x16xf32>
      %309 = arith.mulf %308, %307 : vector<16x16xf32>
      %310 = arith.addf %304, %309 : vector<16x16xf32>
      %c20 = arith.constant 20 : index
      %311 = memref.load %arg2[%c20] : memref<98xf32, #tpu.memory_space<smem>>
      %c0_267 = arith.constant 0 : index
      %c2_268 = arith.constant 2 : index
      %c6_269 = arith.constant 6 : index
      %312 = vector.load %arg6[%c0_267, %c2_268, %c6_269] : memref<2x22x22xf32, #tpu.memory_space<vmem>>, vector<1x16x16xf32>
      %313 = vector.shape_cast %312 : vector<1x16x16xf32> to vector<16x16xf32>
      %314 = vector.broadcast %311 : f32 to vector<16x16xf32>
      %315 = arith.mulf %314, %313 : vector<16x16xf32>
      %316 = arith.addf %310, %315 : vector<16x16xf32>
      %c21 = arith.constant 21 : index
      %317 = memref.load %arg2[%c21] : memref<98xf32, #tpu.memory_space<smem>>
      %c0_270 = arith.constant 0 : index
      %c3_271 = arith.constant 3 : index
      %c0_272 = arith.constant 0 : index
      %318 = vector.load %arg6[%c0_270, %c3_271, %c0_272] : memref<2x22x22xf32, #tpu.memory_space<vmem>>, vector<1x16x16xf32>
      %319 = vector.shape_cast %318 : vector<1x16x16xf32> to vector<16x16xf32>
      %320 = vector.broadcast %317 : f32 to vector<16x16xf32>
      %321 = arith.mulf %320, %319 : vector<16x16xf32>
      %322 = arith.addf %274, %321 : vector<16x16xf32>
      %c22 = arith.constant 22 : index
      %323 = memref.load %arg2[%c22] : memref<98xf32, #tpu.memory_space<smem>>
      %c0_273 = arith.constant 0 : index
      %c3_274 = arith.constant 3 : index
      %c1_275 = arith.constant 1 : index
      %324 = vector.load %arg6[%c0_273, %c3_274, %c1_275] : memref<2x22x22xf32, #tpu.memory_space<vmem>>, vector<1x16x16xf32>
      %325 = vector.shape_cast %324 : vector<1x16x16xf32> to vector<16x16xf32>
      %326 = vector.broadcast %323 : f32 to vector<16x16xf32>
      %327 = arith.mulf %326, %325 : vector<16x16xf32>
      %328 = arith.addf %322, %327 : vector<16x16xf32>
      %c23 = arith.constant 23 : index
      %329 = memref.load %arg2[%c23] : memref<98xf32, #tpu.memory_space<smem>>
      %c0_276 = arith.constant 0 : index
      %c3_277 = arith.constant 3 : index
      %c2_278 = arith.constant 2 : index
      %330 = vector.load %arg6[%c0_276, %c3_277, %c2_278] : memref<2x22x22xf32, #tpu.memory_space<vmem>>, vector<1x16x16xf32>
      %331 = vector.shape_cast %330 : vector<1x16x16xf32> to vector<16x16xf32>
      %332 = vector.broadcast %329 : f32 to vector<16x16xf32>
      %333 = arith.mulf %332, %331 : vector<16x16xf32>
      %334 = arith.addf %328, %333 : vector<16x16xf32>
      %c24 = arith.constant 24 : index
      %335 = memref.load %arg2[%c24] : memref<98xf32, #tpu.memory_space<smem>>
      %c0_279 = arith.constant 0 : index
      %c3_280 = arith.constant 3 : index
      %c3_281 = arith.constant 3 : index
      %336 = vector.load %arg6[%c0_279, %c3_280, %c3_281] : memref<2x22x22xf32, #tpu.memory_space<vmem>>, vector<1x16x16xf32>
      %337 = vector.shape_cast %336 : vector<1x16x16xf32> to vector<16x16xf32>
      %338 = vector.broadcast %335 : f32 to vector<16x16xf32>
      %339 = arith.mulf %338, %337 : vector<16x16xf32>
      %340 = arith.addf %334, %339 : vector<16x16xf32>
      %c25 = arith.constant 25 : index
      %341 = memref.load %arg2[%c25] : memref<98xf32, #tpu.memory_space<smem>>
      %c0_282 = arith.constant 0 : index
      %c3_283 = arith.constant 3 : index
      %c4_284 = arith.constant 4 : index
      %342 = vector.load %arg6[%c0_282, %c3_283, %c4_284] : memref<2x22x22xf32, #tpu.memory_space<vmem>>, vector<1x16x16xf32>
      %343 = vector.shape_cast %342 : vector<1x16x16xf32> to vector<16x16xf32>
      %344 = vector.broadcast %341 : f32 to vector<16x16xf32>
      %345 = arith.mulf %344, %343 : vector<16x16xf32>
      %346 = arith.addf %340, %345 : vector<16x16xf32>
      %c26 = arith.constant 26 : index
      %347 = memref.load %arg2[%c26] : memref<98xf32, #tpu.memory_space<smem>>
      %c0_285 = arith.constant 0 : index
      %c3_286 = arith.constant 3 : index
      %c5_287 = arith.constant 5 : index
      %348 = vector.load %arg6[%c0_285, %c3_286, %c5_287] : memref<2x22x22xf32, #tpu.memory_space<vmem>>, vector<1x16x16xf32>
      %349 = vector.shape_cast %348 : vector<1x16x16xf32> to vector<16x16xf32>
      %350 = vector.broadcast %347 : f32 to vector<16x16xf32>
      %351 = arith.mulf %350, %349 : vector<16x16xf32>
      %352 = arith.addf %346, %351 : vector<16x16xf32>
      %c27 = arith.constant 27 : index
      %353 = memref.load %arg2[%c27] : memref<98xf32, #tpu.memory_space<smem>>
      %c0_288 = arith.constant 0 : index
      %c3_289 = arith.constant 3 : index
      %c6_290 = arith.constant 6 : index
      %354 = vector.load %arg6[%c0_288, %c3_289, %c6_290] : memref<2x22x22xf32, #tpu.memory_space<vmem>>, vector<1x16x16xf32>
      %355 = vector.shape_cast %354 : vector<1x16x16xf32> to vector<16x16xf32>
      %356 = vector.broadcast %353 : f32 to vector<16x16xf32>
      %357 = arith.mulf %356, %355 : vector<16x16xf32>
      %358 = arith.addf %352, %357 : vector<16x16xf32>
      %c28 = arith.constant 28 : index
      %359 = memref.load %arg2[%c28] : memref<98xf32, #tpu.memory_space<smem>>
      %c0_291 = arith.constant 0 : index
      %c4_292 = arith.constant 4 : index
      %c0_293 = arith.constant 0 : index
      %360 = vector.load %arg6[%c0_291, %c4_292, %c0_293] : memref<2x22x22xf32, #tpu.memory_space<vmem>>, vector<1x16x16xf32>
      %361 = vector.shape_cast %360 : vector<1x16x16xf32> to vector<16x16xf32>
      %362 = vector.broadcast %359 : f32 to vector<16x16xf32>
      %363 = arith.mulf %362, %361 : vector<16x16xf32>
      %364 = arith.addf %316, %363 : vector<16x16xf32>
      %c29 = arith.constant 29 : index
      %365 = memref.load %arg2[%c29] : memref<98xf32, #tpu.memory_space<smem>>
      %c0_294 = arith.constant 0 : index
      %c4_295 = arith.constant 4 : index
      %c1_296 = arith.constant 1 : index
      %366 = vector.load %arg6[%c0_294, %c4_295, %c1_296] : memref<2x22x22xf32, #tpu.memory_space<vmem>>, vector<1x16x16xf32>
      %367 = vector.shape_cast %366 : vector<1x16x16xf32> to vector<16x16xf32>
      %368 = vector.broadcast %365 : f32 to vector<16x16xf32>
      %369 = arith.mulf %368, %367 : vector<16x16xf32>
      %370 = arith.addf %364, %369 : vector<16x16xf32>
      %c30 = arith.constant 30 : index
      %371 = memref.load %arg2[%c30] : memref<98xf32, #tpu.memory_space<smem>>
      %c0_297 = arith.constant 0 : index
      %c4_298 = arith.constant 4 : index
      %c2_299 = arith.constant 2 : index
      %372 = vector.load %arg6[%c0_297, %c4_298, %c2_299] : memref<2x22x22xf32, #tpu.memory_space<vmem>>, vector<1x16x16xf32>
      %373 = vector.shape_cast %372 : vector<1x16x16xf32> to vector<16x16xf32>
      %374 = vector.broadcast %371 : f32 to vector<16x16xf32>
      %375 = arith.mulf %374, %373 : vector<16x16xf32>
      %376 = arith.addf %370, %375 : vector<16x16xf32>
      %c31 = arith.constant 31 : index
      %377 = memref.load %arg2[%c31] : memref<98xf32, #tpu.memory_space<smem>>
      %c0_300 = arith.constant 0 : index
      %c4_301 = arith.constant 4 : index
      %c3_302 = arith.constant 3 : index
      %378 = vector.load %arg6[%c0_300, %c4_301, %c3_302] : memref<2x22x22xf32, #tpu.memory_space<vmem>>, vector<1x16x16xf32>
      %379 = vector.shape_cast %378 : vector<1x16x16xf32> to vector<16x16xf32>
      %380 = vector.broadcast %377 : f32 to vector<16x16xf32>
      %381 = arith.mulf %380, %379 : vector<16x16xf32>
      %382 = arith.addf %376, %381 : vector<16x16xf32>
      %c32_303 = arith.constant 32 : index
      %383 = memref.load %arg2[%c32_303] : memref<98xf32, #tpu.memory_space<smem>>
      %c0_304 = arith.constant 0 : index
      %c4_305 = arith.constant 4 : index
      %c4_306 = arith.constant 4 : index
      %384 = vector.load %arg6[%c0_304, %c4_305, %c4_306] : memref<2x22x22xf32, #tpu.memory_space<vmem>>, vector<1x16x16xf32>
      %385 = vector.shape_cast %384 : vector<1x16x16xf32> to vector<16x16xf32>
      %386 = vector.broadcast %383 : f32 to vector<16x16xf32>
      %387 = arith.mulf %386, %385 : vector<16x16xf32>
      %388 = arith.addf %382, %387 : vector<16x16xf32>
      %c33 = arith.constant 33 : index
      %389 = memref.load %arg2[%c33] : memref<98xf32, #tpu.memory_space<smem>>
      %c0_307 = arith.constant 0 : index
      %c4_308 = arith.constant 4 : index
      %c5_309 = arith.constant 5 : index
      %390 = vector.load %arg6[%c0_307, %c4_308, %c5_309] : memref<2x22x22xf32, #tpu.memory_space<vmem>>, vector<1x16x16xf32>
      %391 = vector.shape_cast %390 : vector<1x16x16xf32> to vector<16x16xf32>
      %392 = vector.broadcast %389 : f32 to vector<16x16xf32>
      %393 = arith.mulf %392, %391 : vector<16x16xf32>
      %394 = arith.addf %388, %393 : vector<16x16xf32>
      %c34 = arith.constant 34 : index
      %395 = memref.load %arg2[%c34] : memref<98xf32, #tpu.memory_space<smem>>
      %c0_310 = arith.constant 0 : index
      %c4_311 = arith.constant 4 : index
      %c6_312 = arith.constant 6 : index
      %396 = vector.load %arg6[%c0_310, %c4_311, %c6_312] : memref<2x22x22xf32, #tpu.memory_space<vmem>>, vector<1x16x16xf32>
      %397 = vector.shape_cast %396 : vector<1x16x16xf32> to vector<16x16xf32>
      %398 = vector.broadcast %395 : f32 to vector<16x16xf32>
      %399 = arith.mulf %398, %397 : vector<16x16xf32>
      %400 = arith.addf %394, %399 : vector<16x16xf32>
      %c35 = arith.constant 35 : index
      %401 = memref.load %arg2[%c35] : memref<98xf32, #tpu.memory_space<smem>>
      %c0_313 = arith.constant 0 : index
      %c5_314 = arith.constant 5 : index
      %c0_315 = arith.constant 0 : index
      %402 = vector.load %arg6[%c0_313, %c5_314, %c0_315] : memref<2x22x22xf32, #tpu.memory_space<vmem>>, vector<1x16x16xf32>
      %403 = vector.shape_cast %402 : vector<1x16x16xf32> to vector<16x16xf32>
      %404 = vector.broadcast %401 : f32 to vector<16x16xf32>
      %405 = arith.mulf %404, %403 : vector<16x16xf32>
      %406 = arith.addf %358, %405 : vector<16x16xf32>
      %c36 = arith.constant 36 : index
      %407 = memref.load %arg2[%c36] : memref<98xf32, #tpu.memory_space<smem>>
      %c0_316 = arith.constant 0 : index
      %c5_317 = arith.constant 5 : index
      %c1_318 = arith.constant 1 : index
      %408 = vector.load %arg6[%c0_316, %c5_317, %c1_318] : memref<2x22x22xf32, #tpu.memory_space<vmem>>, vector<1x16x16xf32>
      %409 = vector.shape_cast %408 : vector<1x16x16xf32> to vector<16x16xf32>
      %410 = vector.broadcast %407 : f32 to vector<16x16xf32>
      %411 = arith.mulf %410, %409 : vector<16x16xf32>
      %412 = arith.addf %406, %411 : vector<16x16xf32>
      %c37 = arith.constant 37 : index
      %413 = memref.load %arg2[%c37] : memref<98xf32, #tpu.memory_space<smem>>
      %c0_319 = arith.constant 0 : index
      %c5_320 = arith.constant 5 : index
      %c2_321 = arith.constant 2 : index
      %414 = vector.load %arg6[%c0_319, %c5_320, %c2_321] : memref<2x22x22xf32, #tpu.memory_space<vmem>>, vector<1x16x16xf32>
      %415 = vector.shape_cast %414 : vector<1x16x16xf32> to vector<16x16xf32>
      %416 = vector.broadcast %413 : f32 to vector<16x16xf32>
      %417 = arith.mulf %416, %415 : vector<16x16xf32>
      %418 = arith.addf %412, %417 : vector<16x16xf32>
      %c38 = arith.constant 38 : index
      %419 = memref.load %arg2[%c38] : memref<98xf32, #tpu.memory_space<smem>>
      %c0_322 = arith.constant 0 : index
      %c5_323 = arith.constant 5 : index
      %c3_324 = arith.constant 3 : index
      %420 = vector.load %arg6[%c0_322, %c5_323, %c3_324] : memref<2x22x22xf32, #tpu.memory_space<vmem>>, vector<1x16x16xf32>
      %421 = vector.shape_cast %420 : vector<1x16x16xf32> to vector<16x16xf32>
      %422 = vector.broadcast %419 : f32 to vector<16x16xf32>
      %423 = arith.mulf %422, %421 : vector<16x16xf32>
      %424 = arith.addf %418, %423 : vector<16x16xf32>
      %c39 = arith.constant 39 : index
      %425 = memref.load %arg2[%c39] : memref<98xf32, #tpu.memory_space<smem>>
      %c0_325 = arith.constant 0 : index
      %c5_326 = arith.constant 5 : index
      %c4_327 = arith.constant 4 : index
      %426 = vector.load %arg6[%c0_325, %c5_326, %c4_327] : memref<2x22x22xf32, #tpu.memory_space<vmem>>, vector<1x16x16xf32>
      %427 = vector.shape_cast %426 : vector<1x16x16xf32> to vector<16x16xf32>
      %428 = vector.broadcast %425 : f32 to vector<16x16xf32>
      %429 = arith.mulf %428, %427 : vector<16x16xf32>
      %430 = arith.addf %424, %429 : vector<16x16xf32>
      %c40 = arith.constant 40 : index
      %431 = memref.load %arg2[%c40] : memref<98xf32, #tpu.memory_space<smem>>
      %c0_328 = arith.constant 0 : index
      %c5_329 = arith.constant 5 : index
      %c5_330 = arith.constant 5 : index
      %432 = vector.load %arg6[%c0_328, %c5_329, %c5_330] : memref<2x22x22xf32, #tpu.memory_space<vmem>>, vector<1x16x16xf32>
      %433 = vector.shape_cast %432 : vector<1x16x16xf32> to vector<16x16xf32>
      %434 = vector.broadcast %431 : f32 to vector<16x16xf32>
      %435 = arith.mulf %434, %433 : vector<16x16xf32>
      %436 = arith.addf %430, %435 : vector<16x16xf32>
      %c41 = arith.constant 41 : index
      %437 = memref.load %arg2[%c41] : memref<98xf32, #tpu.memory_space<smem>>
      %c0_331 = arith.constant 0 : index
      %c5_332 = arith.constant 5 : index
      %c6_333 = arith.constant 6 : index
      %438 = vector.load %arg6[%c0_331, %c5_332, %c6_333] : memref<2x22x22xf32, #tpu.memory_space<vmem>>, vector<1x16x16xf32>
      %439 = vector.shape_cast %438 : vector<1x16x16xf32> to vector<16x16xf32>
      %440 = vector.broadcast %437 : f32 to vector<16x16xf32>
      %441 = arith.mulf %440, %439 : vector<16x16xf32>
      %442 = arith.addf %436, %441 : vector<16x16xf32>
      %c42 = arith.constant 42 : index
      %443 = memref.load %arg2[%c42] : memref<98xf32, #tpu.memory_space<smem>>
      %c0_334 = arith.constant 0 : index
      %c6_335 = arith.constant 6 : index
      %c0_336 = arith.constant 0 : index
      %444 = vector.load %arg6[%c0_334, %c6_335, %c0_336] : memref<2x22x22xf32, #tpu.memory_space<vmem>>, vector<1x16x16xf32>
      %445 = vector.shape_cast %444 : vector<1x16x16xf32> to vector<16x16xf32>
      %446 = vector.broadcast %443 : f32 to vector<16x16xf32>
      %447 = arith.mulf %446, %445 : vector<16x16xf32>
      %448 = arith.addf %400, %447 : vector<16x16xf32>
      %c43 = arith.constant 43 : index
      %449 = memref.load %arg2[%c43] : memref<98xf32, #tpu.memory_space<smem>>
      %c0_337 = arith.constant 0 : index
      %c6_338 = arith.constant 6 : index
      %c1_339 = arith.constant 1 : index
      %450 = vector.load %arg6[%c0_337, %c6_338, %c1_339] : memref<2x22x22xf32, #tpu.memory_space<vmem>>, vector<1x16x16xf32>
      %451 = vector.shape_cast %450 : vector<1x16x16xf32> to vector<16x16xf32>
      %452 = vector.broadcast %449 : f32 to vector<16x16xf32>
      %453 = arith.mulf %452, %451 : vector<16x16xf32>
      %454 = arith.addf %448, %453 : vector<16x16xf32>
      %c44 = arith.constant 44 : index
      %455 = memref.load %arg2[%c44] : memref<98xf32, #tpu.memory_space<smem>>
      %c0_340 = arith.constant 0 : index
      %c6_341 = arith.constant 6 : index
      %c2_342 = arith.constant 2 : index
      %456 = vector.load %arg6[%c0_340, %c6_341, %c2_342] : memref<2x22x22xf32, #tpu.memory_space<vmem>>, vector<1x16x16xf32>
      %457 = vector.shape_cast %456 : vector<1x16x16xf32> to vector<16x16xf32>
      %458 = vector.broadcast %455 : f32 to vector<16x16xf32>
      %459 = arith.mulf %458, %457 : vector<16x16xf32>
      %460 = arith.addf %454, %459 : vector<16x16xf32>
      %c45 = arith.constant 45 : index
      %461 = memref.load %arg2[%c45] : memref<98xf32, #tpu.memory_space<smem>>
      %c0_343 = arith.constant 0 : index
      %c6_344 = arith.constant 6 : index
      %c3_345 = arith.constant 3 : index
      %462 = vector.load %arg6[%c0_343, %c6_344, %c3_345] : memref<2x22x22xf32, #tpu.memory_space<vmem>>, vector<1x16x16xf32>
      %463 = vector.shape_cast %462 : vector<1x16x16xf32> to vector<16x16xf32>
      %464 = vector.broadcast %461 : f32 to vector<16x16xf32>
      %465 = arith.mulf %464, %463 : vector<16x16xf32>
      %466 = arith.addf %460, %465 : vector<16x16xf32>
      %c46 = arith.constant 46 : index
      %467 = memref.load %arg2[%c46] : memref<98xf32, #tpu.memory_space<smem>>
      %c0_346 = arith.constant 0 : index
      %c6_347 = arith.constant 6 : index
      %c4_348 = arith.constant 4 : index
      %468 = vector.load %arg6[%c0_346, %c6_347, %c4_348] : memref<2x22x22xf32, #tpu.memory_space<vmem>>, vector<1x16x16xf32>
      %469 = vector.shape_cast %468 : vector<1x16x16xf32> to vector<16x16xf32>
      %470 = vector.broadcast %467 : f32 to vector<16x16xf32>
      %471 = arith.mulf %470, %469 : vector<16x16xf32>
      %472 = arith.addf %466, %471 : vector<16x16xf32>
      %c47 = arith.constant 47 : index
      %473 = memref.load %arg2[%c47] : memref<98xf32, #tpu.memory_space<smem>>
      %c0_349 = arith.constant 0 : index
      %c6_350 = arith.constant 6 : index
      %c5_351 = arith.constant 5 : index
      %474 = vector.load %arg6[%c0_349, %c6_350, %c5_351] : memref<2x22x22xf32, #tpu.memory_space<vmem>>, vector<1x16x16xf32>
      %475 = vector.shape_cast %474 : vector<1x16x16xf32> to vector<16x16xf32>
      %476 = vector.broadcast %473 : f32 to vector<16x16xf32>
      %477 = arith.mulf %476, %475 : vector<16x16xf32>
      %478 = arith.addf %472, %477 : vector<16x16xf32>
      %c48_352 = arith.constant 48 : index
      %479 = memref.load %arg2[%c48_352] : memref<98xf32, #tpu.memory_space<smem>>
      %c0_353 = arith.constant 0 : index
      %c6_354 = arith.constant 6 : index
      %c6_355 = arith.constant 6 : index
      %480 = vector.load %arg6[%c0_353, %c6_354, %c6_355] : memref<2x22x22xf32, #tpu.memory_space<vmem>>, vector<1x16x16xf32>
      %481 = vector.shape_cast %480 : vector<1x16x16xf32> to vector<16x16xf32>
      %482 = vector.broadcast %479 : f32 to vector<16x16xf32>
      %483 = arith.mulf %482, %481 : vector<16x16xf32>
      %484 = arith.addf %478, %483 : vector<16x16xf32>
      %c49 = arith.constant 49 : index
      %485 = memref.load %arg2[%c49] : memref<98xf32, #tpu.memory_space<smem>>
      %c1_356 = arith.constant 1 : index
      %c0_357 = arith.constant 0 : index
      %c0_358 = arith.constant 0 : index
      %486 = vector.load %arg6[%c1_356, %c0_357, %c0_358] : memref<2x22x22xf32, #tpu.memory_space<vmem>>, vector<1x16x16xf32>
      %487 = vector.shape_cast %486 : vector<1x16x16xf32> to vector<16x16xf32>
      %488 = vector.broadcast %485 : f32 to vector<16x16xf32>
      %489 = arith.mulf %488, %487 : vector<16x16xf32>
      %490 = arith.addf %189, %489 : vector<16x16xf32>
      %c50 = arith.constant 50 : index
      %491 = memref.load %arg2[%c50] : memref<98xf32, #tpu.memory_space<smem>>
      %c1_359 = arith.constant 1 : index
      %c0_360 = arith.constant 0 : index
      %c1_361 = arith.constant 1 : index
      %492 = vector.load %arg6[%c1_359, %c0_360, %c1_361] : memref<2x22x22xf32, #tpu.memory_space<vmem>>, vector<1x16x16xf32>
      %493 = vector.shape_cast %492 : vector<1x16x16xf32> to vector<16x16xf32>
      %494 = vector.broadcast %491 : f32 to vector<16x16xf32>
      %495 = arith.mulf %494, %493 : vector<16x16xf32>
      %496 = arith.addf %490, %495 : vector<16x16xf32>
      %c51 = arith.constant 51 : index
      %497 = memref.load %arg2[%c51] : memref<98xf32, #tpu.memory_space<smem>>
      %c1_362 = arith.constant 1 : index
      %c0_363 = arith.constant 0 : index
      %c2_364 = arith.constant 2 : index
      %498 = vector.load %arg6[%c1_362, %c0_363, %c2_364] : memref<2x22x22xf32, #tpu.memory_space<vmem>>, vector<1x16x16xf32>
      %499 = vector.shape_cast %498 : vector<1x16x16xf32> to vector<16x16xf32>
      %500 = vector.broadcast %497 : f32 to vector<16x16xf32>
      %501 = arith.mulf %500, %499 : vector<16x16xf32>
      %502 = arith.addf %496, %501 : vector<16x16xf32>
      %c52 = arith.constant 52 : index
      %503 = memref.load %arg2[%c52] : memref<98xf32, #tpu.memory_space<smem>>
      %c1_365 = arith.constant 1 : index
      %c0_366 = arith.constant 0 : index
      %c3_367 = arith.constant 3 : index
      %504 = vector.load %arg6[%c1_365, %c0_366, %c3_367] : memref<2x22x22xf32, #tpu.memory_space<vmem>>, vector<1x16x16xf32>
      %505 = vector.shape_cast %504 : vector<1x16x16xf32> to vector<16x16xf32>
      %506 = vector.broadcast %503 : f32 to vector<16x16xf32>
      %507 = arith.mulf %506, %505 : vector<16x16xf32>
      %508 = arith.addf %502, %507 : vector<16x16xf32>
      %c53 = arith.constant 53 : index
      %509 = memref.load %arg2[%c53] : memref<98xf32, #tpu.memory_space<smem>>
      %c1_368 = arith.constant 1 : index
      %c0_369 = arith.constant 0 : index
      %c4_370 = arith.constant 4 : index
      %510 = vector.load %arg6[%c1_368, %c0_369, %c4_370] : memref<2x22x22xf32, #tpu.memory_space<vmem>>, vector<1x16x16xf32>
      %511 = vector.shape_cast %510 : vector<1x16x16xf32> to vector<16x16xf32>
      %512 = vector.broadcast %509 : f32 to vector<16x16xf32>
      %513 = arith.mulf %512, %511 : vector<16x16xf32>
      %514 = arith.addf %508, %513 : vector<16x16xf32>
      %c54 = arith.constant 54 : index
      %515 = memref.load %arg2[%c54] : memref<98xf32, #tpu.memory_space<smem>>
      %c1_371 = arith.constant 1 : index
      %c0_372 = arith.constant 0 : index
      %c5_373 = arith.constant 5 : index
      %516 = vector.load %arg6[%c1_371, %c0_372, %c5_373] : memref<2x22x22xf32, #tpu.memory_space<vmem>>, vector<1x16x16xf32>
      %517 = vector.shape_cast %516 : vector<1x16x16xf32> to vector<16x16xf32>
      %518 = vector.broadcast %515 : f32 to vector<16x16xf32>
      %519 = arith.mulf %518, %517 : vector<16x16xf32>
      %520 = arith.addf %514, %519 : vector<16x16xf32>
      %c55 = arith.constant 55 : index
      %521 = memref.load %arg2[%c55] : memref<98xf32, #tpu.memory_space<smem>>
      %c1_374 = arith.constant 1 : index
      %c0_375 = arith.constant 0 : index
      %c6_376 = arith.constant 6 : index
      %522 = vector.load %arg6[%c1_374, %c0_375, %c6_376] : memref<2x22x22xf32, #tpu.memory_space<vmem>>, vector<1x16x16xf32>
      %523 = vector.shape_cast %522 : vector<1x16x16xf32> to vector<16x16xf32>
      %524 = vector.broadcast %521 : f32 to vector<16x16xf32>
      %525 = arith.mulf %524, %523 : vector<16x16xf32>
      %526 = arith.addf %520, %525 : vector<16x16xf32>
      %c56 = arith.constant 56 : index
      %527 = memref.load %arg2[%c56] : memref<98xf32, #tpu.memory_space<smem>>
      %c1_377 = arith.constant 1 : index
      %c1_378 = arith.constant 1 : index
      %c0_379 = arith.constant 0 : index
      %528 = vector.load %arg6[%c1_377, %c1_378, %c0_379] : memref<2x22x22xf32, #tpu.memory_space<vmem>>, vector<1x16x16xf32>
      %529 = vector.shape_cast %528 : vector<1x16x16xf32> to vector<16x16xf32>
      %530 = vector.broadcast %527 : f32 to vector<16x16xf32>
      %531 = arith.mulf %530, %529 : vector<16x16xf32>
      %532 = arith.addf %190, %531 : vector<16x16xf32>
      %c57 = arith.constant 57 : index
      %533 = memref.load %arg2[%c57] : memref<98xf32, #tpu.memory_space<smem>>
      %c1_380 = arith.constant 1 : index
      %c1_381 = arith.constant 1 : index
      %c1_382 = arith.constant 1 : index
      %534 = vector.load %arg6[%c1_380, %c1_381, %c1_382] : memref<2x22x22xf32, #tpu.memory_space<vmem>>, vector<1x16x16xf32>
      %535 = vector.shape_cast %534 : vector<1x16x16xf32> to vector<16x16xf32>
      %536 = vector.broadcast %533 : f32 to vector<16x16xf32>
      %537 = arith.mulf %536, %535 : vector<16x16xf32>
      %538 = arith.addf %532, %537 : vector<16x16xf32>
      %c58 = arith.constant 58 : index
      %539 = memref.load %arg2[%c58] : memref<98xf32, #tpu.memory_space<smem>>
      %c1_383 = arith.constant 1 : index
      %c1_384 = arith.constant 1 : index
      %c2_385 = arith.constant 2 : index
      %540 = vector.load %arg6[%c1_383, %c1_384, %c2_385] : memref<2x22x22xf32, #tpu.memory_space<vmem>>, vector<1x16x16xf32>
      %541 = vector.shape_cast %540 : vector<1x16x16xf32> to vector<16x16xf32>
      %542 = vector.broadcast %539 : f32 to vector<16x16xf32>
      %543 = arith.mulf %542, %541 : vector<16x16xf32>
      %544 = arith.addf %538, %543 : vector<16x16xf32>
      %c59 = arith.constant 59 : index
      %545 = memref.load %arg2[%c59] : memref<98xf32, #tpu.memory_space<smem>>
      %c1_386 = arith.constant 1 : index
      %c1_387 = arith.constant 1 : index
      %c3_388 = arith.constant 3 : index
      %546 = vector.load %arg6[%c1_386, %c1_387, %c3_388] : memref<2x22x22xf32, #tpu.memory_space<vmem>>, vector<1x16x16xf32>
      %547 = vector.shape_cast %546 : vector<1x16x16xf32> to vector<16x16xf32>
      %548 = vector.broadcast %545 : f32 to vector<16x16xf32>
      %549 = arith.mulf %548, %547 : vector<16x16xf32>
      %550 = arith.addf %544, %549 : vector<16x16xf32>
      %c60 = arith.constant 60 : index
      %551 = memref.load %arg2[%c60] : memref<98xf32, #tpu.memory_space<smem>>
      %c1_389 = arith.constant 1 : index
      %c1_390 = arith.constant 1 : index
      %c4_391 = arith.constant 4 : index
      %552 = vector.load %arg6[%c1_389, %c1_390, %c4_391] : memref<2x22x22xf32, #tpu.memory_space<vmem>>, vector<1x16x16xf32>
      %553 = vector.shape_cast %552 : vector<1x16x16xf32> to vector<16x16xf32>
      %554 = vector.broadcast %551 : f32 to vector<16x16xf32>
      %555 = arith.mulf %554, %553 : vector<16x16xf32>
      %556 = arith.addf %550, %555 : vector<16x16xf32>
      %c61 = arith.constant 61 : index
      %557 = memref.load %arg2[%c61] : memref<98xf32, #tpu.memory_space<smem>>
      %c1_392 = arith.constant 1 : index
      %c1_393 = arith.constant 1 : index
      %c5_394 = arith.constant 5 : index
      %558 = vector.load %arg6[%c1_392, %c1_393, %c5_394] : memref<2x22x22xf32, #tpu.memory_space<vmem>>, vector<1x16x16xf32>
      %559 = vector.shape_cast %558 : vector<1x16x16xf32> to vector<16x16xf32>
      %560 = vector.broadcast %557 : f32 to vector<16x16xf32>
      %561 = arith.mulf %560, %559 : vector<16x16xf32>
      %562 = arith.addf %556, %561 : vector<16x16xf32>
      %c62 = arith.constant 62 : index
      %563 = memref.load %arg2[%c62] : memref<98xf32, #tpu.memory_space<smem>>
      %c1_395 = arith.constant 1 : index
      %c1_396 = arith.constant 1 : index
      %c6_397 = arith.constant 6 : index
      %564 = vector.load %arg6[%c1_395, %c1_396, %c6_397] : memref<2x22x22xf32, #tpu.memory_space<vmem>>, vector<1x16x16xf32>
      %565 = vector.shape_cast %564 : vector<1x16x16xf32> to vector<16x16xf32>
      %566 = vector.broadcast %563 : f32 to vector<16x16xf32>
      %567 = arith.mulf %566, %565 : vector<16x16xf32>
      %568 = arith.addf %562, %567 : vector<16x16xf32>
      %c63 = arith.constant 63 : index
      %569 = memref.load %arg2[%c63] : memref<98xf32, #tpu.memory_space<smem>>
      %c1_398 = arith.constant 1 : index
      %c2_399 = arith.constant 2 : index
      %c0_400 = arith.constant 0 : index
      %570 = vector.load %arg6[%c1_398, %c2_399, %c0_400] : memref<2x22x22xf32, #tpu.memory_space<vmem>>, vector<1x16x16xf32>
      %571 = vector.shape_cast %570 : vector<1x16x16xf32> to vector<16x16xf32>
      %572 = vector.broadcast %569 : f32 to vector<16x16xf32>
      %573 = arith.mulf %572, %571 : vector<16x16xf32>
      %574 = arith.addf %526, %573 : vector<16x16xf32>
      %c64_401 = arith.constant 64 : index
      %575 = memref.load %arg2[%c64_401] : memref<98xf32, #tpu.memory_space<smem>>
      %c1_402 = arith.constant 1 : index
      %c2_403 = arith.constant 2 : index
      %c1_404 = arith.constant 1 : index
      %576 = vector.load %arg6[%c1_402, %c2_403, %c1_404] : memref<2x22x22xf32, #tpu.memory_space<vmem>>, vector<1x16x16xf32>
      %577 = vector.shape_cast %576 : vector<1x16x16xf32> to vector<16x16xf32>
      %578 = vector.broadcast %575 : f32 to vector<16x16xf32>
      %579 = arith.mulf %578, %577 : vector<16x16xf32>
      %580 = arith.addf %574, %579 : vector<16x16xf32>
      %c65 = arith.constant 65 : index
      %581 = memref.load %arg2[%c65] : memref<98xf32, #tpu.memory_space<smem>>
      %c1_405 = arith.constant 1 : index
      %c2_406 = arith.constant 2 : index
      %c2_407 = arith.constant 2 : index
      %582 = vector.load %arg6[%c1_405, %c2_406, %c2_407] : memref<2x22x22xf32, #tpu.memory_space<vmem>>, vector<1x16x16xf32>
      %583 = vector.shape_cast %582 : vector<1x16x16xf32> to vector<16x16xf32>
      %584 = vector.broadcast %581 : f32 to vector<16x16xf32>
      %585 = arith.mulf %584, %583 : vector<16x16xf32>
      %586 = arith.addf %580, %585 : vector<16x16xf32>
      %c66 = arith.constant 66 : index
      %587 = memref.load %arg2[%c66] : memref<98xf32, #tpu.memory_space<smem>>
      %c1_408 = arith.constant 1 : index
      %c2_409 = arith.constant 2 : index
      %c3_410 = arith.constant 3 : index
      %588 = vector.load %arg6[%c1_408, %c2_409, %c3_410] : memref<2x22x22xf32, #tpu.memory_space<vmem>>, vector<1x16x16xf32>
      %589 = vector.shape_cast %588 : vector<1x16x16xf32> to vector<16x16xf32>
      %590 = vector.broadcast %587 : f32 to vector<16x16xf32>
      %591 = arith.mulf %590, %589 : vector<16x16xf32>
      %592 = arith.addf %586, %591 : vector<16x16xf32>
      %c67 = arith.constant 67 : index
      %593 = memref.load %arg2[%c67] : memref<98xf32, #tpu.memory_space<smem>>
      %c1_411 = arith.constant 1 : index
      %c2_412 = arith.constant 2 : index
      %c4_413 = arith.constant 4 : index
      %594 = vector.load %arg6[%c1_411, %c2_412, %c4_413] : memref<2x22x22xf32, #tpu.memory_space<vmem>>, vector<1x16x16xf32>
      %595 = vector.shape_cast %594 : vector<1x16x16xf32> to vector<16x16xf32>
      %596 = vector.broadcast %593 : f32 to vector<16x16xf32>
      %597 = arith.mulf %596, %595 : vector<16x16xf32>
      %598 = arith.addf %592, %597 : vector<16x16xf32>
      %c68 = arith.constant 68 : index
      %599 = memref.load %arg2[%c68] : memref<98xf32, #tpu.memory_space<smem>>
      %c1_414 = arith.constant 1 : index
      %c2_415 = arith.constant 2 : index
      %c5_416 = arith.constant 5 : index
      %600 = vector.load %arg6[%c1_414, %c2_415, %c5_416] : memref<2x22x22xf32, #tpu.memory_space<vmem>>, vector<1x16x16xf32>
      %601 = vector.shape_cast %600 : vector<1x16x16xf32> to vector<16x16xf32>
      %602 = vector.broadcast %599 : f32 to vector<16x16xf32>
      %603 = arith.mulf %602, %601 : vector<16x16xf32>
      %604 = arith.addf %598, %603 : vector<16x16xf32>
      %c69 = arith.constant 69 : index
      %605 = memref.load %arg2[%c69] : memref<98xf32, #tpu.memory_space<smem>>
      %c1_417 = arith.constant 1 : index
      %c2_418 = arith.constant 2 : index
      %c6_419 = arith.constant 6 : index
      %606 = vector.load %arg6[%c1_417, %c2_418, %c6_419] : memref<2x22x22xf32, #tpu.memory_space<vmem>>, vector<1x16x16xf32>
      %607 = vector.shape_cast %606 : vector<1x16x16xf32> to vector<16x16xf32>
      %608 = vector.broadcast %605 : f32 to vector<16x16xf32>
      %609 = arith.mulf %608, %607 : vector<16x16xf32>
      %610 = arith.addf %604, %609 : vector<16x16xf32>
      %c70 = arith.constant 70 : index
      %611 = memref.load %arg2[%c70] : memref<98xf32, #tpu.memory_space<smem>>
      %c1_420 = arith.constant 1 : index
      %c3_421 = arith.constant 3 : index
      %c0_422 = arith.constant 0 : index
      %612 = vector.load %arg6[%c1_420, %c3_421, %c0_422] : memref<2x22x22xf32, #tpu.memory_space<vmem>>, vector<1x16x16xf32>
      %613 = vector.shape_cast %612 : vector<1x16x16xf32> to vector<16x16xf32>
      %614 = vector.broadcast %611 : f32 to vector<16x16xf32>
      %615 = arith.mulf %614, %613 : vector<16x16xf32>
      %616 = arith.addf %568, %615 : vector<16x16xf32>
      %c71 = arith.constant 71 : index
      %617 = memref.load %arg2[%c71] : memref<98xf32, #tpu.memory_space<smem>>
      %c1_423 = arith.constant 1 : index
      %c3_424 = arith.constant 3 : index
      %c1_425 = arith.constant 1 : index
      %618 = vector.load %arg6[%c1_423, %c3_424, %c1_425] : memref<2x22x22xf32, #tpu.memory_space<vmem>>, vector<1x16x16xf32>
      %619 = vector.shape_cast %618 : vector<1x16x16xf32> to vector<16x16xf32>
      %620 = vector.broadcast %617 : f32 to vector<16x16xf32>
      %621 = arith.mulf %620, %619 : vector<16x16xf32>
      %622 = arith.addf %616, %621 : vector<16x16xf32>
      %c72 = arith.constant 72 : index
      %623 = memref.load %arg2[%c72] : memref<98xf32, #tpu.memory_space<smem>>
      %c1_426 = arith.constant 1 : index
      %c3_427 = arith.constant 3 : index
      %c2_428 = arith.constant 2 : index
      %624 = vector.load %arg6[%c1_426, %c3_427, %c2_428] : memref<2x22x22xf32, #tpu.memory_space<vmem>>, vector<1x16x16xf32>
      %625 = vector.shape_cast %624 : vector<1x16x16xf32> to vector<16x16xf32>
      %626 = vector.broadcast %623 : f32 to vector<16x16xf32>
      %627 = arith.mulf %626, %625 : vector<16x16xf32>
      %628 = arith.addf %622, %627 : vector<16x16xf32>
      %c73 = arith.constant 73 : index
      %629 = memref.load %arg2[%c73] : memref<98xf32, #tpu.memory_space<smem>>
      %c1_429 = arith.constant 1 : index
      %c3_430 = arith.constant 3 : index
      %c3_431 = arith.constant 3 : index
      %630 = vector.load %arg6[%c1_429, %c3_430, %c3_431] : memref<2x22x22xf32, #tpu.memory_space<vmem>>, vector<1x16x16xf32>
      %631 = vector.shape_cast %630 : vector<1x16x16xf32> to vector<16x16xf32>
      %632 = vector.broadcast %629 : f32 to vector<16x16xf32>
      %633 = arith.mulf %632, %631 : vector<16x16xf32>
      %634 = arith.addf %628, %633 : vector<16x16xf32>
      %c74 = arith.constant 74 : index
      %635 = memref.load %arg2[%c74] : memref<98xf32, #tpu.memory_space<smem>>
      %c1_432 = arith.constant 1 : index
      %c3_433 = arith.constant 3 : index
      %c4_434 = arith.constant 4 : index
      %636 = vector.load %arg6[%c1_432, %c3_433, %c4_434] : memref<2x22x22xf32, #tpu.memory_space<vmem>>, vector<1x16x16xf32>
      %637 = vector.shape_cast %636 : vector<1x16x16xf32> to vector<16x16xf32>
      %638 = vector.broadcast %635 : f32 to vector<16x16xf32>
      %639 = arith.mulf %638, %637 : vector<16x16xf32>
      %640 = arith.addf %634, %639 : vector<16x16xf32>
      %c75 = arith.constant 75 : index
      %641 = memref.load %arg2[%c75] : memref<98xf32, #tpu.memory_space<smem>>
      %c1_435 = arith.constant 1 : index
      %c3_436 = arith.constant 3 : index
      %c5_437 = arith.constant 5 : index
      %642 = vector.load %arg6[%c1_435, %c3_436, %c5_437] : memref<2x22x22xf32, #tpu.memory_space<vmem>>, vector<1x16x16xf32>
      %643 = vector.shape_cast %642 : vector<1x16x16xf32> to vector<16x16xf32>
      %644 = vector.broadcast %641 : f32 to vector<16x16xf32>
      %645 = arith.mulf %644, %643 : vector<16x16xf32>
      %646 = arith.addf %640, %645 : vector<16x16xf32>
      %c76 = arith.constant 76 : index
      %647 = memref.load %arg2[%c76] : memref<98xf32, #tpu.memory_space<smem>>
      %c1_438 = arith.constant 1 : index
      %c3_439 = arith.constant 3 : index
      %c6_440 = arith.constant 6 : index
      %648 = vector.load %arg6[%c1_438, %c3_439, %c6_440] : memref<2x22x22xf32, #tpu.memory_space<vmem>>, vector<1x16x16xf32>
      %649 = vector.shape_cast %648 : vector<1x16x16xf32> to vector<16x16xf32>
      %650 = vector.broadcast %647 : f32 to vector<16x16xf32>
      %651 = arith.mulf %650, %649 : vector<16x16xf32>
      %652 = arith.addf %646, %651 : vector<16x16xf32>
      %c77 = arith.constant 77 : index
      %653 = memref.load %arg2[%c77] : memref<98xf32, #tpu.memory_space<smem>>
      %c1_441 = arith.constant 1 : index
      %c4_442 = arith.constant 4 : index
      %c0_443 = arith.constant 0 : index
      %654 = vector.load %arg6[%c1_441, %c4_442, %c0_443] : memref<2x22x22xf32, #tpu.memory_space<vmem>>, vector<1x16x16xf32>
      %655 = vector.shape_cast %654 : vector<1x16x16xf32> to vector<16x16xf32>
      %656 = vector.broadcast %653 : f32 to vector<16x16xf32>
      %657 = arith.mulf %656, %655 : vector<16x16xf32>
      %658 = arith.addf %610, %657 : vector<16x16xf32>
      %c78 = arith.constant 78 : index
      %659 = memref.load %arg2[%c78] : memref<98xf32, #tpu.memory_space<smem>>
      %c1_444 = arith.constant 1 : index
      %c4_445 = arith.constant 4 : index
      %c1_446 = arith.constant 1 : index
      %660 = vector.load %arg6[%c1_444, %c4_445, %c1_446] : memref<2x22x22xf32, #tpu.memory_space<vmem>>, vector<1x16x16xf32>
      %661 = vector.shape_cast %660 : vector<1x16x16xf32> to vector<16x16xf32>
      %662 = vector.broadcast %659 : f32 to vector<16x16xf32>
      %663 = arith.mulf %662, %661 : vector<16x16xf32>
      %664 = arith.addf %658, %663 : vector<16x16xf32>
      %c79 = arith.constant 79 : index
      %665 = memref.load %arg2[%c79] : memref<98xf32, #tpu.memory_space<smem>>
      %c1_447 = arith.constant 1 : index
      %c4_448 = arith.constant 4 : index
      %c2_449 = arith.constant 2 : index
      %666 = vector.load %arg6[%c1_447, %c4_448, %c2_449] : memref<2x22x22xf32, #tpu.memory_space<vmem>>, vector<1x16x16xf32>
      %667 = vector.shape_cast %666 : vector<1x16x16xf32> to vector<16x16xf32>
      %668 = vector.broadcast %665 : f32 to vector<16x16xf32>
      %669 = arith.mulf %668, %667 : vector<16x16xf32>
      %670 = arith.addf %664, %669 : vector<16x16xf32>
      %c80_450 = arith.constant 80 : index
      %671 = memref.load %arg2[%c80_450] : memref<98xf32, #tpu.memory_space<smem>>
      %c1_451 = arith.constant 1 : index
      %c4_452 = arith.constant 4 : index
      %c3_453 = arith.constant 3 : index
      %672 = vector.load %arg6[%c1_451, %c4_452, %c3_453] : memref<2x22x22xf32, #tpu.memory_space<vmem>>, vector<1x16x16xf32>
      %673 = vector.shape_cast %672 : vector<1x16x16xf32> to vector<16x16xf32>
      %674 = vector.broadcast %671 : f32 to vector<16x16xf32>
      %675 = arith.mulf %674, %673 : vector<16x16xf32>
      %676 = arith.addf %670, %675 : vector<16x16xf32>
      %c81 = arith.constant 81 : index
      %677 = memref.load %arg2[%c81] : memref<98xf32, #tpu.memory_space<smem>>
      %c1_454 = arith.constant 1 : index
      %c4_455 = arith.constant 4 : index
      %c4_456 = arith.constant 4 : index
      %678 = vector.load %arg6[%c1_454, %c4_455, %c4_456] : memref<2x22x22xf32, #tpu.memory_space<vmem>>, vector<1x16x16xf32>
      %679 = vector.shape_cast %678 : vector<1x16x16xf32> to vector<16x16xf32>
      %680 = vector.broadcast %677 : f32 to vector<16x16xf32>
      %681 = arith.mulf %680, %679 : vector<16x16xf32>
      %682 = arith.addf %676, %681 : vector<16x16xf32>
      %c82 = arith.constant 82 : index
      %683 = memref.load %arg2[%c82] : memref<98xf32, #tpu.memory_space<smem>>
      %c1_457 = arith.constant 1 : index
      %c4_458 = arith.constant 4 : index
      %c5_459 = arith.constant 5 : index
      %684 = vector.load %arg6[%c1_457, %c4_458, %c5_459] : memref<2x22x22xf32, #tpu.memory_space<vmem>>, vector<1x16x16xf32>
      %685 = vector.shape_cast %684 : vector<1x16x16xf32> to vector<16x16xf32>
      %686 = vector.broadcast %683 : f32 to vector<16x16xf32>
      %687 = arith.mulf %686, %685 : vector<16x16xf32>
      %688 = arith.addf %682, %687 : vector<16x16xf32>
      %c83 = arith.constant 83 : index
      %689 = memref.load %arg2[%c83] : memref<98xf32, #tpu.memory_space<smem>>
      %c1_460 = arith.constant 1 : index
      %c4_461 = arith.constant 4 : index
      %c6_462 = arith.constant 6 : index
      %690 = vector.load %arg6[%c1_460, %c4_461, %c6_462] : memref<2x22x22xf32, #tpu.memory_space<vmem>>, vector<1x16x16xf32>
      %691 = vector.shape_cast %690 : vector<1x16x16xf32> to vector<16x16xf32>
      %692 = vector.broadcast %689 : f32 to vector<16x16xf32>
      %693 = arith.mulf %692, %691 : vector<16x16xf32>
      %694 = arith.addf %688, %693 : vector<16x16xf32>
      %c84 = arith.constant 84 : index
      %695 = memref.load %arg2[%c84] : memref<98xf32, #tpu.memory_space<smem>>
      %c1_463 = arith.constant 1 : index
      %c5_464 = arith.constant 5 : index
      %c0_465 = arith.constant 0 : index
      %696 = vector.load %arg6[%c1_463, %c5_464, %c0_465] : memref<2x22x22xf32, #tpu.memory_space<vmem>>, vector<1x16x16xf32>
      %697 = vector.shape_cast %696 : vector<1x16x16xf32> to vector<16x16xf32>
      %698 = vector.broadcast %695 : f32 to vector<16x16xf32>
      %699 = arith.mulf %698, %697 : vector<16x16xf32>
      %700 = arith.addf %652, %699 : vector<16x16xf32>
      %c85 = arith.constant 85 : index
      %701 = memref.load %arg2[%c85] : memref<98xf32, #tpu.memory_space<smem>>
      %c1_466 = arith.constant 1 : index
      %c5_467 = arith.constant 5 : index
      %c1_468 = arith.constant 1 : index
      %702 = vector.load %arg6[%c1_466, %c5_467, %c1_468] : memref<2x22x22xf32, #tpu.memory_space<vmem>>, vector<1x16x16xf32>
      %703 = vector.shape_cast %702 : vector<1x16x16xf32> to vector<16x16xf32>
      %704 = vector.broadcast %701 : f32 to vector<16x16xf32>
      %705 = arith.mulf %704, %703 : vector<16x16xf32>
      %706 = arith.addf %700, %705 : vector<16x16xf32>
      %c86 = arith.constant 86 : index
      %707 = memref.load %arg2[%c86] : memref<98xf32, #tpu.memory_space<smem>>
      %c1_469 = arith.constant 1 : index
      %c5_470 = arith.constant 5 : index
      %c2_471 = arith.constant 2 : index
      %708 = vector.load %arg6[%c1_469, %c5_470, %c2_471] : memref<2x22x22xf32, #tpu.memory_space<vmem>>, vector<1x16x16xf32>
      %709 = vector.shape_cast %708 : vector<1x16x16xf32> to vector<16x16xf32>
      %710 = vector.broadcast %707 : f32 to vector<16x16xf32>
      %711 = arith.mulf %710, %709 : vector<16x16xf32>
      %712 = arith.addf %706, %711 : vector<16x16xf32>
      %c87 = arith.constant 87 : index
      %713 = memref.load %arg2[%c87] : memref<98xf32, #tpu.memory_space<smem>>
      %c1_472 = arith.constant 1 : index
      %c5_473 = arith.constant 5 : index
      %c3_474 = arith.constant 3 : index
      %714 = vector.load %arg6[%c1_472, %c5_473, %c3_474] : memref<2x22x22xf32, #tpu.memory_space<vmem>>, vector<1x16x16xf32>
      %715 = vector.shape_cast %714 : vector<1x16x16xf32> to vector<16x16xf32>
      %716 = vector.broadcast %713 : f32 to vector<16x16xf32>
      %717 = arith.mulf %716, %715 : vector<16x16xf32>
      %718 = arith.addf %712, %717 : vector<16x16xf32>
      %c88 = arith.constant 88 : index
      %719 = memref.load %arg2[%c88] : memref<98xf32, #tpu.memory_space<smem>>
      %c1_475 = arith.constant 1 : index
      %c5_476 = arith.constant 5 : index
      %c4_477 = arith.constant 4 : index
      %720 = vector.load %arg6[%c1_475, %c5_476, %c4_477] : memref<2x22x22xf32, #tpu.memory_space<vmem>>, vector<1x16x16xf32>
      %721 = vector.shape_cast %720 : vector<1x16x16xf32> to vector<16x16xf32>
      %722 = vector.broadcast %719 : f32 to vector<16x16xf32>
      %723 = arith.mulf %722, %721 : vector<16x16xf32>
      %724 = arith.addf %718, %723 : vector<16x16xf32>
      %c89 = arith.constant 89 : index
      %725 = memref.load %arg2[%c89] : memref<98xf32, #tpu.memory_space<smem>>
      %c1_478 = arith.constant 1 : index
      %c5_479 = arith.constant 5 : index
      %c5_480 = arith.constant 5 : index
      %726 = vector.load %arg6[%c1_478, %c5_479, %c5_480] : memref<2x22x22xf32, #tpu.memory_space<vmem>>, vector<1x16x16xf32>
      %727 = vector.shape_cast %726 : vector<1x16x16xf32> to vector<16x16xf32>
      %728 = vector.broadcast %725 : f32 to vector<16x16xf32>
      %729 = arith.mulf %728, %727 : vector<16x16xf32>
      %730 = arith.addf %724, %729 : vector<16x16xf32>
      %c90 = arith.constant 90 : index
      %731 = memref.load %arg2[%c90] : memref<98xf32, #tpu.memory_space<smem>>
      %c1_481 = arith.constant 1 : index
      %c5_482 = arith.constant 5 : index
      %c6_483 = arith.constant 6 : index
      %732 = vector.load %arg6[%c1_481, %c5_482, %c6_483] : memref<2x22x22xf32, #tpu.memory_space<vmem>>, vector<1x16x16xf32>
      %733 = vector.shape_cast %732 : vector<1x16x16xf32> to vector<16x16xf32>
      %734 = vector.broadcast %731 : f32 to vector<16x16xf32>
      %735 = arith.mulf %734, %733 : vector<16x16xf32>
      %736 = arith.addf %730, %735 : vector<16x16xf32>
      %c91 = arith.constant 91 : index
      %737 = memref.load %arg2[%c91] : memref<98xf32, #tpu.memory_space<smem>>
      %c1_484 = arith.constant 1 : index
      %c6_485 = arith.constant 6 : index
      %c0_486 = arith.constant 0 : index
      %738 = vector.load %arg6[%c1_484, %c6_485, %c0_486] : memref<2x22x22xf32, #tpu.memory_space<vmem>>, vector<1x16x16xf32>
      %739 = vector.shape_cast %738 : vector<1x16x16xf32> to vector<16x16xf32>
      %740 = vector.broadcast %737 : f32 to vector<16x16xf32>
      %741 = arith.mulf %740, %739 : vector<16x16xf32>
      %742 = arith.addf %694, %741 : vector<16x16xf32>
      %c92 = arith.constant 92 : index
      %743 = memref.load %arg2[%c92] : memref<98xf32, #tpu.memory_space<smem>>
      %c1_487 = arith.constant 1 : index
      %c6_488 = arith.constant 6 : index
      %c1_489 = arith.constant 1 : index
      %744 = vector.load %arg6[%c1_487, %c6_488, %c1_489] : memref<2x22x22xf32, #tpu.memory_space<vmem>>, vector<1x16x16xf32>
      %745 = vector.shape_cast %744 : vector<1x16x16xf32> to vector<16x16xf32>
      %746 = vector.broadcast %743 : f32 to vector<16x16xf32>
      %747 = arith.mulf %746, %745 : vector<16x16xf32>
      %748 = arith.addf %742, %747 : vector<16x16xf32>
      %c93 = arith.constant 93 : index
      %749 = memref.load %arg2[%c93] : memref<98xf32, #tpu.memory_space<smem>>
      %c1_490 = arith.constant 1 : index
      %c6_491 = arith.constant 6 : index
      %c2_492 = arith.constant 2 : index
      %750 = vector.load %arg6[%c1_490, %c6_491, %c2_492] : memref<2x22x22xf32, #tpu.memory_space<vmem>>, vector<1x16x16xf32>
      %751 = vector.shape_cast %750 : vector<1x16x16xf32> to vector<16x16xf32>
      %752 = vector.broadcast %749 : f32 to vector<16x16xf32>
      %753 = arith.mulf %752, %751 : vector<16x16xf32>
      %754 = arith.addf %748, %753 : vector<16x16xf32>
      %c94 = arith.constant 94 : index
      %755 = memref.load %arg2[%c94] : memref<98xf32, #tpu.memory_space<smem>>
      %c1_493 = arith.constant 1 : index
      %c6_494 = arith.constant 6 : index
      %c3_495 = arith.constant 3 : index
      %756 = vector.load %arg6[%c1_493, %c6_494, %c3_495] : memref<2x22x22xf32, #tpu.memory_space<vmem>>, vector<1x16x16xf32>
      %757 = vector.shape_cast %756 : vector<1x16x16xf32> to vector<16x16xf32>
      %758 = vector.broadcast %755 : f32 to vector<16x16xf32>
      %759 = arith.mulf %758, %757 : vector<16x16xf32>
      %760 = arith.addf %754, %759 : vector<16x16xf32>
      %c95 = arith.constant 95 : index
      %761 = memref.load %arg2[%c95] : memref<98xf32, #tpu.memory_space<smem>>
      %c1_496 = arith.constant 1 : index
      %c6_497 = arith.constant 6 : index
      %c4_498 = arith.constant 4 : index
      %762 = vector.load %arg6[%c1_496, %c6_497, %c4_498] : memref<2x22x22xf32, #tpu.memory_space<vmem>>, vector<1x16x16xf32>
      %763 = vector.shape_cast %762 : vector<1x16x16xf32> to vector<16x16xf32>
      %764 = vector.broadcast %761 : f32 to vector<16x16xf32>
      %765 = arith.mulf %764, %763 : vector<16x16xf32>
      %766 = arith.addf %760, %765 : vector<16x16xf32>
      %c96_499 = arith.constant 96 : index
      %767 = memref.load %arg2[%c96_499] : memref<98xf32, #tpu.memory_space<smem>>
      %c1_500 = arith.constant 1 : index
      %c6_501 = arith.constant 6 : index
      %c5_502 = arith.constant 5 : index
      %768 = vector.load %arg6[%c1_500, %c6_501, %c5_502] : memref<2x22x22xf32, #tpu.memory_space<vmem>>, vector<1x16x16xf32>
      %769 = vector.shape_cast %768 : vector<1x16x16xf32> to vector<16x16xf32>
      %770 = vector.broadcast %767 : f32 to vector<16x16xf32>
      %771 = arith.mulf %770, %769 : vector<16x16xf32>
      %772 = arith.addf %766, %771 : vector<16x16xf32>
      %c97 = arith.constant 97 : index
      %773 = memref.load %arg2[%c97] : memref<98xf32, #tpu.memory_space<smem>>
      %c1_503 = arith.constant 1 : index
      %c6_504 = arith.constant 6 : index
      %c6_505 = arith.constant 6 : index
      %774 = vector.load %arg6[%c1_503, %c6_504, %c6_505] : memref<2x22x22xf32, #tpu.memory_space<vmem>>, vector<1x16x16xf32>
      %775 = vector.shape_cast %774 : vector<1x16x16xf32> to vector<16x16xf32>
      %776 = vector.broadcast %773 : f32 to vector<16x16xf32>
      %777 = arith.mulf %776, %775 : vector<16x16xf32>
      %778 = arith.addf %772, %777 : vector<16x16xf32>
      %779 = arith.addf %484, %442 : vector<16x16xf32>
      %780 = arith.addf %778, %736 : vector<16x16xf32>
      %781 = arith.addf %779, %780 : vector<16x16xf32>
      %782 = arith.negf %781 : vector<16x16xf32>
      %783 = math.exp %782 : vector<16x16xf32>
      %cst_506 = arith.constant 1.000000e+00 : f32
      %784 = vector.broadcast %cst_506 : f32 to vector<16x16xf32>
      %785 = arith.addf %784, %783 : vector<16x16xf32>
      %786 = arith.divf %784, %785 : vector<16x16xf32>
      %c0_507 = arith.constant 0 : index
      %c0_508 = arith.constant 0 : index
      %c0_509 = arith.constant 0 : index
      %c0_510 = arith.constant 0 : index
      %787 = vector.load %arg4[%c0_507, %c0_508, %c0_509, %c0_510] : memref<1x1x16x16xf32, #tpu.memory_space<vmem>>, vector<1x1x16x16xf32>
      %788 = vector.shape_cast %787 : vector<1x1x16x16xf32> to vector<16x16xf32>
      %789 = vector.shape_cast %786 : vector<16x16xf32> to vector<1x1x16x16xf32>
      tpu.vector_store %arg4[%c0_507, %c0_508, %c0_509, %c0_510], %789 {strides = array<i32>} : memref<1x1x16x16xf32, #tpu.memory_space<vmem>>, vector<1x1x16x16xf32>,
    } else {
    }
    return
  }
  func.func @transform_0(%arg0: i32, %arg1: i32, %arg2: memref<98xf32, #tpu.memory_space<smem>>) -> (i32, i32, i32) {
    %c0_i32 = arith.constant 0 : i32
    %c0_i32_0 = arith.constant 0 : i32
    return %arg0, %arg1, %c0_i32 : i32, i32, i32
  }
  func.func @transform_1(%arg0: i32, %arg1: i32, %arg2: memref<98xf32, #tpu.memory_space<smem>>) -> (i32, i32, i32, i32) {
    %c0_i32 = arith.constant 0 : i32
    %c0_i32_0 = arith.constant 0 : i32
    %c0_i32_1 = arith.constant 0 : i32
    %c0_i32_2 = arith.constant 0 : i32
    return %arg0, %c0_i32, %c0_i32_0, %c0_i32_1 : i32, i32, i32, i32
  }
}

</mosaic_0001>

<bundles_post_ra>
// kernel: tpu_custom_call.1
= control target key start
LH: loop header
LB: loop body
LE: loop exit
PB: predicated region body
PF: predicated region fallthrough
CT: control target
= control target key end

     0   :  { %s3402_s0 = inlined_call_operand.hbm [shape: f32[98], index: 0, kind: input, shape index: {}]   ;;  %s3403_s1 = inlined_call_operand.hbm [shape: f32[2,4,256], index: 1, kind: input, shape index: {}]   ;;  %s3404_s2 = inlined_call_operand.hbm [shape: f32[2,1,16,16], index: 2, kind: output, shape index: {}]  }
   0x1   :  { %s2231_s11 = scalar_lea.hbm %s3402_s0, 16 }
   0x2   :  { %p2232_p0 = scmp.ne.s32.totalorder %s3402_s0, %s2231_s11  ;;  %p2235_p1 = scmp.lt.u32.totalorder %s2231_s11, %s3402_s0 }
   0x4   :  { %p2237_p2 = pnand %p2235_p1, %p2232_p0 }
   0x6   :  { %2240 = shalt.err (!%p2237_p2)  }
   0x7   :  { %s2357_s16 = smov [#allocation5]  }
   0x8   :  { %8 = dma.hbm_to_smem %s3402_s0, 16, %s2357_s16, [#allocation4] }
   0x9   :  { %2323 = dma.done.wait [#allocation4], 16 }
   0xa   :  { %2324 = vsyncadd [#allocation4], 4294967280 }
   0xb   :  { %10 = sfence }
   0xc   :  { %11 = vsyncpa [#allocation7], 0 }
   0xd   :  { %13 = vsyncpa [#allocation7 + $0x1], 0 }
   0xe   :  { %14 = vsyncpa [#allocation8], 0 }
   0xf   :  { %16 = vsyncpa [#allocation8 + $0x1], 0  ;;  %s2405_s19 = smov 0   ;;  %s2407_s20 = smov 0  }
  0x10   :  { %s2409_s21 = smov 0   ;;  %s2411_s22 = smov 0  }
  0x11   :  { %s2413_s23 = smov 0   ;;  %s2415_s24 = smov 0  }
  0x12 LB: > { %s1993_s0 = sadd.s32 4294967295, %s2355_s24   ;;  %s1994_s25 = sadd.s32 4294967294, %s2355_s24   ;;  %s2355_s24 = sphi %s2415_s24, %s22_s24   ;;  %s2351_s23 = sphi %s2413_s23, %s3420_s23   ;;  %s2347_s22 = sphi %s2411_s22, %s3419_s22   ;;  %s2343_s21 = sphi %s2409_s21, %s3418_s21   ;;  %s2339_s20 = sphi %s2407_s20, %s3417_s20   ;;  %s2335_s19 = sphi %s2405_s19, %s3416_s19  }
  0x13   : > { %s34_s26 = sadd.s32 1, %s2351_s23  ;;  %s43_s27 = sadd.s32 1, %s2343_s21 }
  0x14   : > { %p36_p3 = scmp.ge.s32.totalorder %s34_s26, 2  ;;  %p50_p4 = scmp.ne.s32.totalorder %s2343_s21, %s2339_s20 }
  0x15   : > { %p51_p5 = scmp.eq.s32.totalorder %s2355_s24, 0  ;;  %p56_p6 = scmp.ne.s32.totalorder %s2339_s20, %s2335_s19 }
  0x16   : > { %s3422_s26 = smov (%p36_p3, %s34_s26), 0  ;;  %p57_p8 = scmp.eq.s32.totalorder %s1993_s0, 0 }
  0x17   : > { %p2446_p7 = por %p51_p5, %p50_p4  ;;  %s38_s29 = ssub.s32 %s2351_s23, %s3422_s26 }
  0x18   : > { %p80_p9 = scmp.eq.s32.totalorder %s1993_s0, 1  ;;  %p41_p10 = scmp.eq.s32.totalorder %s38_s29, 0 }
  0x19   : > { %p2452_p11 = por %p57_p8, %p56_p6  ;;  %p86_p13 = scmp.eq.s32.totalorder %s1994_s25, 1 }
  0x1a   : > { %p2456_p12 = por %p80_p9, %p50_p4  ;;  %p2153_p2 = scmp.lt.s32.totalorder %s2355_s24, 2 }
  0x1b   : > { %s2461_s4 = scalar_select %p41_p10, %s2343_s21, %s43_s27  }
  0x1c   : > { %s3408_s3 = scalar_select %p2456_p12, 1, 0 }
  0x1d   : > { %p2463_p0 = por %p86_p13, %p56_p6  ;;  %s106_s6 = sand.u32 1, %s2343_s21  }
  0x1e   : > { %s1997_s7 = sshll.u32 %s106_s6, 3  ;;  %s2139_s8 = sshll.u32 %s2351_s23, 7 }
  0x1f   : > { %s3409_s5 = scalar_select %p2463_p0, 1, 0 }
  0x20   : > { %s2474_s11 = scalar_lea.hbm %s3403_s1, %s2139_s8  ;;  %s110_s12 = scalar_lea.vmem [#allocation6], %s1997_s7 }
  0x21   : > { %s120_s13 = sshll.u32 %s110_s12, 4  ;;  %p2480_p3 = pnand %p2153_p2, %p2446_p7  ;;  %s2476_s13 = int_to_ptr.vmem [resolvable:$true] %s120_s13 }
  0x22   : > { %s107_s15 = scalar_lea.sflag [#allocation7], %s106_s6  ;;  %s2241_s16 = scalar_lea.hbm %s2474_s11, 128 }
  0x23   : > { %p2242_p6 = scmp.ne.s32.totalorder %s2474_s11, %s2241_s16  ;;  %p2243_p8 = pneg %p2480_p3 }
  0x24   : > { %s2246_s0 = scalar_lea.hbm %s3403_s1, 256  ;;  %p2247_p7 = scmp.lt.u32.totalorder %s2474_s11, %s3403_s1 }
  0x25   : > { %p2244_p9 = pnand %p2243_p8, %p2242_p6  ;;  %p2248_p13 = scmp.lt.u32.totalorder %s2246_s0, %s2241_s16 }
  0x26   : > { %p2250_p1 = scmp.lt.u32.totalorder %s2241_s16, %s2474_s11 }
  0x27   : > { %p2245_p10 = pneg %p2244_p9  ;;  %p2249_p2 = por %p2248_p13, %p2247_p7 }
  0x29   : > { %p2251_p4 = por %p2250_p1, %p2249_p2 }
  0x2b   : > { %p2252_p5 = pnand %p2251_p4, %p2245_p10 }
  0x2d   : > { %2255 = shalt.err (!%p2252_p5)
}
  0x2e   : > { %s2256_s28 = scalar_lea.vmem %s2476_s13, 128  ;;  %s2358_s29 = smov [#allocation6]  }
  0x2f   : > { %p2257_p6 = scmp.ne.s32.totalorder %s2476_s13, %s2256_s28  ;;  %s2261_s6 = sshll.u32 %s2358_s29, 4  ;;  %s2262_s6 = int_to_ptr.vmem [resolvable:$false] %s2261_s6 }
  0x30   : > { %s2263_s7 = scalar_lea.vmem %s2262_s6, 256  ;;  %p2264_p12 = scmp.lt.s32.totalorder %s2476_s13, %s2262_s6 }
  0x31   : > { %p2259_p9 = pnand %p2257_p6, %p2243_p8  ;;  %p2265_p7 = scmp.lt.s32.totalorder %s2263_s7, %s2256_s28 }
  0x33   : > { %p2260_p0 = pneg %p2259_p9  ;;  %p2266_p13 = por %p2265_p7, %p2264_p12 }
  0x35   : > { %p2267_p1 = pnand %p2266_p13, %p2260_p0 }
  0x37   : > { %2270 = shalt.err (!%p2267_p1)
}
  0x38   : > { %2148 = dma.hbm_to_vmem [thread:$0]  (!%p2480_p3), %s2474_s11, 128, %s2476_s13, %s107_s15  }
  0x39   : > { %p3411_p4 = scmp.lt.s32.totalorder %s2355_s24, 3  ;;  %p3412_p5 = scmp.ge.s32.totalorder %s2355_s24, 1 }
  0x3b   : > { %p126_p8 = pnand %p3412_p5, %p3411_p4 }
  0x3c   : > { %s2516_s8 = sand.u32 (!%p126_p8), 1, %s2339_s20  }
  0x3d   : > { %129 = sbr.rel (%p126_p8) target bundleno = 742 (0x2e6), region = 24  ;;  %s2001_s9 = sshll.u32 (!%p126_p8), %s2516_s8, 3 }
  0x3e   : > { %s132_s10 = scalar_lea.sflag (!%p126_p8), [#allocation7], %s2516_s8  ;;  %s135_s12 = scalar_lea.vmem (!%p126_p8), [#allocation6], %s2001_s9 }
  0x44   : > { %2326 = dma.done.wait (%p2452_p11), %s132_s10, 128  }
  0x45   : > { %2328 = vsyncadd (%p2452_p11), %s132_s10, 4294967168  ;;  %vm256_vm0 = vcmask 179200   ;;  %v2359_v0 = vmov 0.0   ;;  %vm180_vm1 = vcmask 1043456   ;;  %v154_v1 = vld [vmem:[%s135_s12] sm:$0xff]  ;;  %v220_v15 = vlaneseq  ;;  %s2361_s30 = smov 99  }
  0x46   : > { %257 = vst.msk [vmem:[#allocation3] sm:$0xff] %vm256_vm0, %v2359_v0  ;;  %258 = vst.msk [vmem:[#allocation3 + $0x8] sm:$0xff] %vm256_vm0, %v2359_v0  ;;  %v178_v2 = vcombine.high %v154_v1, %v154_v1  ;;  %v181_v3 = vsel %vm180_vm1, %v154_v1, -inf  ;;  %v200_v4 = vsel %vm180_vm1, %v154_v1, 0.0  ;;  %v2360_v13 = vmov 1966171168  }
  0x47   : > { %261 = vst.msk [vmem:[#allocation3 + $0x18] sm:$0xff] %vm256_vm0, %v2359_v0  ;;  %262 = vst.msk [vmem:[#allocation3 + $0x20] sm:$0xff] %vm256_vm0, %v2359_v0  ;;  %v182_v5 = vrot.slane %v181_v3, 4  ;;  %v201_v6 = vrot.slane %v200_v4, 4  ;;  %v218_v14 = vunpack.c.l.s4 %v2360_v13  ;;  %v221_v25 = vshrl.u32 %v220_v15, 7  ;;  %s2362_s11 = smov 3  }
  0x48   : > { %159 = vst [vmem:[#allocation2] sm:$0xff] %v154_v1  ;;  %161 = vst [vmem:[#allocation2 + $0x8] sm:$0xff] %v154_v1  ;;  %v188_v7 = vsel %vm180_vm1, %v178_v2, -inf  ;;  %v207_v8 = vsel %vm180_vm1, %v178_v2, 0.0  ;;  %vm234_vm2 = vcmp.lt.s32.totalorder %v220_v15, 256  ;;  %s2363_s13 = smov 83  }
  0x49   : > { %v183_v9 = vmax.f32 %v181_v3, %v182_v5  ;;  %v189_v10 = vrot.slane %v188_v7, 4  ;;  %v202_v11 = vadd.f32 %v201_v6, %v200_v4  ;;  %v208_v12 = vrot.slane %v207_v8, 4  ;;  %s2364_s14 = smov 115   ;;  %s2365_s15 = smov 51  }
  0x4a   : > { %v219_v24 = vunpack.c.0.s8 %v218_v14  ;;  %s2366_s16 = smov 67   ;;  %vm259_vm3 = vcmask 177152   ;;  %s2367_s17 = smov 19   ;;  %vm273_vm4 = vcmask 147480   ;;  %vm1892_vm5 = vcmask 130048  }
  0x4b   : > { %v184_v16 = vrot.slane %v183_v9, 2  ;;  %v190_v17 = vmax.f32 %v188_v7, %v189_v10  ;;  %v203_v18 = vrot.slane %v202_v11, 2  ;;  %v209_v19 = vadd.f32 %v208_v12, %v207_v8  ;;  %260 = vst.msk [vmem:[#allocation3 + $0x10] sm:$0x3f] %vm259_vm3, %v2359_v0  ;;  %263 = vst.msk [vmem:[#allocation3 + $0x28] sm:$0x3f] %vm259_vm3, %v2359_v0 }
  0x4c   : > { %v222_v35 = vsub.s32 %v219_v24, %v221_v25  ;;  %s2368_s18 = smov 35   ;;  %s2562_s0 = sld [smem:[#allocation5 + $0x1]] }
  0x4d   : > { %v185_v20 = vmax.f32 %v183_v9, %v184_v16  ;;  %v191_v21 = vrot.slane %v190_v17, 2  ;;  %v204_v22 = vadd.f32 %v203_v18, %v202_v11  ;;  %v210_v23 = vrot.slane %v209_v19, 2  ;;  %s2566_s25 = sld [smem:[#allocation5 + $0x2]]  ;;  %s2571_s27 = sld [smem:[#allocation5 + $0x3]] }
  0x4e   : > { %s2579_s28 = sld [smem:[#allocation5 + $0x4]]  ;;  %s2369_s29 = smov 127  }
  0x4f   : > { %v186_v26 = vrot.slane %v185_v20, 1  ;;  %v192_v27 = vmax.f32 %v190_v17, %v191_v21  ;;  %v205_v28 = vrot.slane %v204_v22, 1  ;;  %v211_v29 = vadd.f32 %v210_v23, %v209_v19  ;;  %s2586_s6 = sld [smem:[#allocation5 + $0x5]]  ;;  %s2370_s7 = smov 126  }
  0x50   : > { %s2593_s9 = sld [smem:[#allocation5 + $0x6]]  ;;  %s2371_s10 = smov 125  }
  0x51   : > { %v187_v30 = vmax.f32 %v185_v20, %v186_v26  ;;  %v193_v31 = vrot.slane %v192_v27, 1  ;;  %v206_v32 = vadd.f32 %v205_v28, %v204_v22  ;;  %v212_v33 = vrot.slane %v211_v29, 1  ;;  %s2600_s12 = sld [smem:[#allocation5 + $0x8]]  ;;  %p3413_p12 = scmp.ne.s32.totalorder %s3408_s3, 0 }
  0x52   : > { %v595_v55 = vstv %s2562_s0  ;;  %s2659_s0 = sld [smem:[#allocation5 + $0xf]] }
  0x53   : > { %v194_v34 = vmax.f32 %v192_v27, %v193_v31  ;;  %v213_v36 = vadd.f32 %v212_v33, %v211_v29  ;;  %v609_v60 = vstv %s2566_s25  ;;  %v623_v0 = vstv %s2571_s27  ;;  %s2668_s25 = sld [smem:[#allocation5 + $0x10]]  ;;  %s2679_s27 = sld [smem:[#allocation5 + $0x11]] }
  0x54   : > { %v637_v4 = vstv %s2579_s28  ;;  %s2686_s28 = sld [smem:[#allocation5 + $0x12]] }
  0x55   : > { %v216_v37 = vcombine.low %v187_v30, %v194_v34  ;;  %v239_v38 = vcombine.low %v206_v32, %v213_v36  ;;  %v651_v8 = vstv %s2586_s6  ;;  %s2693_s6 = sld [smem:[#allocation5 + $0x13]] }
  0x56   : > { %v665_v14 = vstv %s2593_s9  ;;  %s2700_s9 = sld [smem:[#allocation5 + $0x14]] }
  0x57   : > { %v223_v39 = vrot.slane %v216_v37, %v222_v35  ;;  %v246_v40 = vrot.slane %v239_v38, %v222_v35  ;;  %v687_v20 = vstv %s2600_s12  ;;  %s2709_s12 = sld [smem:[#allocation5 + $0x16]] }
  0x59   : > { %v230_v41 = vrot.slane %v223_v39, %v222_v35  ;;  %v253_v42 = vrot.slane %v246_v40, %v222_v35 }
  0x5b   : > { %236 = vst.msk [vmem:[#allocation2] ss:$4 sm:$0x3] %vm234_vm2, %v230_v41  ;;  %255 = vst.msk [vmem:[#allocation2 + $0x8] ss:$4 sm:$0x3] %vm234_vm2, %v253_v42 }
  0x62   : > { %v2005_v43 = vld [vmem:[#allocation2] ss:$0 sm:$0xff]  ;;  %v2012_v44 = vld [vmem:[#allocation2 + $0x4] ss:$0 sm:$0xff]  ;;  %v2019_v45 = vld [vmem:[#allocation2 + $0x8] ss:$0 sm:$0xff] }
  0x63   : > { %291 = vrot.lane.b32.xlu1 %v2005_v43, %s2361_s30  ;;  %270 = vrot.lane.b32.xlu0 %v2005_v43, %s2362_s11  ;;  %v2027_v46 = vld [vmem:[#allocation2 + $0xc] ss:$0 sm:$0xff] }
  0x67   : > { %301 = vrot.lane.b32.xlu1 %v2005_v43, %s2363_s13  ;;  %281 = vrot.lane.b32.xlu0 %v2005_v43, %s2364_s14 }
  0x6b   : > { %321 = vrot.lane.b32.xlu1 %v2005_v43, %s2365_s15  ;;  %311 = vrot.lane.b32.xlu0 %v2005_v43, %s2366_s16 }
  0x6f   : > { %341 = vrot.lane.b32.xlu1 %v2005_v43, %s2367_s17  ;;  %331 = vrot.lane.b32.xlu0 %v2005_v43, %s2368_s18 }
  0x73   : > { %361 = vrot.lane.b32.xlu1 %v2012_v44, %s2364_s14  ;;  %351 = vrot.lane.b32.xlu0 %v2012_v44, %s2362_s11 }
  0x77   : > { %381 = vrot.lane.b32.xlu1 %v2012_v44, %s2363_s13  ;;  %371 = vrot.lane.b32.xlu0 %v2012_v44, %s2361_s30 }
  0x7b   : > { %401 = vrot.lane.b32.xlu1 %v2012_v44, %s2365_s15  ;;  %391 = vrot.lane.b32.xlu0 %v2012_v44, %s2366_s16 }
  0x7f   : > { %421 = vrot.lane.b32.xlu1 %v2012_v44, %s2367_s17  ;;  %411 = vrot.lane.b32.xlu0 %v2012_v44, %s2368_s18 }
  0x83   : > { %431 = vrot.lane.b32.xlu0 %v2019_v45, %s2362_s11  ;;  %442 = vrot.lane.b32.xlu1 %v2019_v45, %s2364_s14 }
  0x87   : > { %452 = vrot.lane.b32.xlu0 %v2019_v45, %s2361_s30  ;;  %462 = vrot.lane.b32.xlu1 %v2019_v45, %s2363_s13 }
  0x8b   : > { %472 = vrot.lane.b32.xlu0 %v2019_v45, %s2366_s16  ;;  %482 = vrot.lane.b32.xlu1 %v2019_v45, %s2365_s15 }
  0x8f   : > { %492 = vrot.lane.b32.xlu0 %v2019_v45, %s2368_s18  ;;  %502 = vrot.lane.b32.xlu1 %v2019_v45, %s2367_s17 }
  0x93   : > { %512 = vrot.lane.b32.xlu0 %v2027_v46, %s2362_s11  ;;  %522 = vrot.lane.b32.xlu1 %v2027_v46, %s2364_s14  ;;  %s2610_s11 = sld [smem:[#allocation5 + $0x9]]  ;;  %s2621_s14 = sld [smem:[#allocation5 + $0xa]] }
  0x97   : > { %532 = vrot.lane.b32.xlu0 %v2027_v46, %s2361_s30  ;;  %542 = vrot.lane.b32.xlu1 %v2027_v46, %s2363_s13  ;;  %s2372_s30 = smov 124   ;;  %s2373_s13 = smov 123  }
  0x99   : > { %v701_v25 = vstv %s2610_s11  ;;  %v715_v30 = vstv %s2621_s14  ;;  %s2716_s11 = sld [smem:[#allocation5 + $0x17]]  ;;  %s2725_s14 = sld [smem:[#allocation5 + $0x18]] }
  0x9b   : > { %552 = vrot.lane.b32.xlu0 %v2027_v46, %s2366_s16  ;;  %562 = vrot.lane.b32.xlu1 %v2027_v46, %s2365_s15  ;;  %s2374_s15 = smov 122   ;;  %s2630_s16 = sld [smem:[#allocation5 + $0xb]] }
  0x9f   : > { %572 = vrot.lane.b32.xlu0 %v2027_v46, %s2368_s18  ;;  %582 = vrot.lane.b32.xlu1 %v2027_v46, %s2367_s17  ;;  %s2639_s17 = sld [smem:[#allocation5 + $0xc]]  ;;  %s2648_s18 = sld [smem:[#allocation5 + $0xd]] }
  0xa1   : > { %v729_v35 = vstv %s2630_s16  ;;  %s2732_s16 = sld [smem:[#allocation5 + $0x19]] }
  0xa5   : > { %v743_v40 = vstv %s2639_s17  ;;  %v757_v46 = vstv %s2648_s18  ;;  %s2739_s17 = sld [smem:[#allocation5 + $0x1a]]  ;;  %s2746_s18 = sld [smem:[#allocation5 + $0x1b]] }
  0xd5   : > { %v292_v47 = vpop.permute.xlu1 %291  ;;  %v271_v48 = vpop.permute.xlu0 %270 }
  0xd6   : > { %294 = vst.msk [vmem:[#allocation3 + $0x5] sm:$0x1] %vm273_vm4, %v292_v47  ;;  %274 = vst.msk [vmem:[#allocation3 + $0x3] sm:$0x1] %vm273_vm4, %v271_v48 }
  0xd9   : > { %v302_v49 = vpop.permute.xlu1 %301  ;;  %v282_v50 = vpop.permute.xlu0 %281 }
  0xda   : > { %304 = vst.msk [vmem:[#allocation3 + $0x6] sm:$0x1] %vm273_vm4, %v302_v49  ;;  %284 = vst.msk [vmem:[#allocation3 + $0x4] sm:$0x1] %vm273_vm4, %v282_v50 }
  0xdd   : > { %v322_v51 = vpop.permute.xlu1 %321  ;;  %v312_v52 = vpop.permute.xlu0 %311 }
  0xde   : > { %324 = vst.msk [vmem:[#allocation3 + $0x8] sm:$0x1] %vm273_vm4, %v322_v51  ;;  %314 = vst.msk [vmem:[#allocation3 + $0x7] sm:$0x1] %vm273_vm4, %v312_v52  ;;  %v779_v52 = vstv %s2659_s0  ;;  %s2755_s0 = sld [smem:[#allocation5 + $0x1d]] }
  0xe1   : > { %v342_v53 = vpop.permute.xlu1 %341  ;;  %v332_v54 = vpop.permute.xlu0 %331 }
  0xe2   : > { %344 = vst.msk [vmem:[#allocation3 + $0xa] sm:$0x1] %vm273_vm4, %v342_v53  ;;  %334 = vst.msk [vmem:[#allocation3 + $0x9] sm:$0x1] %vm273_vm4, %v332_v54 }
  0xe5   : > { %v362_v56 = vpop.permute.xlu1 %361  ;;  %v352_v57 = vpop.permute.xlu0 %351  ;;  %v2573_v58 = vld [vmem:[#allocation3] sm:$0xff] }
  0xe6   : > { %364 = vst.msk [vmem:[#allocation3 + $0xc] sm:$0x1] %vm273_vm4, %v362_v56  ;;  %354 = vst.msk [vmem:[#allocation3 + $0xb] sm:$0x1] %vm273_vm4, %v352_v57  ;;  %v596_v59 = vmul.f32 %v595_v55, %v2573_v58  ;;  %v610_v63 = vmul.f32 %v609_v60, %v2573_v58  ;;  %v624_v3 = vmul.f32 %v623_v0, %v2573_v58  ;;  %v2618_v19 = vld [vmem:[#allocation3 + $0x1] sm:$0xff] }
  0xe7   : > { %v638_v7 = vmul.f32 %v637_v4, %v2573_v58  ;;  %v652_v12 = vmul.f32 %v651_v8, %v2573_v58  ;;  %v666_v17 = vmul.f32 %v665_v14, %v2573_v58  ;;  %v688_v23 = vmul.f32 %v687_v20, %v2618_v19 }
  0xe8   : > { %600 = vrot.lane.b32.xlu0 %v596_v59, %s2369_s29  ;;  %v702_v28 = vmul.f32 %v701_v25, %v2618_v19  ;;  %v716_v33 = vmul.f32 %v715_v30, %v2618_v19  ;;  %v730_v38 = vmul.f32 %v729_v35, %v2618_v19  ;;  %v744_v44 = vmul.f32 %v743_v40, %v2618_v19 }
  0xe9   : > { %v382_v61 = vpop.permute.xlu1 %381  ;;  %v372_v62 = vpop.permute.xlu0 %371  ;;  %v758_v49 = vmul.f32 %v757_v46, %v2618_v19  ;;  %v2676_v51 = vld [vmem:[#allocation3 + $0x2] sm:$0xff]  ;;  %v807_v59 = vstv %s2679_s27  ;;  %s2771_s27 = sld [smem:[#allocation5 + $0x1f]] }
  0xea   : > { %384 = vst.msk [vmem:[#allocation3 + $0xe] sm:$0x1] %vm273_vm4, %v382_v61  ;;  %374 = vst.msk [vmem:[#allocation3 + $0xd] sm:$0x1] %vm273_vm4, %v372_v62  ;;  %v780_v53 = vmul.f32 %v779_v52, %v2676_v51  ;;  %v821_v62 = vstv %s2686_s28  ;;  %s2778_s28 = sld [smem:[#allocation5 + $0x20]] }
  0xec   : > { %614 = vrot.lane.b32.xlu0 %v610_v63, %s2370_s7  ;;  %v822_v63 = vmul.f32 %v821_v62, %v2676_v51 }
  0xed   : > { %v402_v1 = vpop.permute.xlu1 %401  ;;  %v392_v2 = vpop.permute.xlu0 %391 }
  0xee   : > { %404 = vst.msk [vmem:[#allocation3 + $0x10] sm:$0x1] %vm273_vm4, %v402_v1  ;;  %394 = vst.msk [vmem:[#allocation3 + $0xf] sm:$0x1] %vm273_vm4, %v392_v2  ;;  %v835_v1 = vstv %s2693_s6  ;;  %s2785_s6 = sld [smem:[#allocation5 + $0x21]] }
  0xf0   : > { %628 = vrot.lane.b32.xlu0 %v624_v3, %s2371_s10  ;;  %v836_v3 = vmul.f32 %v835_v1, %v2676_v51 }
  0xf1   : > { %v422_v5 = vpop.permute.xlu1 %421  ;;  %v412_v6 = vpop.permute.xlu0 %411 }
  0xf2   : > { %424 = vst.msk [vmem:[#allocation3 + $0x12] sm:$0x1] %vm273_vm4, %v422_v5  ;;  %414 = vst.msk [vmem:[#allocation3 + $0x11] sm:$0x1] %vm273_vm4, %v412_v6  ;;  %v849_v5 = vstv %s2700_s9  ;;  %s2792_s9 = sld [smem:[#allocation5 + $0x22]] }
  0xf3   : > { %v850_v6 = vmul.f32 %v849_v5, %v2676_v51 }
  0xf4   : > { %642 = vrot.lane.b32.xlu0 %v638_v7, %s2372_s30 }
  0xf5   : > { %v2603_v9 = vld [vmem:[#allocation3 + $0x8] sm:$0xff]  ;;  %v432_v10 = vpop.permute.xlu0 %431  ;;  %v443_v11 = vpop.permute.xlu1 %442 }
  0xf6   : > { %v597_v13 = vmul.f32 %v595_v55, %v2603_v9  ;;  %435 = vst.msk [vmem:[#allocation3 + $0x1b] sm:$0x1] %vm273_vm4, %v432_v10  ;;  %445 = vst.msk [vmem:[#allocation3 + $0x1c] sm:$0x1] %vm273_vm4, %v443_v11  ;;  %v611_v18 = vmul.f32 %v609_v60, %v2603_v9  ;;  %v625_v24 = vmul.f32 %v623_v0, %v2603_v9  ;;  %v2657_v41 = vld [vmem:[#allocation3 + $0x9] sm:$0xff]  ;;  %v793_v55 = vstv %s2668_s25  ;;  %s2762_s25 = sld [smem:[#allocation5 + $0x1e]] }
  0xf7   : > { %v639_v29 = vmul.f32 %v637_v4, %v2603_v9  ;;  %v653_v34 = vmul.f32 %v651_v8, %v2603_v9  ;;  %v667_v39 = vmul.f32 %v665_v14, %v2603_v9  ;;  %v689_v45 = vmul.f32 %v687_v20, %v2657_v41  ;;  %v2722_v8 = vld [vmem:[#allocation3 + $0x3] sm:$0xff] }
  0xf8   : > { %656 = vrot.lane.b32.xlu0 %v652_v12, %s2373_s13  ;;  %602 = vrot.lane.b32.xlu1 %v597_v13, %s2369_s29  ;;  %v703_v50 = vmul.f32 %v701_v25, %v2657_v41  ;;  %v717_v54 = vmul.f32 %v715_v30, %v2657_v41  ;;  %v794_v56 = vmul.f32 %v793_v55, %v2676_v51  ;;  %v871_v10 = vstv %s2709_s12  ;;  %v2768_v30 = vld [vmem:[#allocation3 + $0x4] sm:$0xff]  ;;  %s2801_s12 = sld [smem:[#allocation5 + $0x24]] }
  0xf9   : > { %v453_v15 = vpop.permute.xlu0 %452  ;;  %v463_v16 = vpop.permute.xlu1 %462  ;;  %v731_v57 = vmul.f32 %v729_v35, %v2657_v41  ;;  %v808_v60 = vmul.f32 %v807_v59, %v2676_v51  ;;  %v745_v61 = vmul.f32 %v743_v40, %v2657_v41  ;;  %v759_v0 = vmul.f32 %v757_v46, %v2657_v41  ;;  %v2707_v2 = vld [vmem:[#allocation3 + $0xa] sm:$0xff] }
  0xfa   : > { %455 = vst.msk [vmem:[#allocation3 + $0x1d] sm:$0x1] %vm273_vm4, %v453_v15  ;;  %465 = vst.msk [vmem:[#allocation3 + $0x1e] sm:$0x1] %vm273_vm4, %v463_v16  ;;  %v781_v4 = vmul.f32 %v779_v52, %v2707_v2  ;;  %v795_v7 = vmul.f32 %v793_v55, %v2707_v2  ;;  %v872_v11 = vmul.f32 %v871_v10, %v2722_v8  ;;  %v885_v13 = vstv %s2716_s11  ;;  %s2808_s11 = sld [smem:[#allocation5 + $0x25]] }
  0xfb   : > { %v809_v12 = vmul.f32 %v807_v59, %v2707_v2  ;;  %v886_v14 = vmul.f32 %v885_v13, %v2722_v8  ;;  %v823_v15 = vmul.f32 %v821_v62, %v2707_v2  ;;  %v899_v16 = vstv %s2725_s14  ;;  %s2812_s14 = sld [smem:[#allocation5]] }
  0xfc   : > { %670 = vrot.lane.b32.xlu0 %v666_v17, %s2374_s15  ;;  %616 = vrot.lane.b32.xlu1 %v611_v18, %s2370_s7  ;;  %v900_v17 = vmul.f32 %v899_v16, %v2722_v8  ;;  %v837_v18 = vmul.f32 %v835_v1, %v2707_v2  ;;  %v913_v20 = vstv %s2732_s16  ;;  %v1005_v40 = vstv %s2778_s28  ;;  %s2819_s16 = sld [smem:[#allocation5 + $0x26]]  ;;  %s2861_s28 = sld [smem:[#allocation5 + $0x2c]] }
  0xfd   : > { %v473_v21 = vpop.permute.xlu0 %472  ;;  %v483_v22 = vpop.permute.xlu1 %482 }
  0xfe   : > { %475 = vst.msk [vmem:[#allocation3 + $0x1f] sm:$0x1] %vm273_vm4, %v473_v21  ;;  %485 = vst.msk [vmem:[#allocation3 + $0x20] sm:$0x1] %vm273_vm4, %v483_v22  ;;  %v914_v21 = vmul.f32 %v913_v20, %v2722_v8  ;;  %v851_v22 = vmul.f32 %v849_v5, %v2707_v2 }
 0x100   : > { %692 = vrot.lane.b32.xlu0 %v688_v23, %s2369_s29  ;;  %630 = vrot.lane.b32.xlu1 %v625_v24, %s2371_s10  ;;  %v927_v23 = vstv %s2739_s17  ;;  %v2753_v24 = vld [vmem:[#allocation3 + $0xb] sm:$0xff]  ;;  %v1069_v59 = vstv %s2808_s11  ;;  %s2826_s17 = sld [smem:[#allocation5 + $0x27]] }
 0x101   : > { %v493_v26 = vpop.permute.xlu0 %492  ;;  %v503_v27 = vpop.permute.xlu1 %502  ;;  %v928_v25 = vmul.f32 %v927_v23, %v2722_v8  ;;  %s2892_s11 = sld [smem:[#allocation5 + $0x2f]] }
 0x102   : > { %495 = vst.msk [vmem:[#allocation3 + $0x21] sm:$0x1] %vm273_vm4, %v493_v26  ;;  %505 = vst.msk [vmem:[#allocation3 + $0x22] sm:$0x1] %vm273_vm4, %v503_v27  ;;  %v873_v26 = vmul.f32 %v871_v10, %v2753_v24  ;;  %v941_v27 = vstv %s2746_s18  ;;  %v1083_v1 = vstv %s2819_s16  ;;  %s2835_s18 = sld [smem:[#allocation5 + $0x28]] }
 0x103   : > { %s2901_s16 = sld [smem:[#allocation5 + $0x30]] }
 0x104   : > { %706 = vrot.lane.b32.xlu0 %v702_v28, %s2370_s7  ;;  %644 = vrot.lane.b32.xlu1 %v639_v29, %s2372_s30  ;;  %v942_v28 = vmul.f32 %v941_v27, %v2722_v8  ;;  %v887_v29 = vmul.f32 %v885_v13, %v2753_v24 }
 0x105   : > { %v513_v31 = vpop.permute.xlu0 %512  ;;  %v523_v32 = vpop.permute.xlu1 %522 }
 0x106   : > { %515 = vst.msk [vmem:[#allocation3 + $0x23] sm:$0x1] %vm273_vm4, %v513_v31  ;;  %525 = vst.msk [vmem:[#allocation3 + $0x24] sm:$0x1] %vm273_vm4, %v523_v32  ;;  %v963_v31 = vstv %s2755_s0  ;;  %s2839_s0 = sld [smem:[#allocation5 + $0xe]]  ;;  %v1097_v10 = vstv %s2826_s17  ;;  %s2913_s17 = sld [smem:[#allocation5 + $0x32]] }
 0x107   : > { %v964_v32 = vmul.f32 %v963_v31, %v2768_v30 }
 0x108   : > { %720 = vrot.lane.b32.xlu0 %v716_v33, %s2371_s10  ;;  %658 = vrot.lane.b32.xlu1 %v653_v34, %s2373_s13  ;;  %v901_v33 = vmul.f32 %v899_v16, %v2753_v24  ;;  %v977_v34 = vstv %s2762_s25  ;;  %s2844_s25 = sld [smem:[#allocation5 + $0x29]]  ;;  %v1111_v16 = vstv %s2835_s18  ;;  %s2921_s18 = sld [smem:[#allocation5 + $0x33]] }
 0x109   : > { %v533_v36 = vpop.permute.xlu0 %532  ;;  %v543_v37 = vpop.permute.xlu1 %542  ;;  %v978_v35 = vmul.f32 %v977_v34, %v2768_v30 }
 0x10a   : > { %535 = vst.msk [vmem:[#allocation3 + $0x25] sm:$0x1] %vm273_vm4, %v533_v36  ;;  %545 = vst.msk [vmem:[#allocation3 + $0x26] sm:$0x1] %vm273_vm4, %v543_v37  ;;  %v915_v36 = vmul.f32 %v913_v20, %v2753_v24  ;;  %v991_v37 = vstv %s2771_s27  ;;  %s2853_s27 = sld [smem:[#allocation5 + $0x2b]] }
 0x10c   : > { %734 = vrot.lane.b32.xlu0 %v730_v38, %s2372_s30  ;;  %672 = vrot.lane.b32.xlu1 %v667_v39, %s2374_s15  ;;  %v992_v38 = vmul.f32 %v991_v37, %v2768_v30  ;;  %v929_v39 = vmul.f32 %v927_v23, %v2753_v24 }
 0x10d   : > { %v553_v42 = vpop.permute.xlu0 %552  ;;  %v563_v43 = vpop.permute.xlu1 %562 }
 0x10e   : > { %555 = vst.msk [vmem:[#allocation3 + $0x27] sm:$0x1] %vm273_vm4, %v553_v42  ;;  %565 = vst.msk [vmem:[#allocation3 + $0x28] sm:$0x1] %vm273_vm4, %v563_v43  ;;  %v1006_v42 = vmul.f32 %v1005_v40, %v2768_v30  ;;  %v943_v43 = vmul.f32 %v941_v27, %v2753_v24  ;;  %v1125_v27 = vstv %s2844_s25  ;;  %s2941_s25 = sld [smem:[#allocation5 + $0x35]] }
 0x110   : > { %748 = vrot.lane.b32.xlu0 %v744_v44, %s2373_s13  ;;  %694 = vrot.lane.b32.xlu1 %v689_v45, %s2369_s29  ;;  %v1019_v44 = vstv %s2785_s6  ;;  %v2799_v45 = vld [vmem:[#allocation3 + $0xc] sm:$0xff]  ;;  %s2866_s6 = sld [smem:[#allocation5 + $0x7]] }
 0x111   : > { %v573_v47 = vpop.permute.xlu0 %572  ;;  %v583_v48 = vpop.permute.xlu1 %582  ;;  %v1020_v46 = vmul.f32 %v1019_v44, %v2768_v30  ;;  %v979_v52 = vmul.f32 %v977_v34, %v2799_v45 }
 0x112   : > { %575 = vst.msk [vmem:[#allocation3 + $0x29] sm:$0x1] %vm273_vm4, %v573_v47  ;;  %585 = vst.msk [vmem:[#allocation3 + $0x2a] sm:$0x1] %vm273_vm4, %v583_v48  ;;  %v965_v47 = vmul.f32 %v963_v31, %v2799_v45  ;;  %v1033_v48 = vstv %s2792_s9  ;;  %s2876_s9 = sld [smem:[#allocation5 + $0x2d]] }
 0x114   : > { %762 = vrot.lane.b32.xlu0 %v758_v49, %s2374_s15  ;;  %708 = vrot.lane.b32.xlu1 %v703_v50, %s2370_s7  ;;  %v1034_v50 = vmul.f32 %v1033_v48, %v2768_v30 }
 0x118   : > { %784 = vrot.lane.b32.xlu0 %v780_v53, %s2369_s29  ;;  %722 = vrot.lane.b32.xlu1 %v717_v54, %s2371_s10  ;;  %v2816_v53 = vld [vmem:[#allocation3 + $0x5] sm:$0xff]  ;;  %v1055_v54 = vstv %s2801_s12  ;;  %s2883_s12 = sld [smem:[#allocation5 + $0x2e]] }
 0x119   : > { %v1070_v62 = vmul.f32 %v1069_v59, %v2816_v53  ;;  %v1084_v5 = vmul.f32 %v1083_v1, %v2816_v53  ;;  %v1098_v13 = vmul.f32 %v1097_v10, %v2816_v53  ;;  %v1112_v23 = vmul.f32 %v1111_v16, %v2816_v53 }
 0x11c   : > { %798 = vrot.lane.b32.xlu0 %v794_v56, %s2370_s7  ;;  %736 = vrot.lane.b32.xlu1 %v731_v57, %s2372_s30  ;;  %v1056_v56 = vmul.f32 %v1055_v54, %v2816_v53  ;;  %v993_v57 = vmul.f32 %v991_v37, %v2799_v45 }
 0x120   : > { %812 = vrot.lane.b32.xlu0 %v808_v60, %s2371_s10  ;;  %750 = vrot.lane.b32.xlu1 %v745_v61, %s2373_s13  ;;  %v589_v60 = vstv %s2812_s14  ;;  %s2896_s14 = sld [smem:[#allocation5 + $0x15]] }
 0x124   : > { %826 = vrot.lane.b32.xlu0 %v822_v63, %s2372_s30  ;;  %764 = vrot.lane.b32.xlu1 %v759_v0, %s2374_s15  ;;  %v1007_v63 = vmul.f32 %v1005_v40, %v2799_v45  ;;  %v590_v0 = vmul.f32 %v589_v60, %v2573_v58 }
 0x128   : > { %840 = vrot.lane.b32.xlu0 %v836_v3, %s2373_s13  ;;  %786 = vrot.lane.b32.xlu1 %v781_v4, %s2369_s29 }
 0x12c   : > { %854 = vrot.lane.b32.xlu0 %v850_v6, %s2374_s15  ;;  %800 = vrot.lane.b32.xlu1 %v795_v7, %s2370_s7  ;;  %v1021_v6 = vmul.f32 %v1019_v44, %v2799_v45  ;;  %v1161_v44 = vstv %s2861_s28  ;;  %s2952_s28 = sld [smem:[#allocation5 + $0x1c]] }
 0x130   : > { %876 = vrot.lane.b32.xlu0 %v872_v11, %s2369_s29  ;;  %814 = vrot.lane.b32.xlu1 %v809_v12, %s2371_s10 }
 0x134   : > { %890 = vrot.lane.b32.xlu0 %v886_v14, %s2370_s7  ;;  %828 = vrot.lane.b32.xlu1 %v823_v15, %s2372_s30  ;;  %v1035_v14 = vmul.f32 %v1033_v48, %v2799_v45 }
 0x138   : > { %904 = vrot.lane.b32.xlu0 %v900_v17, %s2371_s10  ;;  %842 = vrot.lane.b32.xlu1 %v837_v18, %s2373_s13  ;;  %v2851_v17 = vld [vmem:[#allocation3 + $0xd] sm:$0xff]  ;;  %v773_v18 = vstv %s2839_s0  ;;  %s2934_s0 = sld [smem:[#allocation5 + $0x34]] }
 0x139   : > { %v1071_v34 = vmul.f32 %v1069_v59, %v2851_v17 }
 0x13c   : > { %918 = vrot.lane.b32.xlu0 %v914_v21, %s2372_s30  ;;  %856 = vrot.lane.b32.xlu1 %v851_v22, %s2374_s15 }
 0x140   : > { %932 = vrot.lane.b32.xlu0 %v928_v25, %s2373_s13  ;;  %878 = vrot.lane.b32.xlu1 %v873_v26, %s2369_s29  ;;  %v1057_v25 = vmul.f32 %v1055_v54, %v2851_v17 }
 0x144   : > { %946 = vrot.lane.b32.xlu0 %v942_v28, %s2374_s15  ;;  %892 = vrot.lane.b32.xlu1 %v887_v29, %s2370_s7  ;;  %v774_v28 = vmul.f32 %v773_v18, %v2676_v51  ;;  %v1147_v51 = vstv %s2853_s27  ;;  %s2948_s27 = sld [smem:[#allocation5 + $0x36]] }
 0x148   : > { %968 = vrot.lane.b32.xlu0 %v964_v32, %s2369_s29  ;;  %906 = vrot.lane.b32.xlu1 %v901_v33, %s2371_s10  ;;  %v1126_v33 = vmul.f32 %v1125_v27, %v2816_v53 }
 0x14c   : > { %982 = vrot.lane.b32.xlu0 %v978_v35, %s2370_s7  ;;  %920 = vrot.lane.b32.xlu1 %v915_v36, %s2372_s30  ;;  %v591_v35 = vmul.f32 %v589_v60, %v2603_v9  ;;  %v2873_v36 = vld [vmem:[#allocation3 + $0x6] sm:$0xff]  ;;  %v681_v9 = vstv %s2866_s6  ;;  %s2958_s6 = sld [smem:[#allocation5 + $0x37]] }
 0x14d   : > { %v1148_v40 = vmul.f32 %v1147_v51, %v2873_v36 }
 0x150   : > { %996 = vrot.lane.b32.xlu0 %v992_v38, %s2371_s10  ;;  %934 = vrot.lane.b32.xlu1 %v929_v39, %s2373_s13 }
 0x154   : > { %1010 = vrot.lane.b32.xlu0 %v1006_v42, %s2372_s30  ;;  %948 = vrot.lane.b32.xlu1 %v943_v43, %s2374_s15  ;;  %v1085_v42 = vmul.f32 %v1083_v1, %v2851_v17  ;;  %v775_v1 = vmul.f32 %v773_v18, %v2707_v2  ;;  %v865_v2 = vstv %s2896_s14  ;;  %s2998_s14 = sld [smem:[#allocation5 + $0x3c]] }
 0x158   : > { %1024 = vrot.lane.b32.xlu0 %v1020_v46, %s2373_s13  ;;  %970 = vrot.lane.b32.xlu1 %v965_v47, %s2369_s29 }
 0x15a   : > { %v601_v49 = vpop.permute.xlu0 %600 }
 0x15b   : > { %v606_v3 = vadd.f32 %v601_v49, %v590_v0  ;;  %v1162_v49 = vmul.f32 %v1161_v44, %v2873_v36  ;;  %v1189_v0 = vstv %s2883_s12  ;;  %s2978_s12 = sld [smem:[#allocation5 + $0x3a]] }
 0x15c   : > { %1038 = vrot.lane.b32.xlu0 %v1034_v50, %s2374_s15  ;;  %984 = vrot.lane.b32.xlu1 %v979_v52, %s2370_s7  ;;  %v1099_v50 = vmul.f32 %v1097_v10, %v2851_v17  ;;  %v682_v52 = vmul.f32 %v681_v9, %v2618_v19  ;;  %v1127_v10 = vmul.f32 %v1125_v27, %v2851_v17 }
 0x15e   : > { %v615_v55 = vpop.permute.xlu0 %614 }
 0x15f   : > { %v620_v7 = vadd.f32 %v615_v55, %v606_v3  ;;  %v1175_v55 = vstv %s2876_s9  ;;  %s2970_s9 = sld [smem:[#allocation5 + $0x39]] }
 0x160   : > { %1060 = vrot.lane.b32.xlu0 %v1056_v56, %s2369_s29  ;;  %998 = vrot.lane.b32.xlu1 %v993_v57, %s2371_s10 }
 0x162   : > { %v629_v61 = vpop.permute.xlu0 %628 }
 0x163   : > { %v634_v58 = vadd.f32 %v629_v61, %v620_v7  ;;  %v1176_v61 = vmul.f32 %v1175_v55, %v2873_v36  ;;  %v1190_v7 = vmul.f32 %v1189_v0, %v2873_v36 }
 0x164   : > { %1074 = vrot.lane.b32.xlu0 %v1070_v62, %s2370_s7  ;;  %1012 = vrot.lane.b32.xlu1 %v1007_v63, %s2372_s30  ;;  %v1113_v62 = vmul.f32 %v1111_v16, %v2851_v17 }
 0x166   : > { %v643_v4 = vpop.permute.xlu0 %642 }
 0x167   : > { %v648_v15 = vadd.f32 %v643_v4, %v634_v58 }
 0x168   : > { %1088 = vrot.lane.b32.xlu0 %v1084_v5, %s2371_s10  ;;  %1026 = vrot.lane.b32.xlu1 %v1021_v6, %s2373_s13 }
 0x16a   : > { %v603_v11 = vpop.permute.xlu1 %602  ;;  %v657_v12 = vpop.permute.xlu0 %656 }
 0x16b   : > { %v662_v20 = vadd.f32 %v657_v12, %v648_v15  ;;  %v607_v37 = vadd.f32 %v603_v11, %v591_v35  ;;  %v2910_v11 = vld [vmem:[#allocation3 + $0xe] sm:$0xff]  ;;  %v1203_v12 = vstv %s2892_s11  ;;  %s2990_s11 = sld [smem:[#allocation5 + $0x3b]] }
 0x16c   : > { %1102 = vrot.lane.b32.xlu0 %v1098_v13, %s2372_s30  ;;  %1040 = vrot.lane.b32.xlu1 %v1035_v14, %s2374_s15  ;;  %v1149_v16 = vmul.f32 %v1147_v51, %v2910_v11  ;;  %v1204_v18 = vmul.f32 %v1203_v12, %v2873_v36  ;;  %v1163_v27 = vmul.f32 %v1161_v44, %v2910_v11 }
 0x16d   : > { %v1177_v51 = vmul.f32 %v1175_v55, %v2910_v11 }
 0x16e   : > { %v617_v21 = vpop.permute.xlu1 %616  ;;  %v671_v22 = vpop.permute.xlu0 %670 }
 0x16f   : > { %v676_v26 = vadd.f32 %v671_v22, %v662_v20  ;;  %v621_v43 = vadd.f32 %v617_v21, %v607_v37  ;;  %v1217_v21 = vstv %s2901_s16  ;;  %v866_v22 = vmul.f32 %v865_v2, %v2722_v8  ;;  %s3005_s16 = sld [smem:[#allocation5 + $0x40]] }
 0x170   : > { %1116 = vrot.lane.b32.xlu0 %v1112_v23, %s2373_s13  ;;  %1062 = vrot.lane.b32.xlu1 %v1057_v25, %s2369_s29 }
 0x171   : > { %v2868_v29 = vadd.f32 %v774_v28, %v676_v26  ;;  %v1218_v28 = vmul.f32 %v1217_v21, %v2873_v36 }
 0x172   : > { %v631_v31 = vpop.permute.xlu1 %630  ;;  %v693_v32 = vpop.permute.xlu0 %692 }
 0x173   : > { %v635_v46 = vadd.f32 %v631_v31, %v621_v43  ;;  %v698_v56 = vadd.f32 %v693_v32, %v682_v52  ;;  %v683_v31 = vmul.f32 %v681_v9, %v2657_v41  ;;  %v2931_v32 = vld [vmem:[#allocation3 + $0x18] sm:$0xff]  ;;  %v1191_v43 = vmul.f32 %v1189_v0, %v2910_v11 }
 0x174   : > { %1130 = vrot.lane.b32.xlu0 %v1126_v33, %s2374_s15  ;;  %1076 = vrot.lane.b32.xlu1 %v1071_v34, %s2370_s7  ;;  %v1239_v33 = vstv %s2913_s17  ;;  %v1205_v52 = vmul.f32 %v1203_v12, %v2910_v11  ;;  %s3009_s17 = sld [smem:[#allocation5 + $0x23]] }
 0x175   : > { %v1240_v37 = vmul.f32 %v1239_v33, %v2931_v32 }
 0x176   : > { %v645_v38 = vpop.permute.xlu1 %644  ;;  %v707_v39 = vpop.permute.xlu0 %706 }
 0x177   : > { %v649_v54 = vadd.f32 %v645_v38, %v635_v46  ;;  %v712_v19 = vadd.f32 %v707_v39, %v698_v56  ;;  %v1253_v39 = vstv %s2921_s18  ;;  %v1267_v46 = vstv %s2934_s0  ;;  %s3015_s18 = sld [smem:[#allocation5 + $0x41]]  ;;  %s3029_s0 = sld [smem:[#allocation5 + $0x42]] }
 0x178   : > { %1152 = vrot.lane.b32.xlu0 %v1148_v40, %s2369_s29  ;;  %1090 = vrot.lane.b32.xlu1 %v1085_v42, %s2371_s10  ;;  %v1254_v44 = vmul.f32 %v1253_v39, %v2931_v32 }
 0x17a   : > { %v659_v47 = vpop.permute.xlu1 %658  ;;  %v721_v48 = vpop.permute.xlu0 %720 }
 0x17b   : > { %v663_v57 = vadd.f32 %v659_v47, %v649_v54  ;;  %v726_v3 = vadd.f32 %v721_v48, %v712_v19  ;;  %v1268_v54 = vmul.f32 %v1267_v46, %v2931_v32  ;;  %v1219_v19 = vmul.f32 %v1217_v21, %v2910_v11  ;;  %v2987_v21 = vld [vmem:[#allocation3 + $0x19] sm:$0xff] }
 0x17c   : > { %1166 = vrot.lane.b32.xlu0 %v1162_v49, %s2370_s7  ;;  %1104 = vrot.lane.b32.xlu1 %v1099_v50, %s2372_s30 }
 0x17e   : > { %v673_v59 = vpop.permute.xlu1 %672  ;;  %v735_v60 = vpop.permute.xlu0 %734 }
 0x17f   : > { %v677_v63 = vadd.f32 %v673_v59, %v663_v57  ;;  %v740_v58 = vadd.f32 %v735_v60, %v726_v3  ;;  %v1281_v57 = vstv %s2941_s25  ;;  %v867_v59 = vmul.f32 %v865_v2, %v2753_v24  ;;  %v2968_v3 = vld [vmem:[#allocation3 + $0x20] sm:$0xff]  ;;  %s3037_s25 = sld [smem:[#allocation5 + $0x43]] }
 0x180   : > { %1180 = vrot.lane.b32.xlu0 %v1176_v61, %s2371_s10  ;;  %1118 = vrot.lane.b32.xlu1 %v1113_v62, %s2373_s13  ;;  %v957_v24 = vstv %s2952_s28  ;;  %v1309_v2 = vstv %s2958_s6  ;;  %s3055_s28 = sld [smem:[#allocation5 + $0x44]]  ;;  %s3064_s6 = sld [smem:[#allocation5 + $0x3e]] }
 0x181   : > { %v2906_v4 = vadd.f32 %v775_v1, %v677_v63  ;;  %v1282_v63 = vmul.f32 %v1281_v57, %v2931_v32  ;;  %v1295_v1 = vstv %s2948_s27  ;;  %s3047_s27 = sld [smem:[#allocation5 + $0x3d]] }
 0x182   : > { %v695_v5 = vpop.permute.xlu1 %694  ;;  %v749_v6 = vpop.permute.xlu0 %748 }
 0x183   : > { %v754_v13 = vadd.f32 %v749_v6, %v740_v58  ;;  %v699_v8 = vadd.f32 %v695_v5, %v683_v31  ;;  %v1241_v58 = vmul.f32 %v1239_v33, %v2968_v3  ;;  %v1345_v33 = vstv %s2978_s12  ;;  %s3074_s12 = sld [smem:[#allocation5 + $0x45]] }
 0x184   : > { %1194 = vrot.lane.b32.xlu0 %v1190_v7, %s2372_s30  ;;  %1132 = vrot.lane.b32.xlu1 %v1127_v10, %s2374_s15  ;;  %v1296_v10 = vmul.f32 %v1295_v1, %v2931_v32 }
 0x186   : > { %v709_v14 = vpop.permute.xlu1 %708  ;;  %v763_v15 = vpop.permute.xlu0 %762 }
 0x187   : > { %v768_v20 = vadd.f32 %v763_v15, %v754_v13  ;;  %v713_v38 = vadd.f32 %v709_v14, %v699_v8  ;;  %v958_v13 = vmul.f32 %v957_v24, %v2768_v30 }
 0x188   : > { %1154 = vrot.lane.b32.xlu1 %v1149_v16, %s2369_s29  ;;  %1208 = vrot.lane.b32.xlu0 %v1204_v18, %s2373_s13  ;;  %v1255_v18 = vmul.f32 %v1253_v39, %v2968_v3 }
 0x189   : > { %v2926_v23 = vadd.f32 %v866_v22, %v768_v20  ;;  %v1310_v20 = vmul.f32 %v1309_v2, %v2931_v32  ;;  %v1331_v22 = vstv %s2970_s9  ;;  %s3068_s9 = sld [smem:[#allocation5 + $0x2a]] }
 0x18a   : > { %v723_v25 = vpop.permute.xlu1 %722  ;;  %v785_v26 = vpop.permute.xlu0 %784 }
 0x18b   : > { %v727_v41 = vadd.f32 %v723_v25, %v713_v38  ;;  %v790_v47 = vadd.f32 %v785_v26, %v2868_v29  ;;  %v1359_v38 = vstv %s2990_s11  ;;  %s3084_s11 = sld [smem:[#allocation5 + $0x47]] }
 0x18c   : > { %1168 = vrot.lane.b32.xlu1 %v1163_v27, %s2370_s7  ;;  %1222 = vrot.lane.b32.xlu0 %v1218_v28, %s2374_s15  ;;  %v1269_v27 = vmul.f32 %v1267_v46, %v2968_v3  ;;  %v1332_v28 = vmul.f32 %v1331_v22, %v2987_v21 }
 0x18e   : > { %v737_v34 = vpop.permute.xlu1 %736  ;;  %v799_v35 = vpop.permute.xlu0 %798 }
 0x18f   : > { %v741_v9 = vadd.f32 %v737_v34, %v727_v41  ;;  %v804_v55 = vadd.f32 %v799_v35, %v790_v47  ;;  %v1373_v47 = vstv %s2998_s14  ;;  %s3092_s14 = sld [smem:[#allocation5 + $0x4e]] }
 0x190   : > { %1182 = vrot.lane.b32.xlu1 %v1177_v51, %s2371_s10  ;;  %1244 = vrot.lane.b32.xlu0 %v1240_v37, %s2369_s29  ;;  %v1346_v51 = vmul.f32 %v1345_v33, %v2987_v21 }
 0x192   : > { %v751_v40 = vpop.permute.xlu1 %750  ;;  %v813_v42 = vpop.permute.xlu0 %812 }
 0x193   : > { %v755_v48 = vadd.f32 %v751_v40, %v741_v9  ;;  %v818_v29 = vadd.f32 %v813_v42, %v804_v55  ;;  %v1374_v55 = vmul.f32 %v1373_v47, %v2987_v21 }
 0x194   : > { %1196 = vrot.lane.b32.xlu1 %v1191_v43, %s2372_s30  ;;  %1258 = vrot.lane.b32.xlu0 %v1254_v44, %s2370_s7  ;;  %v1297_v43 = vmul.f32 %v1295_v1, %v2968_v3  ;;  %v1360_v44 = vmul.f32 %v1359_v38, %v2987_v21 }
 0x196   : > { %v765_v49 = vpop.permute.xlu1 %764  ;;  %v827_v50 = vpop.permute.xlu0 %826 }
 0x197   : > { %v769_v56 = vadd.f32 %v765_v49, %v755_v48  ;;  %v832_v0 = vadd.f32 %v827_v50, %v818_v29  ;;  %v959_v48 = vmul.f32 %v957_v24, %v2799_v45  ;;  %v1423_v45 = vstv %s3005_s16  ;;  %s3104_s16 = sld [smem:[#allocation5 + $0x48]] }
 0x198   : > { %1210 = vrot.lane.b32.xlu1 %v1205_v52, %s2373_s13  ;;  %1272 = vrot.lane.b32.xlu0 %v1268_v54, %s2371_s10  ;;  %v1311_v54 = vmul.f32 %v1309_v2, %v2968_v3  ;;  %v1049_v29 = vstv %s3009_s17  ;;  %v1437_v24 = vstv %s3015_s18  ;;  %s3114_s17 = sld [smem:[#allocation5 + $0x4f]]  ;;  %s3121_s18 = sld [smem:[#allocation5 + $0x49]] }
 0x199   : > { %v2963_v60 = vadd.f32 %v867_v59, %v769_v56  ;;  %v3026_v59 = vld [vmem:[#allocation3 + $0x1a] sm:$0xff]  ;;  %v1451_v2 = vstv %s3029_s0  ;;  %s3129_s0 = sld [smem:[#allocation5 + $0x50]] }
 0x19a   : > { %v787_v61 = vpop.permute.xlu1 %786  ;;  %v841_v62 = vpop.permute.xlu0 %840 }
 0x19b   : > { %v846_v5 = vadd.f32 %v841_v62, %v832_v0  ;;  %v791_v30 = vadd.f32 %v787_v61, %v2906_v4  ;;  %v1283_v4 = vmul.f32 %v1281_v57, %v2968_v3  ;;  %v3024_v57 = vld [vmem:[#allocation3 + $0x21] sm:$0xff]  ;;  %v1424_v0 = vmul.f32 %v1423_v45, %v3026_v59 }
 0x19c   : > { %1224 = vrot.lane.b32.xlu1 %v1219_v19, %s2374_s15  ;;  %1286 = vrot.lane.b32.xlu0 %v1282_v63, %s2372_s30  ;;  %v1333_v63 = vmul.f32 %v1331_v22, %v3024_v57  ;;  %v1465_v22 = vstv %s3037_s25  ;;  %s3141_s25 = sld [smem:[#allocation5 + $0x4a]] }
 0x19e   : > { %v801_v6 = vpop.permute.xlu1 %800  ;;  %v855_v7 = vpop.permute.xlu0 %854 }
 0x19f   : > { %v860_v12 = vadd.f32 %v855_v7, %v846_v5  ;;  %v805_v31 = vadd.f32 %v801_v6, %v791_v30  ;;  %v1050_v5 = vmul.f32 %v1049_v29, %v2816_v53 }
 0x1a0   : > { %1300 = vrot.lane.b32.xlu0 %v1296_v10, %s2373_s13  ;;  %1246 = vrot.lane.b32.xlu1 %v1241_v58, %s2369_s29  ;;  %v1347_v58 = vmul.f32 %v1345_v33, %v3024_v57  ;;  %v1387_v33 = vstv %s3047_s27  ;;  %s3152_s27 = sld [smem:[#allocation5 + $0x51]] }
 0x1a1   : > { %v2983_v14 = vadd.f32 %v958_v13, %v860_v12  ;;  %v1438_v12 = vmul.f32 %v1437_v24, %v3026_v59 }
 0x1a2   : > { %v815_v15 = vpop.permute.xlu1 %814  ;;  %v877_v16 = vpop.permute.xlu0 %876 }
 0x1a3   : > { %v819_v8 = vadd.f32 %v815_v15, %v805_v31  ;;  %v882_v39 = vadd.f32 %v877_v16, %v2926_v23  ;;  %v1361_v16 = vmul.f32 %v1359_v38, %v3024_v57  ;;  %v3061_v31 = vld [vmem:[#allocation3 + $0x22] sm:$0xff] }
 0x1a4   : > { %1260 = vrot.lane.b32.xlu1 %v1255_v18, %s2370_s7  ;;  %1314 = vrot.lane.b32.xlu0 %v1310_v20, %s2374_s15  ;;  %v1452_v18 = vmul.f32 %v1451_v2, %v3026_v59 }
 0x1a6   : > { %v829_v25 = vpop.permute.xlu1 %828  ;;  %v891_v26 = vpop.permute.xlu0 %890 }
 0x1a7   : > { %v833_v37 = vadd.f32 %v829_v25, %v819_v8  ;;  %v896_v9 = vadd.f32 %v891_v26, %v882_v39 }
 0x1a8   : > { %1274 = vrot.lane.b32.xlu1 %v1269_v27, %s2371_s10  ;;  %1336 = vrot.lane.b32.xlu0 %v1332_v28, %s2369_s29  ;;  %v1466_v27 = vmul.f32 %v1465_v22, %v3026_v59 }
 0x1aa   : > { %v843_v34 = vpop.permute.xlu1 %842  ;;  %v905_v35 = vpop.permute.xlu0 %904 }
 0x1ab   : > { %v847_v41 = vadd.f32 %v843_v34, %v833_v37  ;;  %v910_v23 = vadd.f32 %v905_v35, %v896_v9  ;;  %v1388_v37 = vmul.f32 %v1387_v33, %v2987_v21  ;;  %v1439_v9 = vmul.f32 %v1437_v24, %v3061_v31 }
 0x1ac   : > { %1288 = vrot.lane.b32.xlu1 %v1283_v4, %s2372_s30  ;;  %1350 = vrot.lane.b32.xlu0 %v1346_v51, %s2370_s7  ;;  %v1425_v51 = vmul.f32 %v1423_v45, %v3061_v31  ;;  %v1493_v45 = vstv %s3074_s12  ;;  %v1515_v24 = vstv %s3084_s11  ;;  %s3181_s12 = sld [smem:[#allocation5 + $0x31]]  ;;  %s3186_s11 = sld [smem:[#allocation5 + $0x53]] }
 0x1ae   : > { %v857_v40 = vpop.permute.xlu1 %856  ;;  %v919_v42 = vpop.permute.xlu0 %918 }
 0x1af   : > { %v861_v46 = vadd.f32 %v857_v40, %v847_v41  ;;  %v924_v56 = vadd.f32 %v919_v42, %v910_v23  ;;  %v1479_v41 = vstv %s3055_s28  ;;  %v1051_v40 = vmul.f32 %v1049_v29, %v2851_v17  ;;  %s3160_s28 = sld [smem:[#allocation5 + $0x4b]] }
 0x1b0   : > { %1302 = vrot.lane.b32.xlu1 %v1297_v43, %s2373_s13  ;;  %1364 = vrot.lane.b32.xlu0 %v1360_v44, %s2371_s10  ;;  %v1141_v17 = vstv %s3068_s9  ;;  %s3175_s9 = sld [smem:[#allocation5 + $0x4c]] }
 0x1b1   : > { %v3020_v49 = vadd.f32 %v959_v48, %v861_v46  ;;  %v1480_v46 = vmul.f32 %v1479_v41, %v3026_v59  ;;  %v1401_v48 = vstv %s3064_s6  ;;  %v1142_v29 = vmul.f32 %v1141_v17, %v2873_v36  ;;  %s3168_s6 = sld [smem:[#allocation5 + $0x52]] }
 0x1b2   : > { %v879_v50 = vpop.permute.xlu1 %878  ;;  %v933_v52 = vpop.permute.xlu0 %932 }
 0x1b3   : > { %v938_v61 = vadd.f32 %v933_v52, %v924_v56  ;;  %v883_v53 = vadd.f32 %v879_v50, %v2963_v60  ;;  %v1375_v60 = vmul.f32 %v1373_v47, %v3024_v57 }
 0x1b4   : > { %1316 = vrot.lane.b32.xlu1 %v1311_v54, %s2374_s15  ;;  %1378 = vrot.lane.b32.xlu0 %v1374_v55, %s2372_s30  ;;  %v1453_v54 = vmul.f32 %v1451_v2, %v3061_v31  ;;  %v1402_v55 = vmul.f32 %v1401_v48, %v2987_v21  ;;  %v3111_v2 = vld [vmem:[#allocation3 + $0x1c] sm:$0xff] }
 0x1b6   : > { %v893_v62 = vpop.permute.xlu1 %892  ;;  %v947_v19 = vpop.permute.xlu0 %946 }
 0x1b7   : > { %v952_v1 = vadd.f32 %v947_v19, %v938_v61  ;;  %v897_v20 = vadd.f32 %v893_v62, %v883_v53  ;;  %v1607_v53 = vstv %s3092_s14  ;;  %s3194_s14 = sld [smem:[#allocation5 + $0x55]] }
 0x1b8   : > { %1338 = vrot.lane.b32.xlu1 %v1333_v63, %s2369_s29  ;;  %1428 = vrot.lane.b32.xlu0 %v1424_v0, %s2369_s29  ;;  %v1467_v63 = vmul.f32 %v1465_v22, %v3061_v31  ;;  %v1494_v0 = vmul.f32 %v1493_v45, %v3026_v59  ;;  %v1529_v22 = vstv %s3104_s16  ;;  %s3202_s16 = sld [smem:[#allocation5 + $0x5c]] }
 0x1b9   : > { %v3042_v6 = vadd.f32 %v1050_v5, %v952_v1  ;;  %v3101_v1 = vld [vmem:[#allocation3 + $0x1b] sm:$0xff] }
 0x1ba   : > { %v907_v7 = vpop.permute.xlu1 %906  ;;  %v969_v10 = vpop.permute.xlu0 %968 }
 0x1bb   : > { %v911_v30 = vadd.f32 %v907_v7, %v897_v20  ;;  %v974_v8 = vadd.f32 %v969_v10, %v2983_v14  ;;  %v1389_v10 = vmul.f32 %v1387_v33, %v3024_v57 }
 0x1bc   : > { %1352 = vrot.lane.b32.xlu1 %v1347_v58, %s2370_s7  ;;  %1442 = vrot.lane.b32.xlu0 %v1438_v12, %s2370_s7  ;;  %v1516_v58 = vmul.f32 %v1515_v24, %v3101_v1 }
 0x1be   : > { %v921_v13 = vpop.permute.xlu1 %920  ;;  %v983_v15 = vpop.permute.xlu0 %982 }
 0x1bf   : > { %v925_v28 = vadd.f32 %v921_v13, %v911_v30  ;;  %v988_v38 = vadd.f32 %v983_v15, %v974_v8 }
 0x1c0   : > { %1366 = vrot.lane.b32.xlu1 %v1361_v16, %s2371_s10  ;;  %1456 = vrot.lane.b32.xlu0 %v1452_v18, %s2371_s10  ;;  %v1481_v16 = vmul.f32 %v1479_v41, %v3061_v31  ;;  %v1608_v18 = vmul.f32 %v1607_v53, %v3111_v2 }
 0x1c2   : > { %v935_v25 = vpop.permute.xlu1 %934  ;;  %v997_v26 = vpop.permute.xlu0 %996 }
 0x1c3   : > { %v939_v34 = vadd.f32 %v935_v25, %v925_v28  ;;  %v1002_v14 = vadd.f32 %v997_v26, %v988_v38  ;;  %v1530_v28 = vmul.f32 %v1529_v22, %v3101_v1  ;;  %v1495_v38 = vmul.f32 %v1493_v45, %v3061_v31 }
 0x1c4   : > { %1380 = vrot.lane.b32.xlu1 %v1375_v60, %s2372_s30  ;;  %1470 = vrot.lane.b32.xlu0 %v1466_v27, %s2372_s30  ;;  %v1403_v27 = vmul.f32 %v1401_v48, %v3024_v57  ;;  %v3149_v48 = vld [vmem:[#allocation3 + $0x24] sm:$0xff] }
 0x1c6   : > { %v949_v35 = vpop.permute.xlu1 %948  ;;  %v1011_v4 = vpop.permute.xlu0 %1010 }
 0x1c7   : > { %v953_v39 = vadd.f32 %v949_v35, %v939_v34  ;;  %v1016_v47 = vadd.f32 %v1011_v4, %v1002_v14  ;;  %v1621_v34 = vstv %s3114_s17  ;;  %v1143_v35 = vmul.f32 %v1141_v17, %v2910_v11  ;;  %s3215_s17 = sld [smem:[#allocation5 + $0x56]] }
 0x1c8   : > { %1430 = vrot.lane.b32.xlu1 %v1425_v51, %s2369_s29  ;;  %1392 = vrot.lane.b32.xlu0 %v1388_v37, %s2373_s13  ;;  %v1543_v14 = vstv %s3121_s18  ;;  %v1635_v17 = vstv %s3129_s0  ;;  %s3224_s18 = sld [smem:[#allocation5 + $0x5d]]  ;;  %s3231_s0 = sld [smem:[#allocation5 + $0x57]] }
 0x1c9   : > { %v3079_v42 = vadd.f32 %v1051_v40, %v953_v39  ;;  %v1622_v39 = vmul.f32 %v1621_v34, %v3111_v2  ;;  %v3138_v40 = vld [vmem:[#allocation3 + $0x23] sm:$0xff] }
 0x1ca   : > { %v971_v43 = vpop.permute.xlu1 %970  ;;  %v1025_v44 = vpop.permute.xlu0 %1024 }
 0x1cb   : > { %v1030_v23 = vadd.f32 %v1025_v44, %v1016_v47  ;;  %v975_v36 = vadd.f32 %v971_v43, %v3020_v49 }
 0x1cc   : > { %1444 = vrot.lane.b32.xlu1 %v1439_v9, %s2370_s7  ;;  %1484 = vrot.lane.b32.xlu0 %v1480_v46, %s2373_s13  ;;  %v1517_v9 = vmul.f32 %v1515_v24, %v3138_v40  ;;  %v1544_v46 = vmul.f32 %v1543_v14, %v3101_v1 }
 0x1ce   : > { %v985_v50 = vpop.permute.xlu1 %984  ;;  %v1039_v52 = vpop.permute.xlu0 %1038 }
 0x1cf   : > { %v1044_v56 = vadd.f32 %v1039_v52, %v1030_v23  ;;  %v989_v12 = vadd.f32 %v985_v50, %v975_v36  ;;  %v1609_v52 = vmul.f32 %v1607_v53, %v3149_v48  ;;  %v1649_v36 = vstv %s3152_s27  ;;  %s3239_s27 = sld [smem:[#allocation5 + $0x38]] }
 0x1d0   : > { %1458 = vrot.lane.b32.xlu1 %v1453_v54, %s2371_s10  ;;  %1406 = vrot.lane.b32.xlu0 %v1402_v55, %s2374_s15  ;;  %v1636_v54 = vmul.f32 %v1635_v17, %v3111_v2  ;;  %v1571_v53 = vstv %s3160_s28  ;;  %s3242_s28 = sld [smem:[#allocation5 + $0x5e]] }
 0x1d1   : > { %v3097_v61 = vadd.f32 %v1142_v29, %v1044_v56  ;;  %v1557_v56 = vstv %s3141_s25  ;;  %s3235_s25 = sld [smem:[#allocation5 + $0x3f]] }
 0x1d2   : > { %v999_v62 = vpop.permute.xlu1 %998  ;;  %v1061_v19 = vpop.permute.xlu0 %1060 }
 0x1d3   : > { %v1003_v13 = vadd.f32 %v999_v62, %v989_v12  ;;  %v1066_v30 = vadd.f32 %v1061_v19, %v3042_v6  ;;  %v1531_v19 = vmul.f32 %v1529_v22, %v3138_v40 }
 0x1d4   : > { %1472 = vrot.lane.b32.xlu1 %v1467_v63, %s2372_s30  ;;  %1498 = vrot.lane.b32.xlu0 %v1494_v0, %s2374_s15  ;;  %v1558_v63 = vmul.f32 %v1557_v56, %v3101_v1 }
 0x1d6   : > { %v1013_v5 = vpop.permute.xlu1 %1012  ;;  %v1075_v7 = vpop.permute.xlu0 %1074 }
 0x1d7   : > { %v1017_v20 = vadd.f32 %v1013_v5, %v1003_v13  ;;  %v1080_v33 = vadd.f32 %v1075_v7, %v1066_v30  ;;  %v1663_v30 = vstv %s3168_s6  ;;  %s3255_s6 = sld [smem:[#allocation5 + $0x58]] }
 0x1d8   : > { %1394 = vrot.lane.b32.xlu1 %v1389_v10, %s2373_s13  ;;  %1520 = vrot.lane.b32.xlu0 %v1516_v58, %s2369_s29  ;;  %v1650_v10 = vmul.f32 %v1649_v36, %v3111_v2 }
 0x1da   : > { %v1027_v15 = vpop.permute.xlu1 %1026  ;;  %v1089_v49 = vpop.permute.xlu0 %1088 }
 0x1db   : > { %v1031_v25 = vadd.f32 %v1027_v15, %v1017_v20  ;;  %v1094_v6 = vadd.f32 %v1089_v49, %v1080_v33 }
 0x1dc   : > { %1486 = vrot.lane.b32.xlu1 %v1481_v16, %s2373_s13  ;;  %1612 = vrot.lane.b32.xlu0 %v1608_v18, %s2369_s29  ;;  %v1545_v16 = vmul.f32 %v1543_v14, %v3138_v40  ;;  %v1572_v18 = vmul.f32 %v1571_v53, %v3101_v1 }
 0x1de   : > { %v1041_v26 = vpop.permute.xlu1 %1040  ;;  %v1103_v60 = vpop.permute.xlu0 %1102 }
 0x1df   : > { %v1045_v8 = vadd.f32 %v1041_v26, %v1031_v25  ;;  %v1108_v41 = vadd.f32 %v1103_v60, %v1094_v6  ;;  %v1637_v60 = vmul.f32 %v1635_v17, %v3149_v48  ;;  %v1559_v6 = vmul.f32 %v1557_v56, %v3138_v40 }
 0x1e0   : > { %1408 = vrot.lane.b32.xlu1 %v1403_v27, %s2374_s15  ;;  %1534 = vrot.lane.b32.xlu0 %v1530_v28, %s2370_s7  ;;  %v1664_v27 = vmul.f32 %v1663_v30, %v3111_v2 }
 0x1e1   : > { %v3134_v4 = vadd.f32 %v1143_v35, %v1045_v8  ;;  %v1585_v8 = vstv %s3175_s9  ;;  %s3266_s9 = sld [smem:[#allocation5 + $0x5f]] }
 0x1e2   : > { %v1063_v51 = vpop.permute.xlu1 %1062  ;;  %v1117_v37 = vpop.permute.xlu0 %1116 }
 0x1e3   : > { %v1122_v11 = vadd.f32 %v1117_v37, %v1108_v41  ;;  %v1067_v45 = vadd.f32 %v1063_v51, %v3079_v42  ;;  %v1623_v42 = vmul.f32 %v1621_v34, %v3149_v48  ;;  %v1586_v51 = vmul.f32 %v1585_v8, %v3101_v1 }
 0x1e4   : > { %1500 = vrot.lane.b32.xlu1 %v1495_v38, %s2374_s15  ;;  %1626 = vrot.lane.b32.xlu0 %v1622_v39, %s2370_s7  ;;  %v1233_v37 = vstv %s3181_s12  ;;  %v1677_v41 = vstv %s3186_s11  ;;  %s3275_s12 = sld [smem:[#allocation5 + $0x59]]  ;;  %s3282_s11 = sld [smem:[#allocation5 + $0x60]] }
 0x1e5   : > { %v1234_v14 = vmul.f32 %v1233_v37, %v2931_v32 }
 0x1e6   : > { %v1077_v43 = vpop.permute.xlu1 %1076  ;;  %v1131_v44 = vpop.permute.xlu0 %1130 }
 0x1e7   : > { %v3147_v47 = vadd.f32 %v1131_v44, %v1122_v11  ;;  %v1081_v0 = vadd.f32 %v1077_v43, %v1067_v45  ;;  %v1651_v44 = vmul.f32 %v1649_v36, %v3149_v48  ;;  %v3221_v45 = vld [vmem:[#allocation3 + $0x1e] sm:$0xff] }
 0x1e8   : > { %1522 = vrot.lane.b32.xlu1 %v1517_v9, %s2369_s29  ;;  %1548 = vrot.lane.b32.xlu0 %v1544_v46, %s2371_s10  ;;  %v1678_v9 = vmul.f32 %v1677_v41, %v3111_v2 }
 0x1ea   : > { %v1091_v23 = vpop.permute.xlu1 %1090  ;;  %v1153_v50 = vpop.permute.xlu0 %1152 }
 0x1eb   : > { %v1158_v55 = vadd.f32 %v1153_v50, %v3097_v61  ;;  %v1095_v61 = vadd.f32 %v1091_v23, %v1081_v0  ;;  %v3212_v23 = vld [vmem:[#allocation3 + $0x1d] sm:$0xff]  ;;  %v1699_v50 = vstv %s3194_s14  ;;  %s3296_s14 = sld [smem:[#allocation5 + $0x61]] }
 0x1ec   : > { %1614 = vrot.lane.b32.xlu1 %v1609_v52, %s2369_s29  ;;  %1640 = vrot.lane.b32.xlu0 %v1636_v54, %s2371_s10  ;;  %v1573_v52 = vmul.f32 %v1571_v53, %v3138_v40  ;;  %v1700_v54 = vmul.f32 %v1699_v50, %v3212_v23  ;;  %v1805_v53 = vstv %s3224_s18 }
 0x1ee   : > { %v1105_v29 = vpop.permute.xlu1 %1104  ;;  %v1167_v62 = vpop.permute.xlu0 %1166 }
 0x1ef   : > { %v1172_v24 = vadd.f32 %v1167_v62, %v1158_v55  ;;  %v1109_v58 = vadd.f32 %v1105_v29, %v1095_v61  ;;  %v1791_v29 = vstv %s3202_s16  ;;  %v1713_v61 = vstv %s3215_s17  ;;  %s2140_s17 = sshll.u32 %s2347_s22, 8  ;;  %s2375_s22 = smov [#allocation9]  }
 0x1f0   : > { %1536 = vrot.lane.b32.xlu1 %v1531_v19, %s2370_s7  ;;  %1562 = vrot.lane.b32.xlu0 %v1558_v63, %s2372_s30  ;;  %v1665_v63 = vmul.f32 %v1663_v30, %v3149_v48  ;;  %v1792_v0 = vmul.f32 %v1791_v29, %v3221_v45 }
 0x1f2   : > { %v1119_v5 = vpop.permute.xlu1 %1118  ;;  %v1181_v7 = vpop.permute.xlu0 %1180 }
 0x1f3   : > { %v1186_v12 = vadd.f32 %v1181_v7, %v1172_v24  ;;  %v1123_v13 = vadd.f32 %v1119_v5, %v1109_v58 }
 0x1f4   : > { %1628 = vrot.lane.b32.xlu1 %v1623_v42, %s2370_s7  ;;  %1654 = vrot.lane.b32.xlu0 %v1650_v10, %s2372_s30  ;;  %v1587_v42 = vmul.f32 %v1585_v8, %v3138_v40  ;;  %v1714_v10 = vmul.f32 %v1713_v61, %v3212_v23  ;;  %v1325_v8 = vstv %s3239_s27  ;;  %s3351_s27 = scalar_lea.hbm %s3404_s2, %s2140_s17 }
 0x1f6   : > { %v1133_v15 = vpop.permute.xlu1 %1132  ;;  %v1195_v49 = vpop.permute.xlu0 %1194 }
 0x1f7   : > { %v3183_v20 = vadd.f32 %v1133_v15, %v1123_v13  ;;  %v1200_v22 = vadd.f32 %v1195_v49, %v1186_v12  ;;  %v1235_v15 = vmul.f32 %v1233_v37, %v2968_v3  ;;  %v1417_v3 = vstv %s3235_s25 }
 0x1f8   : > { %1550 = vrot.lane.b32.xlu1 %v1545_v16, %s2371_s10  ;;  %1576 = vrot.lane.b32.xlu0 %v1572_v18, %s2373_s13  ;;  %v1679_v18 = vmul.f32 %v1677_v41, %v3149_v48  ;;  %v1418_v37 = vmul.f32 %v1417_v3, %v3026_v59 }
 0x1fa   : > { %v1155_v25 = vpop.permute.xlu1 %1154  ;;  %v1209_v26 = vpop.permute.xlu0 %1208 }
 0x1fb   : > { %v1159_v28 = vadd.f32 %v1155_v25, %v3134_v4  ;;  %v1214_v33 = vadd.f32 %v1209_v26, %v1200_v22  ;;  %v1806_v22 = vmul.f32 %v1805_v53, %v3221_v45  ;;  %v3252_v26 = vld [vmem:[#allocation3 + $0x25] sm:$0xff] }
 0x1fc   : > { %1642 = vrot.lane.b32.xlu1 %v1637_v60, %s2371_s10  ;;  %1668 = vrot.lane.b32.xlu0 %v1664_v27, %s2373_s13  ;;  %v1727_v60 = vstv %s3231_s0 }
 0x1fe   : > { %v1169_v34 = vpop.permute.xlu1 %1168  ;;  %v1223_v35 = vpop.permute.xlu0 %1222 }
 0x1ff   : > { %v1173_v38 = vadd.f32 %v1169_v34, %v1159_v28  ;;  %v1228_v39 = vadd.f32 %v1223_v35, %v1214_v33  ;;  %v1701_v28 = vmul.f32 %v1699_v50, %v3252_v26  ;;  %v1728_v33 = vmul.f32 %v1727_v60, %v3212_v23 }
 0x200   : > { %1564 = vrot.lane.b32.xlu1 %v1559_v6, %s2372_s30  ;;  %1590 = vrot.lane.b32.xlu0 %v1586_v51, %s2374_s15  ;;  %v3263_v6 = vld [vmem:[#allocation3 + $0x26] sm:$0xff]  ;;  %v1819_v51 = vstv %s3242_s28  ;;  %s1896_s28 = scalar_lea.sflag [#allocation8], %s2516_s8 }
 0x201   : > { %v3207_v4 = vadd.f32 %v1228_v39, %v3147_v47 }
 0x202   : > { %v1183_v11 = vpop.permute.xlu1 %1182  ;;  %v1245_v43 = vpop.permute.xlu0 %1244 }
 0x203   : > { %v1187_v46 = vadd.f32 %v1183_v11, %v1173_v38  ;;  %v1250_v17 = vadd.f32 %v1245_v43, %v1234_v14  ;;  %v1326_v38 = vmul.f32 %v1325_v8, %v2987_v21  ;;  %v1793_v11 = vmul.f32 %v1791_v29, %v3263_v6 }
 0x204   : > { %1656 = vrot.lane.b32.xlu1 %v1651_v44, %s2372_s30  ;;  %1682 = vrot.lane.b32.xlu0 %v1678_v9, %s2374_s15  ;;  %v1820_v43 = vmul.f32 %v1819_v51, %v3221_v45 }
 0x206   : > { %v1197_v47 = vpop.permute.xlu1 %1196  ;;  %v1259_v32 = vpop.permute.xlu0 %1258 }
 0x207   : > { %v1201_v55 = vadd.f32 %v1197_v47, %v1187_v46  ;;  %v1264_v56 = vadd.f32 %v1259_v32, %v1250_v17  ;;  %v1741_v46 = vstv %s3255_s6  ;;  %v1715_v17 = vmul.f32 %v1713_v61, %v3252_v26 }
 0x208   : > { %1578 = vrot.lane.b32.xlu1 %v1573_v52, %s2373_s13  ;;  %1704 = vrot.lane.b32.xlu0 %v1700_v54, %s2369_s29  ;;  %v1742_v50 = vmul.f32 %v1741_v46, %v3212_v23  ;;  %v1833_v52 = vstv %s3266_s9  ;;  %s2275_s9 = sshll.u32 %s2375_s22, 4  ;;  %s2276_s9 = int_to_ptr.vmem [resolvable:$false] %s2275_s9 }
 0x209   : > { %v1834_v29 = vmul.f32 %v1833_v52, %v3221_v45 }
 0x20a   : > { %v1211_v62 = vpop.permute.xlu1 %1210  ;;  %v1273_v19 = vpop.permute.xlu0 %1272 }
 0x20b   : > { %v1215_v24 = vadd.f32 %v1211_v62, %v1201_v55  ;;  %v1278_v36 = vadd.f32 %v1273_v19, %v1264_v56  ;;  %v1807_v56 = vmul.f32 %v1805_v53, %v3263_v6 }
 0x20c   : > { %1670 = vrot.lane.b32.xlu1 %v1665_v63, %s2373_s13  ;;  %1796 = vrot.lane.b32.xlu0 %v1792_v0, %s2369_s29  ;;  %v1755_v63 = vstv %s3275_s12  ;;  %s2277_s12 = scalar_lea.vmem %s2276_s9, 512 }
 0x20d   : > { %v1756_v61 = vmul.f32 %v1755_v63, %v3212_v23 }
 0x20e   : > { %v1225_v5 = vpop.permute.xlu1 %1224  ;;  %v1287_v7 = vpop.permute.xlu0 %1286 }
 0x20f   : > { %v1229_v58 = vadd.f32 %v1225_v5, %v1215_v24  ;;  %v1292_v12 = vadd.f32 %v1287_v7, %v1278_v36  ;;  %v1729_v36 = vmul.f32 %v1727_v60, %v3252_v26  ;;  %v1743_v60 = vmul.f32 %v1741_v46, %v3252_v26 }
 0x210   : > { %1592 = vrot.lane.b32.xlu1 %v1587_v42, %s2374_s15  ;;  %1718 = vrot.lane.b32.xlu0 %v1714_v10, %s2370_s7  ;;  %v1847_v42 = vstv %s3282_s11  ;;  %v1419_v10 = vmul.f32 %v1417_v3, %v3061_v31 }
 0x211   : > { %v3247_v13 = vadd.f32 %v1229_v58, %v3183_v20  ;;  %v1327_v58 = vmul.f32 %v1325_v8, %v3024_v57  ;;  %v1835_v8 = vmul.f32 %v1833_v52, %v3263_v6 }
 0x212   : > { %v1247_v49 = vpop.permute.xlu1 %1246  ;;  %v1301_v16 = vpop.permute.xlu0 %1300 }
 0x213   : > { %v1251_v30 = vadd.f32 %v1247_v49, %v1235_v15  ;;  %v1306_v25 = vadd.f32 %v1301_v16, %v1292_v12  ;;  %v1821_v49 = vmul.f32 %v1819_v51, %v3263_v6  ;;  %v1848_v16 = vmul.f32 %v1847_v42, %v3221_v45 }
 0x214   : > { %1684 = vrot.lane.b32.xlu1 %v1679_v18, %s2374_s15  ;;  %1810 = vrot.lane.b32.xlu0 %v1806_v22, %s2370_s7 }
 0x216   : > { %v1261_v20 = vpop.permute.xlu1 %1260  ;;  %v1315_v27 = vpop.permute.xlu0 %1314 }
 0x217   : > { %v1265_v34 = vadd.f32 %v1261_v20, %v1251_v30  ;;  %v1320_v35 = vadd.f32 %v1315_v27, %v1306_v25  ;;  %v1861_v27 = vstv %s3296_s14 }
 0x218   : > { %1706 = vrot.lane.b32.xlu1 %v1701_v28, %s2369_s29  ;;  %1732 = vrot.lane.b32.xlu0 %v1728_v33, %s2371_s10 }
 0x219   : > { %v1420_v39 = vadd.f32 %v1418_v37, %v1320_v35 }
 0x21a   : > { %v1275_v41 = vpop.permute.xlu1 %1274  ;;  %v1337_v14 = vpop.permute.xlu0 %1336 }
 0x21b   : > { %v1279_v44 = vadd.f32 %v1275_v41, %v1265_v34  ;;  %v1342_v9 = vadd.f32 %v1337_v14, %v1326_v38  ;;  %v1862_v34 = vmul.f32 %v1861_v27, %v3221_v45 }
 0x21c   : > { %1798 = vrot.lane.b32.xlu1 %v1793_v11, %s2369_s29  ;;  %1824 = vrot.lane.b32.xlu0 %v1820_v43, %s2371_s10  ;;  %s3289_s29 = sld [smem:[#allocation5 + $0x5a]] }
 0x21e   : > { %v1289_v59 = vpop.permute.xlu1 %1288  ;;  %v1351_v21 = vpop.permute.xlu0 %1350 }
 0x21f   : > { %v1293_v47 = vadd.f32 %v1289_v59, %v1279_v44  ;;  %v1356_v32 = vadd.f32 %v1351_v21, %v1342_v9  ;;  %v1849_v44 = vmul.f32 %v1847_v42, %v3263_v6 }
 0x220   : > { %1720 = vrot.lane.b32.xlu1 %v1715_v17, %s2370_s7  ;;  %1746 = vrot.lane.b32.xlu0 %v1742_v50, %s2372_s30 }
 0x222   : > { %v1303_v54 = vpop.permute.xlu1 %1302  ;;  %v1365_v55 = vpop.permute.xlu0 %1364  ;;  %v1769_v30 = vstv %s3289_s29 }
 0x223   : > { %v1307_v62 = vadd.f32 %v1303_v54, %v1293_v47  ;;  %v1370_v19 = vadd.f32 %v1365_v55, %v1356_v32  ;;  %v1770_v57 = vmul.f32 %v1769_v30, %v3212_v23  ;;  %v1771_v17 = vmul.f32 %v1769_v30, %v3252_v26 }
 0x224   : > { %1812 = vrot.lane.b32.xlu1 %v1807_v56, %s2370_s7  ;;  %1838 = vrot.lane.b32.xlu0 %v1834_v29, %s2372_s30  ;;  %s3318_s7 = sld [smem:[#allocation5 + $0x46]]  ;;  %v1863_v55 = vmul.f32 %v1861_v27, %v3263_v6 }
 0x226   : > { %v1317_v0 = vpop.permute.xlu1 %1316  ;;  %v1379_v24 = vpop.permute.xlu0 %1378 }
 0x227   : > { %v1321_v5 = vadd.f32 %v1317_v0, %v1307_v62  ;;  %v1384_v7 = vadd.f32 %v1379_v24, %v1370_v19 }
 0x228   : > { %1734 = vrot.lane.b32.xlu1 %v1729_v36, %s2371_s10  ;;  %1760 = vrot.lane.b32.xlu0 %v1756_v61, %s2373_s13 }
 0x229   : > { %v1421_v12 = vadd.f32 %v1419_v10, %v1321_v5 }
 0x22a   : > { %v1339_v53 = vpop.permute.xlu1 %1338  ;;  %v1429_v15 = vpop.permute.xlu0 %1428  ;;  %v1509_v32 = vstv %s3318_s7 }
 0x22b   : > { %v1343_v18 = vadd.f32 %v1339_v53, %v1327_v58  ;;  %v1434_v22 = vadd.f32 %v1429_v15, %v1420_v39  ;;  %v1757_v39 = vmul.f32 %v1755_v63, %v3252_v26  ;;  %v1510_v62 = vmul.f32 %v1509_v32, %v3101_v1 }
 0x22c   : > { %1826 = vrot.lane.b32.xlu1 %v1821_v49, %s2371_s10  ;;  %1852 = vrot.lane.b32.xlu0 %v1848_v16, %s2373_s13  ;;  %s3322_s10 = sld [smem:[#allocation5 + $0x4d]]  ;;  %v1511_v30 = vmul.f32 %v1509_v32, %v3138_v40 }
 0x22e   : > { %v1353_v31 = vpop.permute.xlu1 %1352  ;;  %v1443_v25 = vpop.permute.xlu0 %1442 }
 0x22f   : > { %v1357_v3 = vadd.f32 %v1353_v31, %v1343_v18  ;;  %v1448_v20 = vadd.f32 %v1443_v25, %v1434_v22 }
 0x230   : > { %1748 = vrot.lane.b32.xlu1 %v1743_v60, %s2372_s30  ;;  %1774 = vrot.lane.b32.xlu0 %v1770_v57, %s2374_s15 }
 0x232   : > { %v1367_v28 = vpop.permute.xlu1 %1366  ;;  %v1457_v33 = vpop.permute.xlu0 %1456  ;;  %v1601_v19 = vstv %s3322_s10 }
 0x233   : > { %v1371_v35 = vadd.f32 %v1367_v28, %v1357_v3  ;;  %v1462_v51 = vadd.f32 %v1457_v33, %v1448_v20  ;;  %v1602_v5 = vmul.f32 %v1601_v19, %v3111_v2  ;;  %v1603_v2 = vmul.f32 %v1601_v19, %v3149_v48 }
 0x234   : > { %1840 = vrot.lane.b32.xlu1 %v1835_v8, %s2372_s30  ;;  %1866 = vrot.lane.b32.xlu0 %v1862_v34, %s2374_s15  ;;  %s3334_s30 = sld [smem:[#allocation5 + $0x54]] }
 0x236   : > { %v1381_v37 = vpop.permute.xlu1 %1380  ;;  %v1471_v38 = vpop.permute.xlu0 %1470 }
 0x237   : > { %v1385_v41 = vadd.f32 %v1381_v37, %v1371_v35  ;;  %v1476_v14 = vadd.f32 %v1471_v38, %v1462_v51 }
 0x238   : > { %1762 = vrot.lane.b32.xlu1 %v1757_v39, %s2373_s13 }
 0x23a   : > { %v1431_v11 = vpop.permute.xlu1 %1430  ;;  %v1393_v43 = vpop.permute.xlu0 %1392 }
 0x23b   : > { %v1435_v9 = vadd.f32 %v1431_v11, %v1421_v12  ;;  %v1398_v46 = vadd.f32 %v1393_v43, %v1384_v7 }
 0x23c   : > { %1854 = vrot.lane.b32.xlu1 %v1849_v44, %s2373_s13  ;;  %s3336_s13 = sld [smem:[#allocation5 + $0x5b]] }
 0x23e   : > { %v1445_v59 = vpop.permute.xlu1 %1444  ;;  %v1485_v21 = vpop.permute.xlu0 %1484 }
 0x23f   : > { %v1449_v50 = vadd.f32 %v1445_v59, %v1435_v9  ;;  %v1490_v47 = vadd.f32 %v1485_v21, %v1476_v14  ;;  %v1693_v9 = vstv %s3334_s30 }
 0x240   : > { %1776 = vrot.lane.b32.xlu1 %v1771_v17, %s2374_s15  ;;  %v1694_v32 = vmul.f32 %v1693_v9, %v3212_v23 }
 0x242   : > { %v1459_v52 = vpop.permute.xlu1 %1458  ;;  %v1407_v54 = vpop.permute.xlu0 %1406 }
 0x243   : > { %v1463_v56 = vadd.f32 %v1459_v52, %v1449_v50  ;;  %v1412_v29 = vadd.f32 %v1407_v54, %v1398_v46  ;;  %v1785_v52 = vstv %s3336_s13 }
 0x244   : > { %1868 = vrot.lane.b32.xlu1 %v1863_v55, %s2374_s15  ;;  %v1786_v19 = vmul.f32 %v1785_v52, %v3221_v45  ;;  %s2002_s15 = sshll.u32 %s2516_s8, 4 }
 0x245   : > { %v1512_v63 = vadd.f32 %v1510_v62, %v1412_v29  ;;  %s153_s16 = scalar_lea.vmem [#allocation9], %s2002_s15 }
 0x246   : > { %v1473_v0 = vpop.permute.xlu1 %1472  ;;  %v1499_v24 = vpop.permute.xlu0 %1498  ;;  %s1909_s18 = sshll.u32 %s153_s16, 4  ;;  %s3353_s18 = int_to_ptr.vmem [resolvable:$true] %s1909_s18 }
 0x247   : > { %v1477_v36 = vadd.f32 %v1473_v0, %v1463_v56  ;;  %v1504_v61 = vadd.f32 %v1499_v24, %v1490_v47  ;;  %s2271_s6 = scalar_lea.vmem %s3353_s18, 256  ;;  %p2278_p10 = scmp.lt.s32.totalorder %s3353_s18, %s2276_s9 }
 0x248   : > { %p2272_p11 = scmp.ne.s32.totalorder %s3353_s18, %s2271_s6  ;;  %p2279_p2 = scmp.lt.s32.totalorder %s2277_s12, %s2271_s6 }
 0x249   : > { %v1604_v7 = vadd.f32 %v1602_v5, %v1504_v61 }
 0x24a   : > { %v1395_v42 = vpop.permute.xlu1 %1394  ;;  %v1521_v10 = vpop.permute.xlu0 %1520  ;;  %p2273_p0 = pnand %p2272_p11, %p3413_p12  ;;  %p2280_p6 = por %p2279_p2, %p2278_p10 }
 0x24b   : > { %v1399_v58 = vadd.f32 %v1395_v42, %v1385_v41  ;;  %v1526_v12 = vadd.f32 %v1521_v10, %v1512_v63 }
 0x24c   : > { %p2274_p3 = pneg %p2273_p0 }
 0x24e   : > { %v1487_v53 = vpop.permute.xlu1 %1486  ;;  %v1613_v15 = vpop.permute.xlu0 %1612  ;;  %p2281_p9 = pnand %p2280_p6, %p2274_p3 }
 0x24f   : > { %v1491_v49 = vadd.f32 %v1487_v53, %v1477_v36  ;;  %v1618_v16 = vadd.f32 %v1613_v15, %v1604_v7 }
 0x252   : > { %v1409_v1 = vpop.permute.xlu1 %1408  ;;  %v1535_v18 = vpop.permute.xlu0 %1534 }
 0x253   : > { %v1413_v22 = vadd.f32 %v1409_v1, %v1399_v58  ;;  %v1540_v41 = vadd.f32 %v1535_v18, %v1526_v12 }
 0x255   : > { %v1513_v31 = vadd.f32 %v1511_v30, %v1413_v22 }
 0x256   : > { %v1501_v25 = vpop.permute.xlu1 %1500  ;;  %v1627_v60 = vpop.permute.xlu0 %1626 }
 0x257   : > { %v1505_v57 = vadd.f32 %v1501_v25, %v1491_v49  ;;  %v1632_v43 = vadd.f32 %v1627_v60, %v1618_v16  ;;  %v1695_v16 = vmul.f32 %v1693_v9, %v3252_v26 }
 0x259   : > { %v1605_v3 = vadd.f32 %v1603_v2, %v1505_v57 }
 0x25a   : > { %v1523_v20 = vpop.permute.xlu1 %1522  ;;  %v1549_v27 = vpop.permute.xlu0 %1548 }
 0x25b   : > { %v1527_v28 = vadd.f32 %v1523_v20, %v1513_v31  ;;  %v1554_v48 = vadd.f32 %v1549_v27, %v1540_v41  ;;  %v1787_v31 = vmul.f32 %v1785_v52, %v3263_v6 }
 0x25e   : > { %v1615_v33 = vpop.permute.xlu1 %1614  ;;  %v1641_v8 = vpop.permute.xlu0 %1640 }
 0x25f   : > { %v1619_v34 = vadd.f32 %v1615_v33, %v1605_v3  ;;  %v1646_v46 = vadd.f32 %v1641_v8, %v1632_v43 }
 0x262   : > { %v1537_v35 = vpop.permute.xlu1 %1536  ;;  %v1563_v51 = vpop.permute.xlu0 %1562 }
 0x263   : > { %v1568_v44 = vadd.f32 %v1563_v51, %v1554_v48  ;;  %v1541_v36 = vadd.f32 %v1537_v35, %v1527_v28 }
 0x266   : > { %v1629_v37 = vpop.permute.xlu1 %1628  ;;  %v1655_v38 = vpop.permute.xlu0 %1654 }
 0x267   : > { %v1660_v50 = vadd.f32 %v1655_v38, %v1646_v46  ;;  %v1633_v42 = vadd.f32 %v1629_v37, %v1619_v34 }
 0x26a   : > { %v1551_v40 = vpop.permute.xlu1 %1550  ;;  %v1577_v39 = vpop.permute.xlu0 %1576 }
 0x26b   : > { %v1582_v59 = vadd.f32 %v1577_v39, %v1568_v44  ;;  %v1555_v61 = vadd.f32 %v1551_v40, %v1541_v36 }
 0x26e   : > { %v1643_v14 = vpop.permute.xlu1 %1642  ;;  %v1669_v11 = vpop.permute.xlu0 %1668 }
 0x26f   : > { %v1674_v54 = vadd.f32 %v1669_v11, %v1660_v50  ;;  %v1647_v58 = vadd.f32 %v1643_v14, %v1633_v42 }
 0x272   : > { %v1565_v21 = vpop.permute.xlu1 %1564  ;;  %v1591_v17 = vpop.permute.xlu0 %1590 }
 0x273   : > { %v1596_v47 = vadd.f32 %v1591_v17, %v1582_v59  ;;  %v1569_v10 = vadd.f32 %v1565_v21, %v1555_v61 }
 0x275   : > { %v1696_v55 = vadd.f32 %v1694_v32, %v1596_v47 }
 0x276   : > { %v1657_v56 = vpop.permute.xlu1 %1656  ;;  %v1683_v29 = vpop.permute.xlu0 %1682 }
 0x277   : > { %v1688_v62 = vadd.f32 %v1683_v29, %v1674_v54  ;;  %v1661_v15 = vadd.f32 %v1657_v56, %v1647_v58 }
 0x279   : > { %v1788_v63 = vadd.f32 %v1786_v19, %v1688_v62 }
 0x27a   : > { %v1579_v0 = vpop.permute.xlu1 %1578  ;;  %v1705_v24 = vpop.permute.xlu0 %1704 }
 0x27b   : > { %v1583_v12 = vadd.f32 %v1579_v0, %v1569_v10  ;;  %v1710_v35 = vadd.f32 %v1705_v24, %v1696_v55 }
 0x27e   : > { %v1671_v5 = vpop.permute.xlu1 %1670  ;;  %v1797_v7 = vpop.permute.xlu0 %1796 }
 0x27f   : > { %v1675_v1 = vadd.f32 %v1671_v5, %v1661_v15  ;;  %v1802_v26 = vadd.f32 %v1797_v7, %v1788_v63 }
 0x282   : > { %v1593_v23 = vpop.permute.xlu1 %1592  ;;  %v1719_v53 = vpop.permute.xlu0 %1718 }
 0x283   : > { %v1597_v49 = vadd.f32 %v1593_v23, %v1583_v12  ;;  %v1724_v38 = vadd.f32 %v1719_v53, %v1710_v35 }
 0x285   : > { %v1697_v18 = vadd.f32 %v1695_v16, %v1597_v49 }
 0x286   : > { %v1685_v45 = vpop.permute.xlu1 %1684  ;;  %v1811_v22 = vpop.permute.xlu0 %1810 }
 0x287   : > { %v1689_v30 = vadd.f32 %v1685_v45, %v1675_v1  ;;  %v1816_v40 = vadd.f32 %v1811_v22, %v1802_v26 }
 0x289   : > { %v1789_v25 = vadd.f32 %v1787_v31, %v1689_v30 }
 0x28a   : > { %v1707_v60 = vpop.permute.xlu1 %1706  ;;  %v1733_v57 = vpop.permute.xlu0 %1732 }
 0x28b   : > { %v1738_v39 = vadd.f32 %v1733_v57, %v1724_v38  ;;  %v1711_v32 = vadd.f32 %v1707_v60, %v1697_v18 }
 0x28e   : > { %v1799_v2 = vpop.permute.xlu1 %1798  ;;  %v1825_v3 = vpop.permute.xlu0 %1824 }
 0x28f   : > { %v1830_v41 = vadd.f32 %v1825_v3, %v1816_v40  ;;  %v1803_v52 = vadd.f32 %v1799_v2, %v1789_v25 }
 0x292   : > { %v1721_v20 = vpop.permute.xlu1 %1720  ;;  %v1747_v27 = vpop.permute.xlu0 %1746 }
 0x293   : > { %v1752_v14 = vadd.f32 %v1747_v27, %v1738_v39  ;;  %v1725_v56 = vadd.f32 %v1721_v20, %v1711_v32 }
 0x296   : > { %v1813_v28 = vpop.permute.xlu1 %1812  ;;  %v1839_v33 = vpop.permute.xlu0 %1838 }
 0x297   : > { %v1844_v11 = vadd.f32 %v1839_v33, %v1830_v41  ;;  %v1817_v29 = vadd.f32 %v1813_v28, %v1803_v52 }
 0x29a   : > { %v1735_v8 = vpop.permute.xlu1 %1734  ;;  %v1761_v34 = vpop.permute.xlu0 %1760 }
 0x29b   : > { %v1766_v43 = vadd.f32 %v1761_v34, %v1752_v14  ;;  %v1739_v62 = vadd.f32 %v1735_v8, %v1725_v56 }
 0x29e   : > { %v1827_v51 = vpop.permute.xlu1 %1826  ;;  %v1853_v37 = vpop.permute.xlu0 %1852 }
 0x29f   : > { %v1858_v44 = vadd.f32 %v1853_v37, %v1844_v11  ;;  %v1831_v19 = vadd.f32 %v1827_v51, %v1817_v29 }
 0x2a2   : > { %v1749_v6 = vpop.permute.xlu1 %1748  ;;  %v1775_v48 = vpop.permute.xlu0 %1774 }
 0x2a3   : > { %v1780_v59 = vadd.f32 %v1775_v48, %v1766_v43  ;;  %v1753_v0 = vadd.f32 %v1749_v6, %v1739_v62 }
 0x2a6   : > { %v1841_v9 = vpop.permute.xlu1 %1840  ;;  %v1867_v46 = vpop.permute.xlu0 %1866 }
 0x2a7   : > { %v1872_v21 = vadd.f32 %v1867_v46, %v1858_v44  ;;  %v1845_v24 = vadd.f32 %v1841_v9, %v1831_v19 }
 0x2a9   : > { %v1876_v17 = vadd.f32 %v1872_v21, %v1780_v59 }
 0x2aa   : > { %v1763_v50 = vpop.permute.xlu1 %1762 }
 0x2ab   : > { %v1878_v47 = vadd.f32 %v1876_v17, %v3207_v4  ;;  %v1767_v36 = vadd.f32 %v1763_v50, %v1753_v0 }
 0x2ad   : > { %v2132_v54 = vmul.f32 -1.442695, %v1878_v47 }
 0x2ae   : > { %v1855_v55 = vpop.permute.xlu1 %1854 }
 0x2af   : > { %2223 = vpow2.f32 %v2132_v54  ;;  %v1859_v61 = vadd.f32 %v1855_v55, %v1845_v24 }
 0x2b2   : > { %v1777_v63 = vpop.permute.xlu1 %1776 }
 0x2b3   : > { %v1781_v7 = vadd.f32 %v1777_v63, %v1767_v36 }
 0x2b6   : > { %v1869_v5 = vpop.permute.xlu1 %1868 }
 0x2b7   : > { %v1873_v42 = vadd.f32 %v1869_v5, %v1859_v61 }
 0x2b9   : > { %v2224_v4 = vpop.eup %2223  ;;  %v1877_v10 = vadd.f32 %v1873_v42, %v1781_v7 }
 0x2ba   : > { %v1886_v58 = vadd.f32 1.0, %v2224_v4 }
 0x2bb   : > { %v1879_v12 = vadd.f32 %v1877_v10, %v3247_v13 }
 0x2bc   : > { %2225 = vrcp.f32 %v1886_v58 }
 0x2bd   : > { %v2133_v23 = vmul.f32 -1.442695, %v1879_v12 }
 0x2bf   : > { %2227 = vpow2.f32 %v2133_v23 }
 0x2c6   : > { %v2226_v53 = vpop.eup %2225 }
 0x2c7   : > { %1893 = vst.msk [vmem:[%s153_s16] sm:$0xff] %vm1892_vm5, %v2226_v53 }
 0x2c9   : > { %v2228_v15 = vpop.eup %2227 }
 0x2ca   : > { %v1887_v49 = vadd.f32 1.0, %v2228_v15 }
 0x2cc   : > { %2229 = vrcp.f32 %v1887_v49 }
 0x2d6   : > { %v2230_v13 = vpop.eup %2229 }
 0x2d7   : > { %1894 = vst.msk [vmem:[%s153_s16 + $0x8] sm:$0xff] %vm1892_vm5, %v2230_v13 }
 0x2d8   : > { %2284 = shalt.err (!%p2281_p9)
}
 0x2d9   : > { %s2285_s11 = scalar_lea.hbm %s3351_s27, 256  ;;  %s2289_s7 = scalar_lea.hbm %s3404_s2, 512 }
 0x2da   : > { %p2286_p7 = scmp.ne.s32.totalorder %s3351_s27, %s2285_s11  ;;  %p2290_p4 = scmp.lt.u32.totalorder %s3351_s27, %s3404_s2 }
 0x2db   : > { %p2291_p5 = scmp.lt.u32.totalorder %s2289_s7, %s2285_s11  ;;  %p2293_p11 = scmp.lt.u32.totalorder %s2285_s11, %s3351_s27 }
 0x2dc   : > { %p2287_p13 = pnand %p2286_p7, %p3413_p12 }
 0x2dd   : > { %p2292_p8 = por %p2291_p5, %p2290_p4 }
 0x2de   : > { %p2288_p1 = pneg %p2287_p13 }
 0x2df   : > { %p2294_p0 = por %p2293_p11, %p2292_p8 }
 0x2e1   : > { %p2295_p3 = pnand %p2294_p0, %p2288_p1 }
 0x2e3   : > { %2298 = shalt.err (!%p2295_p3)
}
 0x2e4   : > { %s2376_s13 = smov 128   ;;  %s2377_s15 = smov 8  }
 0x2e5   : > { %2143 = dma.vmem_to_hbm [thread:$0]  (%p3413_p12), %s3353_s18, 256, %s3351_s27, %s1896_s28, %s2376_s13, %s2376_s13, %s2377_s15  }
 0x2e6 PF: > { %s1924_s16 = sand.u32 1, %s2335_s19   ;;  %p3414_p10 = scmp.ne.s32.totalorder %s3409_s5, 0 }
 0x2e7   : > { %p3415_p2 = scmp.ge.s32.totalorder %s2355_s24, 2  ;;  %s1925_s17 = scalar_lea.sflag [#allocation8], %s1924_s16 }
 0x2e9   : > { %p2150_p6 = pnand %p3415_p2, %p3414_p10 }
 0x2eb   : > { %2330 = dma.done.wait (!%p2150_p6), %s1925_s17, 256  }
 0x2ec   : > { %2332 = vsyncadd (!%p2150_p6), %s1925_s17, 4294967040  ;;  %s22_s24 = sadd.s32 1, %s2355_s24   ;;  %s3416_s19 = smov %s2339_s20 }
 0x2ed   : > { %p19_p9 = scmp.ge.s32.totalorder %s22_s24, 4   ;;  %s3417_s20 = smov %s2343_s21 }
 0x2ee   : > { %s3418_s21 = smov %s2461_s4  ;;  %s3419_s22 = smov %s2351_s23 }
 0x2ef   : > { %s3420_s23 = smov %s3422_s26  ;;  %21 = sbr.rel (!%p19_p9) target bundleno = 18 (0x12), region = 85 }
 0x2f6   :  { %1930 = vsyncpa [#allocation7], 1 }
 0x2f7   :  { %1932 = vsyncpa [#allocation7 + $0x1], 1 }
 0x2f8   :  { %1933 = vsyncpa [#allocation8], 1 }
 0x2f9   :  { %1935 = vsyncpa [#allocation8 + $0x1], 1 }

</bundles_post_ra>
